<compile_context>
chip_gen: v5e
topology: v5e:2x2
jax: 0.10.0
libtpu: 0.0.40
codegen_flags: <defaults>
</compile_context>

<pallas_src>
import functools
import math

import jax
import jax.numpy as jnp
from jax.experimental import pallas as pl
from jax.experimental.pallas import tpu as pltpu


# --------------------------- feature probes / limits --------------------------

_SINGLE_BUFFER_WEIGHTS = False  # resolved eagerly in __main__ (never inside jit)


def _probe_single_buffer_support():
    """Check (eagerly, outside any trace) that pipeline_mode=pl.Buffered(1) lowers."""
    global _SINGLE_BUFFER_WEIGHTS
    try:
        def k(x_ref, o_ref):
            o_ref[...] = x_ref[...] + 1.0

        spec = pl.BlockSpec((8, 128), lambda i: (0, 0),
                            pipeline_mode=pl.Buffered(1))
        r = pl.pallas_call(
            k,
            out_shape=jax.ShapeDtypeStruct((8, 128), jnp.float32),
            grid=(2,),
            in_specs=[spec],
            out_specs=pl.BlockSpec((8, 128), lambda i: (0, 0)),
        )(jnp.zeros((8, 128), jnp.float32))
        jax.block_until_ready(r)
        _SINGLE_BUFFER_WEIGHTS = True
    except Exception:
        _SINGLE_BUFFER_WEIGHTS = False


@functools.lru_cache(maxsize=1)
def _vmem_limit_bytes():
    try:
        cap = int(pltpu.get_tpu_info().vmem_capacity_bytes)
    except Exception:
        cap = 64 * 1024 * 1024
    return max(32 * 1024 * 1024, (cap * 3) // 4)


def _const_spec(shape):
    """BlockSpec for an operand whose block never changes across the grid.

    Single-buffered when supported (weights are resident, not streamed), which
    halves their VMEM footprint (important for v7x's 64 MiB VMEM).
    """
    idx = lambda *args: (0,) * len(shape)
    if _SINGLE_BUFFER_WEIGHTS:
        return pl.BlockSpec(shape, idx, pipeline_mode=pl.Buffered(1))
    return pl.BlockSpec(shape, idx)


# ------------------------------ in-kernel helpers ----------------------------

def _ln(x, g, b):
    """LayerNorm on an f32 (rows, D) tile; g/b are (1, D)."""
    mu = jnp.mean(x, axis=-1, keepdims=True)
    var = jnp.mean(jnp.square(x - mu), axis=-1, keepdims=True)
    return (x - mu) * jax.lax.rsqrt(var + 1e-5) * g + b


def _gelu(x):
    # tanh-approx GELU ("gelu_new", as used by GPT-2) -- f32 math (EUP tanh).
    return 0.5 * x * (1.0 + jnp.tanh(0.7978845608028654 *
                                     (x + 0.044715 * x * x * x)))


def _mha(qh, kh, vh, mask):
    """Batched-over-heads attention.

    qh: (H, Tq, dh) bf16 (softmax scale already folded into the Q projection),
    kh/vh: (H, S, dh) bf16, mask: (Tq, S) additive f32 or None.
    Returns (H, Tq, dh) f32.  Scores and PV are single batched MXU issues,
    softmax statistics stay f32, divide via approx reciprocal on the EUP.
    """
    s = jax.lax.dot_general(qh, kh, (((2,), (2,)), ((0,), (0,))),
                            preferred_element_type=jnp.float32)      # (H,Tq,S)
    if mask is not None:
        s = s + mask[None, :, :]
    m = jnp.max(s, axis=-1, keepdims=True)
    p = jnp.exp(s - m)
    inv = pl.reciprocal(jnp.sum(p, axis=-1, keepdims=True), approx=True)
    p = (p * inv).astype(jnp.bfloat16)
    return jax.lax.dot_general(p, vh, (((2,), (1,)), ((0,), (0,))),
                               preferred_element_type=jnp.float32)   # (H,Tq,dh)


# --------------------------------- kernels -----------------------------------

def _cross_attn_block_kernel(x_ref, kv_ref, lng_ref, lnb_ref,
                             wq_ref, bq_ref, wk_ref, bk_ref, wv_ref, bv_ref,
                             wo_ref, bo_ref, gate_ref, o_ref,
                             k_s, v_s, q_s, oh_s, *, H):
    """Gated cross-attn:  x_tile + tanh(gate) * (MHA(LN(x_tile), kv) Wo + bo).

    Grid = (batch, query-tile).  K/V are projected once per batch (t == 0) into
    head-split VMEM scratch and reused for every query tile of that batch.
    """
    t = pl.program_id(1)
    D = x_ref.shape[2]
    dh = D // H

    @pl.when(t == 0)
    def _():
        kvb = kv_ref[0].astype(jnp.bfloat16)                         # (S, D)
        kf = (jnp.dot(kvb, wk_ref[...], preferred_element_type=jnp.float32)
              + bk_ref[...])
        vf = (jnp.dot(kvb, wv_ref[...], preferred_element_type=jnp.float32)
              + bv_ref[...])
        for h in range(H):
            lo = h * dh
            k_s[h] = kf[:, lo:lo + dh].astype(jnp.bfloat16)
            v_s[h] = vf[:, lo:lo + dh].astype(jnp.bfloat16)

    x = x_ref[0].astype(jnp.float32)                                 # (bt, D)
    xn = _ln(x, lng_ref[...], lnb_ref[...]).astype(jnp.bfloat16)
    q = (jnp.dot(xn, wq_ref[...], preferred_element_type=jnp.float32)
         + bq_ref[...]).astype(jnp.bfloat16)        # 1/sqrt(dh) folded into wq
    for h in range(H):
        q_s[h] = q[:, h * dh:(h + 1) * dh]

    o = _mha(q_s[...], k_s[...], v_s[...], None)                     # (H,bt,dh)
    for h in range(H):
        oh_s[:, h * dh:(h + 1) * dh] = o[h].astype(jnp.bfloat16)
    y = (jnp.dot(oh_s[...], wo_ref[...], preferred_element_type=jnp.float32)
         + bo_ref[...])                                              # one K=D matmul
    o_ref[0] = (x + y * gate_ref[...]).astype(o_ref.dtype)


def _self_attn_block_kernel(xf_ref, xt_ref, pad_ref, lng_ref, lnb_ref,
                            wq_ref, bq_ref, wkv_ref, bkv_ref, wo_ref, bo_ref,
                            o_ref, k_s, v_s, q_s, oh_s, *, H):
    """GPT-2 self-attention:  x_tile + (causal MHA(LN(x)) c_proj + b).

    Grid = (batch, query-tile).  Full-sequence LN + K/V projection happen once
    per batch (t == 0) into head-split VMEM scratch; each query tile only does
    its own LN + Q projection + attention + output projection.
    """
    t = pl.program_id(1)
    T = xf_ref.shape[1]
    D = xf_ref.shape[2]
    dh = D // H
    bt = xt_ref.shape[1]

    @pl.when(t == 0)
    def _():
        xf = xf_ref[0].astype(jnp.float32)                           # (T, D)
        xn = _ln(xf, lng_ref[...], lnb_ref[...]).astype(jnp.bfloat16)
        kv = (jnp.dot(xn, wkv_ref[...], preferred_element_type=jnp.float32)
              + bkv_ref[...])                                        # (T, 2D)
        for h in range(H):
            lo = h * dh
            k_s[h] = kv[:, lo:lo + dh].astype(jnp.bfloat16)
            v_s[h] = kv[:, D + lo:D + lo + dh].astype(jnp.bfloat16)

    x_t = xt_ref[0].astype(jnp.float32)                              # (bt, D)
    xn_t = _ln(x_t, lng_ref[...], lnb_ref[...]).astype(jnp.bfloat16)
    q = (jnp.dot(xn_t, wq_ref[...], preferred_element_type=jnp.float32)
         + bq_ref[...]).astype(jnp.bfloat16)        # 1/sqrt(dh) folded into wq
    for h in range(H):
        q_s[h] = q[:, h * dh:(h + 1) * dh]

    # Causal + padding mask built on the VPU (no HBM mask tensor).
    start = t * bt
    row = jax.lax.broadcasted_iota(jnp.int32, (bt, T), 0) + start
    col = jax.lax.broadcasted_iota(jnp.int32, (bt, T), 1)
    mask = jnp.where(col <= row, 0.0, -1e9).astype(jnp.float32) + pad_ref[0]

    o = _mha(q_s[...], k_s[...], v_s[...], mask)                     # (H,bt,dh)
    for h in range(H):
        oh_s[:, h * dh:(h + 1) * dh] = o[h].astype(jnp.bfloat16)
    y = (jnp.dot(oh_s[...], wo_ref[...], preferred_element_type=jnp.float32)
         + bo_ref[...])
    o_ref[0] = (x_t + y).astype(o_ref.dtype)


def _ln_mlp_block_kernel(x_ref, lng_ref, lnb_ref, w1_ref, b1_ref,
                         w2_ref, b2_ref, gate_ref, o_ref, xn_s, acc_s):
    """x + gate * MLP(LN(x)), F-tiled.

    Grid = (row-block, F-chunk).  LN result cached in bf16 scratch at k == 0,
    per-chunk GELU-MLP accumulated into f32 scratch, epilogue at the last chunk.
    """
    k = pl.program_id(1)

    @pl.when(k == 0)
    def _():
        x = x_ref[...].astype(jnp.float32)
        xn_s[...] = _ln(x, lng_ref[...], lnb_ref[...]).astype(jnp.bfloat16)
        acc_s[...] = jnp.zeros_like(acc_s)

    h = (jnp.dot(xn_s[...], w1_ref[...], preferred_element_type=jnp.float32)
         + b1_ref[...])
    h = _gelu(h).astype(jnp.bfloat16)
    acc_s[...] += jnp.dot(h, w2_ref[...], preferred_element_type=jnp.float32)

    @pl.when(k == pl.num_programs(1) - 1)
    def _():
        x = x_ref[...].astype(jnp.float32)
        y = acc_s[...] + b2_ref[...]
        o_ref[...] = (x + y * gate_ref[...]).astype(o_ref.dtype)


# ------------------------------ tile choosers ---------------------------------

def _pick_seq_block(T, H, budget=12 << 20):
    """Largest query tile (multiple of 8, divisor of T) whose f32 score tile
    (H, bt, T) stays under `budget` bytes."""
    for c in (512, 256, 128, 64, 32, 16, 8):
        if c <= T and T % c == 0 and 4 * H * c * T <= budget:
            return c
    for c in (8, 16, 32, 64, 128, 256, 512):
        if c <= T and T % c == 0:
            return c
    return T


def _pick_mlp_tiles(M, D, F, budget=24 << 20):
    """(row block, F chunk) so streamed weight chunks + activations fit VMEM."""
    bf = F
    for c in (2048, 1024, 512, 256, 128):
        if c <= F and F % c == 0 and 8 * D * c <= budget // 2:
            bf = c
            break
    else:
        for c in (128, 256, 512, 1024, 2048):
            if c <= F and F % c == 0:
                bf = c
                break
    wbytes = 8 * D * bf                       # w1 + w2 chunks, bf16, 2 buffers

    def cost(bm):
        return bm * D * 18 + bm * bf * 6 + wbytes

    bm = M
    for c in (1024, 512, 256, 128, 64, 32, 16, 8):
        if c <= M and M % c == 0 and cost(c) <= budget:
            bm = c
            break
    return bm, bf


# ------------------------------ host wrappers ---------------------------------

def cross_attn_block(x, kv, lng, lnb, wq, bq, wk, bk, wv, bv, wo, bo, gate, H):
    B, T, D = x.shape
    S = kv.shape[1]
    dh = D // H
    bt = _pick_seq_block(T, H)
    nt = T // bt
    kern = functools.partial(_cross_attn_block_kernel, H=H)
    cost = pl.CostEstimate(
        flops=int(B * (4 * T * D * D + 4 * S * D * D + 4 * T * S * D)),
        transcendentals=int(B * H * T * S),
        bytes_accessed=int(8 * B * T * D + 4 * B * S * D + 8 * D * D + 24 * D))
    return pl.pallas_call(
        kern,
        out_shape=jax.ShapeDtypeStruct((B, T, D), x.dtype),
        grid=(B, nt),
        in_specs=[pl.BlockSpec((1, bt, D), lambda b, t: (b, t, 0)),
                  pl.BlockSpec((1, S, D), lambda b, t: (b, 0, 0)),
                  _const_spec((1, D)), _const_spec((1, D)),
                  _const_spec((D, D)), _const_spec((1, D)),
                  _const_spec((D, D)), _const_spec((1, D)),
                  _const_spec((D, D)), _const_spec((1, D)),
                  _const_spec((D, D)), _const_spec((1, D)),
                  _const_spec((1, 1))],
        out_specs=pl.BlockSpec((1, bt, D), lambda b, t: (b, t, 0)),
        scratch_shapes=[pltpu.VMEM((H, S, dh), jnp.bfloat16),   # K (head-split)
                        pltpu.VMEM((H, S, dh), jnp.bfloat16),   # V
                        pltpu.VMEM((H, bt, dh), jnp.bfloat16),  # Q
                        pltpu.VMEM((bt, D), jnp.bfloat16)],     # merged heads
        compiler_params=pltpu.CompilerParams(
            dimension_semantics=("parallel", "arbitrary"),
            vmem_limit_bytes=_vmem_limit_bytes()),
        cost_estimate=cost,
    )(x, kv, lng.reshape(1, D), lnb.reshape(1, D),
      wq, bq.reshape(1, D), wk, bk.reshape(1, D), wv, bv.reshape(1, D),
      wo, bo.reshape(1, D), gate)


def self_attn_block(x, pad, lng, lnb, wq, bq, wkv, bkv, wo, bo, H):
    B, T, D = x.shape
    dh = D // H
    bt = _pick_seq_block(T, H)
    nt = T // bt
    kern = functools.partial(_self_attn_block_kernel, H=H)
    cost = pl.CostEstimate(
        flops=int(B * (8 * T * D * D + 4 * T * T * D)),
        transcendentals=int(B * H * T * T),
        bytes_accessed=int(8 * B * T * D + 4 * B * T + 8 * D * D + 24 * D))
    return pl.pallas_call(
        kern,
        out_shape=jax.ShapeDtypeStruct((B, T, D), x.dtype),
        grid=(B, nt),
        in_specs=[pl.BlockSpec((1, T, D), lambda b, t: (b, 0, 0)),   # full seq
                  pl.BlockSpec((1, bt, D), lambda b, t: (b, t, 0)),  # query tile
                  pl.BlockSpec((1, 1, T), lambda b, t: (b, 0, 0)),   # pad mask
                  _const_spec((1, D)), _const_spec((1, D)),
                  _const_spec((D, D)), _const_spec((1, D)),
                  _const_spec((D, 2 * D)), _const_spec((1, 2 * D)),
                  _const_spec((D, D)), _const_spec((1, D))],
        out_specs=pl.BlockSpec((1, bt, D), lambda b, t: (b, t, 0)),
        scratch_shapes=[pltpu.VMEM((H, T, dh), jnp.bfloat16),   # K (head-split)
                        pltpu.VMEM((H, T, dh), jnp.bfloat16),   # V
                        pltpu.VMEM((H, bt, dh), jnp.bfloat16),  # Q
                        pltpu.VMEM((bt, D), jnp.bfloat16)],     # merged heads
        compiler_params=pltpu.CompilerParams(
            dimension_semantics=("parallel", "arbitrary"),
            vmem_limit_bytes=_vmem_limit_bytes()),
        cost_estimate=cost,
    )(x, x, pad, lng.reshape(1, D), lnb.reshape(1, D),
      wq, bq.reshape(1, D), wkv, bkv.reshape(1, 2 * D),
      wo, bo.reshape(1, D))


def ln_mlp_block(x, lng, lnb, w1, b1, w2, b2, gate):
    B, T, D = x.shape
    M = B * T
    F = w1.shape[1]
    bm, bf = _pick_mlp_tiles(M, D, F)
    x2d = x.reshape(M, D)
    cost = pl.CostEstimate(
        flops=int(4 * M * D * F),
        transcendentals=int(M * F + M),
        bytes_accessed=int(8 * M * D + 4 * D * F + 4 * F + 16 * D))
    out = pl.pallas_call(
        _ln_mlp_block_kernel,
        out_shape=jax.ShapeDtypeStruct((M, D), x.dtype),
        grid=(M // bm, F // bf),
        in_specs=[pl.BlockSpec((bm, D), lambda i, k: (i, 0)),
                  _const_spec((1, D)), _const_spec((1, D)),
                  pl.BlockSpec((D, bf), lambda i, k: (0, k)),
                  pl.BlockSpec((1, bf), lambda i, k: (0, k)),
                  pl.BlockSpec((bf, D), lambda i, k: (k, 0)),
                  _const_spec((1, D)),
                  _const_spec((1, 1))],
        out_specs=pl.BlockSpec((bm, D), lambda i, k: (i, 0)),
        scratch_shapes=[pltpu.VMEM((bm, D), jnp.bfloat16),      # LN(x) cache
                        pltpu.VMEM((bm, D), jnp.float32)],      # accumulator
        compiler_params=pltpu.CompilerParams(
            dimension_semantics=("parallel", "arbitrary"),
            vmem_limit_bytes=_vmem_limit_bytes()),
        cost_estimate=cost,
    )(x2d, lng.reshape(1, D), lnb.reshape(1, D),
      w1, b1.reshape(1, F), w2, b2.reshape(1, D), gate)
    return out.reshape(B, T, D)


# ----------------------------- parameter setup --------------------------------

def init_params(key, D, H, F):
    def w(k, shape):
        # weights stored bf16 (MXU operands); biases / LN params stay f32.
        return (0.02 * jax.random.normal(k, shape, jnp.float32)).astype(jnp.bfloat16)

    ks = jax.random.split(key, 16)
    p = {
        "H": H,
        # --- gxd_block: gated cross-attention-dense (Flamingo style) ---
        "ca_ln_g": jnp.ones((D,), jnp.float32), "ca_ln_b": jnp.zeros((D,), jnp.float32),
        "wq": w(ks[0], (D, D)), "bq": jnp.zeros((D,), jnp.float32),
        "wk": w(ks[1], (D, D)), "bk": jnp.zeros((D,), jnp.float32),
        "wv": w(ks[2], (D, D)), "bv": jnp.zeros((D,), jnp.float32),
        "wo": w(ks[3], (D, D)), "bo": jnp.zeros((D,), jnp.float32),
        "ff_ln_g": jnp.ones((D,), jnp.float32), "ff_ln_b": jnp.zeros((D,), jnp.float32),
        "ff_w1": w(ks[4], (D, F)), "ff_b1": jnp.zeros((F,), jnp.float32),
        "ff_w2": w(ks[5], (F, D)), "ff_b2": jnp.zeros((D,), jnp.float32),
        # Flamingo inits gates to 0 (identity); non-zero so the path is exercised.
        "attn_gate": jnp.float32(0.5), "ff_gate": jnp.float32(0.5),
        # --- original_block: GPT-2 style LM block ---
        "ln1_g": jnp.ones((D,), jnp.float32), "ln1_b": jnp.zeros((D,), jnp.float32),
        "c_attn_w": w(ks[6], (D, 3 * D)), "c_attn_b": jnp.zeros((3 * D,), jnp.float32),
        "c_proj_w": w(ks[7], (D, D)), "c_proj_b": jnp.zeros((D,), jnp.float32),
        "ln2_g": jnp.ones((D,), jnp.float32), "ln2_b": jnp.zeros((D,), jnp.float32),
        "mlp_w1": w(ks[8], (D, F)), "mlp_b1": jnp.zeros((F,), jnp.float32),
        "mlp_w2": w(ks[9], (F, D)), "mlp_b2": jnp.zeros((D,), jnp.float32),
    }
    return p


# ------------------------------ forward pass ----------------------------------

def modified_lm_block_forward(p, hidden_states, vis_kv, attention_mask):
    """hidden_states: (B,T,D); vis_kv: (B,S,D) = gxd_block.kv set via condition();
    attention_mask: (B,1,1,T) additive (0 / -inf or -1e4) padding mask."""
    B, T, D = hidden_states.shape
    H = p["H"]
    dh = D // H
    scale = 1.0 / math.sqrt(dh)

    # Clamp so a fully-masked row can never produce exp(-inf - (-inf)) = NaN.
    pad = jnp.maximum(attention_mask.reshape(B, 1, T).astype(jnp.float32),
                      jnp.float32(-1e9))
    attn_gate = jnp.tanh(p["attn_gate"]).reshape(1, 1)
    ff_gate = jnp.tanh(p["ff_gate"]).reshape(1, 1)
    one_gate = jnp.ones((1, 1), jnp.float32)

    # Fold the 1/sqrt(dh) softmax scale into the Q projections (constant-folded
    # under jit since params are closed over) -> no per-token scale in-kernel.
    wq_ca = (p["wq"].astype(jnp.float32) * scale).astype(p["wq"].dtype)
    bq_ca = p["bq"] * scale
    wq_sa = (p["c_attn_w"][:, :D].astype(jnp.float32) * scale
             ).astype(p["c_attn_w"].dtype)
    bq_sa = p["c_attn_b"][:D] * scale
    wkv_sa = p["c_attn_w"][:, D:]
    bkv_sa = p["c_attn_b"][D:]

    # ---- gxd_block(hidden_states, mask_padding=None, mask_causal=None) ----
    x = cross_attn_block(hidden_states, vis_kv,
                         p["ca_ln_g"], p["ca_ln_b"],
                         wq_ca, bq_ca, p["wk"], p["bk"], p["wv"], p["bv"],
                         p["wo"], p["bo"], attn_gate, H)
    x = ln_mlp_block(x, p["ff_ln_g"], p["ff_ln_b"],
                     p["ff_w1"], p["ff_b1"], p["ff_w2"], p["ff_b2"], ff_gate)

    # ---- original_block (GPT-2 block); layer_past / head_mask /
    # encoder_hidden_states / encoder_attention_mask = None ----
    x = self_attn_block(x, pad, p["ln1_g"], p["ln1_b"],
                        wq_sa, bq_sa, wkv_sa, bkv_sa,
                        p["c_proj_w"], p["c_proj_b"], H)
    x = ln_mlp_block(x, p["ln2_g"], p["ln2_b"],
                     p["mlp_w1"], p["mlp_b1"], p["mlp_w2"], p["mlp_b2"], one_gate)

    # TODO(synk): use_cache / output_attentions paths (present KV, attn probs)
    # are not returned; HF returns a tuple, so we mimic (hidden_states,).
    return (x,)


# --------------------------- pure-JAX reference --------------------------------

def _reference_forward(p, hidden_states, vis_kv, attention_mask):
    H = p["H"]
    B, T, D = hidden_states.shape
    dh = D // H
    scale = 1.0 / math.sqrt(dh)
    f32 = jnp.float32

    def ln(x, g, b):
        mu = jnp.mean(x, -1, keepdims=True)
        var = jnp.mean(jnp.square(x - mu), -1, keepdims=True)
        return (x - mu) * jax.lax.rsqrt(var + 1e-5) * g + b

    def gelu(x):
        return 0.5 * x * (1.0 + jnp.tanh(0.7978845608028654 *
                                         (x + 0.044715 * x ** 3)))

    def mha(q, k, v, mask):
        qh = q.reshape(q.shape[0], q.shape[1], H, dh).transpose(0, 2, 1, 3)
        kh = k.reshape(k.shape[0], k.shape[1], H, dh).transpose(0, 2, 1, 3)
        vh = v.reshape(v.shape[0], v.shape[1], H, dh).transpose(0, 2, 1, 3)
        s = jnp.einsum("bhqd,bhkd->bhqk", qh, kh) * scale
        if mask is not None:
            s = s + mask
        pr = jax.nn.softmax(s, axis=-1)
        o = jnp.einsum("bhqk,bhkd->bhqd", pr, vh)
        return o.transpose(0, 2, 1, 3).reshape(q.shape)

    x = hidden_states.astype(f32)
    kvx = vis_kv.astype(f32)
    xn = ln(x, p["ca_ln_g"], p["ca_ln_b"])
    q = xn @ p["wq"].astype(f32) + p["bq"]
    k = kvx @ p["wk"].astype(f32) + p["bk"]
    v = kvx @ p["wv"].astype(f32) + p["bv"]
    a = mha(q, k, v, None) @ p["wo"].astype(f32) + p["bo"]
    x = x + jnp.tanh(p["attn_gate"]) * a
    xn = ln(x, p["ff_ln_g"], p["ff_ln_b"])
    h = gelu(xn @ p["ff_w1"].astype(f32) + p["ff_b1"])
    x = x + jnp.tanh(p["ff_gate"]) * (h @ p["ff_w2"].astype(f32) + p["ff_b2"])

    pad = jnp.maximum(attention_mask.reshape(B, 1, 1, T).astype(f32), -1e9)
    causal = jnp.where(jnp.arange(T)[:, None] >= jnp.arange(T)[None, :],
                       0.0, -1e9).astype(f32)
    mask = causal[None, None] + pad
    xn = ln(x, p["ln1_g"], p["ln1_b"])
    qkv = xn @ p["c_attn_w"].astype(f32) + p["c_attn_b"]
    q, k, v = qkv[..., :D], qkv[..., D:2 * D], qkv[..., 2 * D:]
    a = mha(q, k, v, mask) @ p["c_proj_w"].astype(f32) + p["c_proj_b"]
    x = x + a
    xn = ln(x, p["ln2_g"], p["ln2_b"])
    h = gelu(xn @ p["mlp_w1"].astype(f32) + p["mlp_b1"])
    x = x + h @ p["mlp_w2"].astype(f32) + p["mlp_b2"]
    return x


# ---------------------------------- main ---------------------------------------

if __name__ == "__main__":
    _probe_single_buffer_support()   # eager, outside any trace

    B, T, S, D, H, F = 2, 8, 16, 32, 4, 128
    key = jax.random.PRNGKey(0)
    k_param, k_h, k_v = jax.random.split(key, 3)

    params = init_params(k_param, D, H, F)
    hidden_states = jax.random.normal(k_h, (B, T, D), jnp.float32)
    vis_kv = jax.random.normal(k_v, (B, S, D), jnp.float32)        # set via condition()
    attention_mask = jnp.zeros((B, 1, 1, T), jnp.float32)          # no padding

    fwd = jax.jit(functools.partial(modified_lm_block_forward, params))
    out = fwd(hidden_states, vis_kv, attention_mask)
    jax.block_until_ready(out)

    assert out[0].shape == (B, T, D)
    assert bool(jnp.all(jnp.isfinite(out[0])))

    ref = _reference_forward(params, hidden_states, vis_kv, attention_mask)
    max_err = float(jnp.max(jnp.abs(out[0].astype(jnp.float32) - ref)))
    assert max_err < 5e-2, f"mismatch vs reference: {max_err}"

    print("KERNEL_OK")
</pallas_src>

<mosaic_0001>
module attributes {stable_mosaic.version = 11 : i64} {
  func.func @k(%arg0: i32, %arg1: memref<8x128xf32, #tpu.memory_space<vmem>>, %arg2: memref<8x128xf32, #tpu.memory_space<vmem>>) attributes {dimension_semantics = [#tpu.dimension_semantics<arbitrary>], iteration_bounds = array<i64: 2>, scalar_prefetch = 0 : i64, scratch_operands = 0 : i64, tpu.core_type = #tpu.core_type<tc>, window_params = [{pipeline_mode = #tpu.pipeline_mode<synchronous>, transform_indices = @transform_0, window_bounds = array<i64: 8, 128>}, {pipeline_mode = #tpu.pipeline_mode<synchronous>, transform_indices = @transform_1, window_bounds = array<i64: 8, 128>}]} {
    %c0 = arith.constant 0 : index
    %c0_0 = arith.constant 0 : index
    %0 = vector.load %arg1[%c0, %c0_0] : memref<8x128xf32, #tpu.memory_space<vmem>>, vector<8x128xf32>
    %cst = arith.constant 1.000000e+00 : f32
    %1 = vector.broadcast %cst : f32 to vector<8x128xf32>
    %2 = arith.addf %0, %1 : vector<8x128xf32>
    %c0_1 = arith.constant 0 : index
    %c0_2 = arith.constant 0 : index
    %3 = vector.load %arg2[%c0_1, %c0_2] : memref<8x128xf32, #tpu.memory_space<vmem>>, vector<8x128xf32>
    tpu.vector_store %arg2[%c0_1, %c0_2], %2 {strides = array<i32>} : memref<8x128xf32, #tpu.memory_space<vmem>>, vector<8x128xf32>,
    return
  }
  func.func @transform_0(%arg0: i32) -> (i32, i32) {
    %c0_i32 = arith.constant 0 : i32
    %c0_i32_0 = arith.constant 0 : i32
    %c0_i32_1 = arith.constant 0 : i32
    return %c0_i32, %c0_i32_0 : i32, i32
  }
  func.func @transform_1(%arg0: i32) -> (i32, i32) {
    %c0_i32 = arith.constant 0 : i32
    %c0_i32_0 = arith.constant 0 : i32
    %c0_i32_1 = arith.constant 0 : i32
    return %c0_i32, %c0_i32_0 : i32, i32
  }
}

module attributes {stable_mosaic.version = 11 : i64} {
  func.func @_self_attn_block_kernel(%arg0: i32, %arg1: i32, %arg2: memref<1x8x32xf32, #tpu.memory_space<vmem>>, %arg3: memref<1x8x32xf32, #tpu.memory_space<vmem>>, %arg4: memref<1x1x8xf32, #tpu.memory_space<vmem>>, %arg5: memref<1x32xf32, #tpu.memory_space<vmem>>, %arg6: memref<1x32xf32, #tpu.memory_space<vmem>>, %arg7: memref<32x32xbf16, #tpu.memory_space<vmem>>, %arg8: memref<1x32xf32, #tpu.memory_space<vmem>>, %arg9: memref<32x64xbf16, #tpu.memory_space<vmem>>, %arg10: memref<1x64xf32, #tpu.memory_space<vmem>>, %arg11: memref<32x32xbf16, #tpu.memory_space<vmem>>, %arg12: memref<1x32xf32, #tpu.memory_space<vmem>>, %arg13: memref<1x8x32xf32, #tpu.memory_space<vmem>>, %arg14: memref<4x8x8xbf16, #tpu.memory_space<vmem>>, %arg15: memref<4x8x8xbf16, #tpu.memory_space<vmem>>, %arg16: memref<4x8x8xbf16, #tpu.memory_space<vmem>>, %arg17: memref<8x32xbf16, #tpu.memory_space<vmem>>) attributes {dimension_semantics = [#tpu.dimension_semantics<parallel>, #tpu.dimension_semantics<arbitrary>], iteration_bounds = array<i64: 2, 1>, scalar_prefetch = 0 : i64, scratch_operands = 4 : i64, tpu.core_type = #tpu.core_type<tc>, window_params = [{transform_indices = @transform_0, window_bounds = array<i64: 1, 8, 32>}, {transform_indices = @transform_1, window_bounds = array<i64: 1, 8, 32>}, {transform_indices = @transform_2, window_bounds = array<i64: 1, 1, 8>}, {pipeline_mode = #tpu.pipeline_mode<synchronous>, transform_indices = @transform_3, window_bounds = array<i64: 1, 32>}, {pipeline_mode = #tpu.pipeline_mode<synchronous>, transform_indices = @transform_4, window_bounds = array<i64: 1, 32>}, {pipeline_mode = #tpu.pipeline_mode<synchronous>, transform_indices = @transform_5, window_bounds = array<i64: 32, 32>}, {pipeline_mode = #tpu.pipeline_mode<synchronous>, transform_indices = @transform_6, window_bounds = array<i64: 1, 32>}, {pipeline_mode = #tpu.pipeline_mode<synchronous>, transform_indices = @transform_7, window_bounds = array<i64: 32, 64>}, {pipeline_mode = #tpu.pipeline_mode<synchronous>, transform_indices = @transform_8, window_bounds = array<i64: 1, 64>}, {pipeline_mode = #tpu.pipeline_mode<synchronous>, transform_indices = @transform_9, window_bounds = array<i64: 32, 32>}, {pipeline_mode = #tpu.pipeline_mode<synchronous>, transform_indices = @transform_10, window_bounds = array<i64: 1, 32>}, {transform_indices = @transform_11, window_bounds = array<i64: 1, 8, 32>}]} {
    %c0_i32 = arith.constant 0 : i32
    %0 = arith.cmpi eq, %arg1, %c0_i32 : i32
    %1 = arith.extui %0 : i1 to i32
    %c0_i32_0 = arith.constant 0 : i32
    %2 = arith.cmpi ne, %1, %c0_i32_0 : i32
    scf.if %2 {
      %c0_58 = arith.constant 0 : index
      %c0_59 = arith.constant 0 : index
      %c0_60 = arith.constant 0 : index
      %110 = vector.load %arg2[%c0_58, %c0_59, %c0_60] : memref<1x8x32xf32, #tpu.memory_space<vmem>>, vector<1x8x32xf32>
      %111 = vector.shape_cast %110 : vector<1x8x32xf32> to vector<8x32xf32>
      %c0_61 = arith.constant 0 : index
      %c0_62 = arith.constant 0 : index
      %112 = vector.load %arg5[%c0_61, %c0_62] : memref<1x32xf32, #tpu.memory_space<vmem>>, vector<1x32xf32>
      %c0_63 = arith.constant 0 : index
      %c0_64 = arith.constant 0 : index
      %113 = vector.load %arg6[%c0_63, %c0_64] : memref<1x32xf32, #tpu.memory_space<vmem>>, vector<1x32xf32>
      %cst_65 = arith.constant dense<0.000000e+00> : vector<8xf32>
      %114 = vector.multi_reduction <add>, %111, %cst_65 [1] : vector<8x32xf32> to vector<8xf32>
      %115 = vector.shape_cast %114 : vector<8xf32> to vector<8x1xf32>
      %cst_66 = arith.constant 3.200000e+01 : f32
      %116 = vector.broadcast %cst_66 : f32 to vector<8x1xf32>
      %117 = arith.divf %115, %116 : vector<8x1xf32>
      %118 = vector.broadcast %117 : vector<8x1xf32> to vector<8x32xf32>
      %119 = arith.subf %111, %118 : vector<8x32xf32>
      %120 = arith.mulf %119, %119 : vector<8x32xf32>
      %cst_67 = arith.constant dense<0.000000e+00> : vector<8xf32>
      %121 = vector.multi_reduction <add>, %120, %cst_67 [1] : vector<8x32xf32> to vector<8xf32>
      %122 = vector.shape_cast %121 : vector<8xf32> to vector<8x1xf32>
      %cst_68 = arith.constant 3.200000e+01 : f32
      %123 = vector.broadcast %cst_68 : f32 to vector<8x1xf32>
      %124 = arith.divf %122, %123 : vector<8x1xf32>
      %125 = vector.broadcast %117 : vector<8x1xf32> to vector<8x32xf32>
      %126 = arith.subf %111, %125 : vector<8x32xf32>
      %cst_69 = arith.constant 9.99999974E-6 : f32
      %127 = vector.broadcast %cst_69 : f32 to vector<8x1xf32>
      %128 = arith.addf %124, %127 : vector<8x1xf32>
      %129 = math.rsqrt %128 : vector<8x1xf32>
      %130 = vector.broadcast %129 : vector<8x1xf32> to vector<8x32xf32>
      %131 = arith.mulf %126, %130 : vector<8x32xf32>
      %132 = vector.broadcast %112 : vector<1x32xf32> to vector<8x32xf32>
      %133 = arith.mulf %131, %132 : vector<8x32xf32>
      %134 = vector.broadcast %113 : vector<1x32xf32> to vector<8x32xf32>
      %135 = arith.addf %133, %134 : vector<8x32xf32>
      %136 = arith.truncf %135 : vector<8x32xf32> to vector<8x32xbf16>
      %c0_70 = arith.constant 0 : index
      %c0_71 = arith.constant 0 : index
      %137 = vector.load %arg9[%c0_70, %c0_71] : memref<32x64xbf16, #tpu.memory_space<vmem>>, vector<32x64xbf16>
      %cst_72 = arith.constant dense<0.000000e+00> : vector<8x64xf32>
      %138 = tpu.matmul %136, %137, %cst_72 {dimension_numbers = #tpu.dot_dimension_numbers<[1], [0], [0], [1], [0, 0, 1, 1], [], []>} : vector<8x32xbf16>, vector<32x64xbf16>, vector<8x64xf32> -> vector<8x64xf32>
      %c0_73 = arith.constant 0 : index
      %c0_74 = arith.constant 0 : index
      %139 = vector.load %arg10[%c0_73, %c0_74] : memref<1x64xf32, #tpu.memory_space<vmem>>, vector<1x64xf32>
      %140 = vector.broadcast %139 : vector<1x64xf32> to vector<8x64xf32>
      %141 = arith.addf %138, %140 : vector<8x64xf32>
      %142 = vector.extract_strided_slice %141 {offsets = [0, 0], sizes = [8, 8], strides = [1, 1]} : vector<8x64xf32> to vector<8x8xf32>
      %143 = arith.truncf %142 : vector<8x8xf32> to vector<8x8xbf16>
      %c0_75 = arith.constant 0 : index
      %c0_76 = arith.constant 0 : index
      %c0_77 = arith.constant 0 : index
      %144 = vector.load %arg14[%c0_75, %c0_76, %c0_77] : memref<4x8x8xbf16, #tpu.memory_space<vmem>>, vector<1x8x8xbf16>
      %145 = vector.shape_cast %144 : vector<1x8x8xbf16> to vector<8x8xbf16>
      %146 = vector.shape_cast %143 : vector<8x8xbf16> to vector<1x8x8xbf16>
      tpu.vector_store %arg14[%c0_75, %c0_76, %c0_77], %146 {strides = array<i32>} : memref<4x8x8xbf16, #tpu.memory_space<vmem>>, vector<1x8x8xbf16>,
      %147 = vector.extract_strided_slice %141 {offsets = [0, 32], sizes = [8, 8], strides = [1, 1]} : vector<8x64xf32> to vector<8x8xf32>
      %148 = arith.truncf %147 : vector<8x8xf32> to vector<8x8xbf16>
      %c0_78 = arith.constant 0 : index
      %c0_79 = arith.constant 0 : index
      %c0_80 = arith.constant 0 : index
      %149 = vector.load %arg15[%c0_78, %c0_79, %c0_80] : memref<4x8x8xbf16, #tpu.memory_space<vmem>>, vector<1x8x8xbf16>
      %150 = vector.shape_cast %149 : vector<1x8x8xbf16> to vector<8x8xbf16>
      %151 = vector.shape_cast %148 : vector<8x8xbf16> to vector<1x8x8xbf16>
      tpu.vector_store %arg15[%c0_78, %c0_79, %c0_80], %151 {strides = array<i32>} : memref<4x8x8xbf16, #tpu.memory_space<vmem>>, vector<1x8x8xbf16>,
      %152 = vector.extract_strided_slice %141 {offsets = [0, 8], sizes = [8, 8], strides = [1, 1]} : vector<8x64xf32> to vector<8x8xf32>
      %153 = arith.truncf %152 : vector<8x8xf32> to vector<8x8xbf16>
      %c1_81 = arith.constant 1 : index
      %c0_82 = arith.constant 0 : index
      %c0_83 = arith.constant 0 : index
      %154 = vector.load %arg14[%c1_81, %c0_82, %c0_83] : memref<4x8x8xbf16, #tpu.memory_space<vmem>>, vector<1x8x8xbf16>
      %155 = vector.shape_cast %154 : vector<1x8x8xbf16> to vector<8x8xbf16>
      %156 = vector.shape_cast %153 : vector<8x8xbf16> to vector<1x8x8xbf16>
      tpu.vector_store %arg14[%c1_81, %c0_82, %c0_83], %156 {strides = array<i32>} : memref<4x8x8xbf16, #tpu.memory_space<vmem>>, vector<1x8x8xbf16>,
      %157 = vector.extract_strided_slice %141 {offsets = [0, 40], sizes = [8, 8], strides = [1, 1]} : vector<8x64xf32> to vector<8x8xf32>
      %158 = arith.truncf %157 : vector<8x8xf32> to vector<8x8xbf16>
      %c1_84 = arith.constant 1 : index
      %c0_85 = arith.constant 0 : index
      %c0_86 = arith.constant 0 : index
      %159 = vector.load %arg15[%c1_84, %c0_85, %c0_86] : memref<4x8x8xbf16, #tpu.memory_space<vmem>>, vector<1x8x8xbf16>
      %160 = vector.shape_cast %159 : vector<1x8x8xbf16> to vector<8x8xbf16>
      %161 = vector.shape_cast %158 : vector<8x8xbf16> to vector<1x8x8xbf16>
      tpu.vector_store %arg15[%c1_84, %c0_85, %c0_86], %161 {strides = array<i32>} : memref<4x8x8xbf16, #tpu.memory_space<vmem>>, vector<1x8x8xbf16>,
      %162 = vector.extract_strided_slice %141 {offsets = [0, 16], sizes = [8, 8], strides = [1, 1]} : vector<8x64xf32> to vector<8x8xf32>
      %163 = arith.truncf %162 : vector<8x8xf32> to vector<8x8xbf16>
      %c2_87 = arith.constant 2 : index
      %c0_88 = arith.constant 0 : index
      %c0_89 = arith.constant 0 : index
      %164 = vector.load %arg14[%c2_87, %c0_88, %c0_89] : memref<4x8x8xbf16, #tpu.memory_space<vmem>>, vector<1x8x8xbf16>
      %165 = vector.shape_cast %164 : vector<1x8x8xbf16> to vector<8x8xbf16>
      %166 = vector.shape_cast %163 : vector<8x8xbf16> to vector<1x8x8xbf16>
      tpu.vector_store %arg14[%c2_87, %c0_88, %c0_89], %166 {strides = array<i32>} : memref<4x8x8xbf16, #tpu.memory_space<vmem>>, vector<1x8x8xbf16>,
      %167 = vector.extract_strided_slice %141 {offsets = [0, 48], sizes = [8, 8], strides = [1, 1]} : vector<8x64xf32> to vector<8x8xf32>
      %168 = arith.truncf %167 : vector<8x8xf32> to vector<8x8xbf16>
      %c2_90 = arith.constant 2 : index
      %c0_91 = arith.constant 0 : index
      %c0_92 = arith.constant 0 : index
      %169 = vector.load %arg15[%c2_90, %c0_91, %c0_92] : memref<4x8x8xbf16, #tpu.memory_space<vmem>>, vector<1x8x8xbf16>
      %170 = vector.shape_cast %169 : vector<1x8x8xbf16> to vector<8x8xbf16>
      %171 = vector.shape_cast %168 : vector<8x8xbf16> to vector<1x8x8xbf16>
      tpu.vector_store %arg15[%c2_90, %c0_91, %c0_92], %171 {strides = array<i32>} : memref<4x8x8xbf16, #tpu.memory_space<vmem>>, vector<1x8x8xbf16>,
      %172 = vector.extract_strided_slice %141 {offsets = [0, 24], sizes = [8, 8], strides = [1, 1]} : vector<8x64xf32> to vector<8x8xf32>
      %173 = arith.truncf %172 : vector<8x8xf32> to vector<8x8xbf16>
      %c3_93 = arith.constant 3 : index
      %c0_94 = arith.constant 0 : index
      %c0_95 = arith.constant 0 : index
      %174 = vector.load %arg14[%c3_93, %c0_94, %c0_95] : memref<4x8x8xbf16, #tpu.memory_space<vmem>>, vector<1x8x8xbf16>
      %175 = vector.shape_cast %174 : vector<1x8x8xbf16> to vector<8x8xbf16>
      %176 = vector.shape_cast %173 : vector<8x8xbf16> to vector<1x8x8xbf16>
      tpu.vector_store %arg14[%c3_93, %c0_94, %c0_95], %176 {strides = array<i32>} : memref<4x8x8xbf16, #tpu.memory_space<vmem>>, vector<1x8x8xbf16>,
      %177 = vector.extract_strided_slice %141 {offsets = [0, 56], sizes = [8, 8], strides = [1, 1]} : vector<8x64xf32> to vector<8x8xf32>
      %178 = arith.truncf %177 : vector<8x8xf32> to vector<8x8xbf16>
      %c3_96 = arith.constant 3 : index
      %c0_97 = arith.constant 0 : index
      %c0_98 = arith.constant 0 : index
      %179 = vector.load %arg15[%c3_96, %c0_97, %c0_98] : memref<4x8x8xbf16, #tpu.memory_space<vmem>>, vector<1x8x8xbf16>
      %180 = vector.shape_cast %179 : vector<1x8x8xbf16> to vector<8x8xbf16>
      %181 = vector.shape_cast %178 : vector<8x8xbf16> to vector<1x8x8xbf16>
      tpu.vector_store %arg15[%c3_96, %c0_97, %c0_98], %181 {strides = array<i32>} : memref<4x8x8xbf16, #tpu.memory_space<vmem>>, vector<1x8x8xbf16>,
    } else {
    }
    %c0 = arith.constant 0 : index
    %c0_1 = arith.constant 0 : index
    %c0_2 = arith.constant 0 : index
    %3 = vector.load %arg3[%c0, %c0_1, %c0_2] : memref<1x8x32xf32, #tpu.memory_space<vmem>>, vector<1x8x32xf32>
    %4 = vector.shape_cast %3 : vector<1x8x32xf32> to vector<8x32xf32>
    %c0_3 = arith.constant 0 : index
    %c0_4 = arith.constant 0 : index
    %5 = vector.load %arg5[%c0_3, %c0_4] : memref<1x32xf32, #tpu.memory_space<vmem>>, vector<1x32xf32>
    %c0_5 = arith.constant 0 : index
    %c0_6 = arith.constant 0 : index
    %6 = vector.load %arg6[%c0_5, %c0_6] : memref<1x32xf32, #tpu.memory_space<vmem>>, vector<1x32xf32>
    %cst = arith.constant dense<0.000000e+00> : vector<8xf32>
    %7 = vector.multi_reduction <add>, %4, %cst [1] : vector<8x32xf32> to vector<8xf32>
    %8 = vector.shape_cast %7 : vector<8xf32> to vector<8x1xf32>
    %cst_7 = arith.constant 3.200000e+01 : f32
    %9 = vector.broadcast %cst_7 : f32 to vector<8x1xf32>
    %10 = arith.divf %8, %9 : vector<8x1xf32>
    %11 = vector.broadcast %10 : vector<8x1xf32> to vector<8x32xf32>
    %12 = arith.subf %4, %11 : vector<8x32xf32>
    %13 = arith.mulf %12, %12 : vector<8x32xf32>
    %cst_8 = arith.constant dense<0.000000e+00> : vector<8xf32>
    %14 = vector.multi_reduction <add>, %13, %cst_8 [1] : vector<8x32xf32> to vector<8xf32>
    %15 = vector.shape_cast %14 : vector<8xf32> to vector<8x1xf32>
    %cst_9 = arith.constant 3.200000e+01 : f32
    %16 = vector.broadcast %cst_9 : f32 to vector<8x1xf32>
    %17 = arith.divf %15, %16 : vector<8x1xf32>
    %18 = vector.broadcast %10 : vector<8x1xf32> to vector<8x32xf32>
    %19 = arith.subf %4, %18 : vector<8x32xf32>
    %cst_10 = arith.constant 9.99999974E-6 : f32
    %20 = vector.broadcast %cst_10 : f32 to vector<8x1xf32>
    %21 = arith.addf %17, %20 : vector<8x1xf32>
    %22 = math.rsqrt %21 : vector<8x1xf32>
    %23 = vector.broadcast %22 : vector<8x1xf32> to vector<8x32xf32>
    %24 = arith.mulf %19, %23 : vector<8x32xf32>
    %25 = vector.broadcast %5 : vector<1x32xf32> to vector<8x32xf32>
    %26 = arith.mulf %24, %25 : vector<8x32xf32>
    %27 = vector.broadcast %6 : vector<1x32xf32> to vector<8x32xf32>
    %28 = arith.addf %26, %27 : vector<8x32xf32>
    %29 = arith.truncf %28 : vector<8x32xf32> to vector<8x32xbf16>
    %c0_11 = arith.constant 0 : index
    %c0_12 = arith.constant 0 : index
    %30 = vector.load %arg7[%c0_11, %c0_12] : memref<32x32xbf16, #tpu.memory_space<vmem>>, vector<32x32xbf16>
    %cst_13 = arith.constant dense<0.000000e+00> : vector<8x32xf32>
    %31 = tpu.matmul %29, %30, %cst_13 {dimension_numbers = #tpu.dot_dimension_numbers<[1], [0], [0], [1], [0, 0, 1, 1], [], []>} : vector<8x32xbf16>, vector<32x32xbf16>, vector<8x32xf32> -> vector<8x32xf32>
    %c0_14 = arith.constant 0 : index
    %c0_15 = arith.constant 0 : index
    %32 = vector.load %arg8[%c0_14, %c0_15] : memref<1x32xf32, #tpu.memory_space<vmem>>, vector<1x32xf32>
    %33 = vector.broadcast %32 : vector<1x32xf32> to vector<8x32xf32>
    %34 = arith.addf %31, %33 : vector<8x32xf32>
    %35 = arith.truncf %34 : vector<8x32xf32> to vector<8x32xbf16>
    %36 = vector.extract_strided_slice %35 {offsets = [0, 0], sizes = [8, 8], strides = [1, 1]} : vector<8x32xbf16> to vector<8x8xbf16>
    %c0_16 = arith.constant 0 : index
    %c0_17 = arith.constant 0 : index
    %c0_18 = arith.constant 0 : index
    %37 = vector.load %arg16[%c0_16, %c0_17, %c0_18] : memref<4x8x8xbf16, #tpu.memory_space<vmem>>, vector<1x8x8xbf16>
    %38 = vector.shape_cast %37 : vector<1x8x8xbf16> to vector<8x8xbf16>
    %39 = vector.shape_cast %36 : vector<8x8xbf16> to vector<1x8x8xbf16>
    tpu.vector_store %arg16[%c0_16, %c0_17, %c0_18], %39 {strides = array<i32>} : memref<4x8x8xbf16, #tpu.memory_space<vmem>>, vector<1x8x8xbf16>,
    %40 = vector.extract_strided_slice %35 {offsets = [0, 8], sizes = [8, 8], strides = [1, 1]} : vector<8x32xbf16> to vector<8x8xbf16>
    %c1 = arith.constant 1 : index
    %c0_19 = arith.constant 0 : index
    %c0_20 = arith.constant 0 : index
    %41 = vector.load %arg16[%c1, %c0_19, %c0_20] : memref<4x8x8xbf16, #tpu.memory_space<vmem>>, vector<1x8x8xbf16>
    %42 = vector.shape_cast %41 : vector<1x8x8xbf16> to vector<8x8xbf16>
    %43 = vector.shape_cast %40 : vector<8x8xbf16> to vector<1x8x8xbf16>
    tpu.vector_store %arg16[%c1, %c0_19, %c0_20], %43 {strides = array<i32>} : memref<4x8x8xbf16, #tpu.memory_space<vmem>>, vector<1x8x8xbf16>,
    %44 = vector.extract_strided_slice %35 {offsets = [0, 16], sizes = [8, 8], strides = [1, 1]} : vector<8x32xbf16> to vector<8x8xbf16>
    %c2 = arith.constant 2 : index
    %c0_21 = arith.constant 0 : index
    %c0_22 = arith.constant 0 : index
    %45 = vector.load %arg16[%c2, %c0_21, %c0_22] : memref<4x8x8xbf16, #tpu.memory_space<vmem>>, vector<1x8x8xbf16>
    %46 = vector.shape_cast %45 : vector<1x8x8xbf16> to vector<8x8xbf16>
    %47 = vector.shape_cast %44 : vector<8x8xbf16> to vector<1x8x8xbf16>
    tpu.vector_store %arg16[%c2, %c0_21, %c0_22], %47 {strides = array<i32>} : memref<4x8x8xbf16, #tpu.memory_space<vmem>>, vector<1x8x8xbf16>,
    %48 = vector.extract_strided_slice %35 {offsets = [0, 24], sizes = [8, 8], strides = [1, 1]} : vector<8x32xbf16> to vector<8x8xbf16>
    %c3 = arith.constant 3 : index
    %c0_23 = arith.constant 0 : index
    %c0_24 = arith.constant 0 : index
    %49 = vector.load %arg16[%c3, %c0_23, %c0_24] : memref<4x8x8xbf16, #tpu.memory_space<vmem>>, vector<1x8x8xbf16>
    %50 = vector.shape_cast %49 : vector<1x8x8xbf16> to vector<8x8xbf16>
    %51 = vector.shape_cast %48 : vector<8x8xbf16> to vector<1x8x8xbf16>
    tpu.vector_store %arg16[%c3, %c0_23, %c0_24], %51 {strides = array<i32>} : memref<4x8x8xbf16, #tpu.memory_space<vmem>>, vector<1x8x8xbf16>,
    %c8_i32 = arith.constant 8 : i32
    %52 = arith.muli %arg1, %c8_i32 : i32
    %53 = tpu.iota {dimensions = array<i32: 0>} : vector<8x8xi32>
    %54 = vector.broadcast %52 : i32 to vector<8x8xi32>
    %55 = arith.addi %53, %54 : vector<8x8xi32>
    %56 = tpu.iota {dimensions = array<i32: 1>} : vector<8x8xi32>
    %57 = arith.cmpi sle, %56, %55 : vector<8x8xi32>
    %cst_25 = arith.constant 0.000000e+00 : f32
    %cst_26 = arith.constant -1.000000e+09 : f32
    %58 = vector.broadcast %cst_25 : f32 to vector<8x8xf32>
    %59 = vector.broadcast %cst_26 : f32 to vector<8x8xf32>
    %60 = arith.select %57, %58, %59 : vector<8x8xi1>, vector<8x8xf32>
    %c0_27 = arith.constant 0 : index
    %c0_28 = arith.constant 0 : index
    %c0_29 = arith.constant 0 : index
    %61 = vector.load %arg4[%c0_27, %c0_28, %c0_29] : memref<1x1x8xf32, #tpu.memory_space<vmem>>, vector<1x1x8xf32>
    %62 = vector.shape_cast %61 : vector<1x1x8xf32> to vector<1x8xf32>
    %63 = vector.broadcast %62 : vector<1x8xf32> to vector<8x8xf32>
    %64 = arith.addf %60, %63 : vector<8x8xf32>
    %c0_30 = arith.constant 0 : index
    %c0_31 = arith.constant 0 : index
    %c0_32 = arith.constant 0 : index
    %65 = vector.load %arg16[%c0_30, %c0_31, %c0_32] : memref<4x8x8xbf16, #tpu.memory_space<vmem>>, vector<4x8x8xbf16>
    %c0_33 = arith.constant 0 : index
    %c0_34 = arith.constant 0 : index
    %c0_35 = arith.constant 0 : index
    %66 = vector.load %arg14[%c0_33, %c0_34, %c0_35] : memref<4x8x8xbf16, #tpu.memory_space<vmem>>, vector<4x8x8xbf16>
    %c0_36 = arith.constant 0 : index
    %c0_37 = arith.constant 0 : index
    %c0_38 = arith.constant 0 : index
    %67 = vector.load %arg15[%c0_36, %c0_37, %c0_38] : memref<4x8x8xbf16, #tpu.memory_space<vmem>>, vector<4x8x8xbf16>
    %cst_39 = arith.constant dense<0.000000e+00> : vector<4x8x8xf32>
    %68 = tpu.matmul %65, %66, %cst_39 {dimension_numbers = #tpu.dot_dimension_numbers<[2], [2], [1], [1], [0, 0, 0, 1, 1, 1], [0], [0]>} : vector<4x8x8xbf16>, vector<4x8x8xbf16>, vector<4x8x8xf32> -> vector<4x8x8xf32>
    %69 = vector.shape_cast %64 : vector<8x8xf32> to vector<1x8x8xf32>
    %70 = vector.broadcast %69 : vector<1x8x8xf32> to vector<4x8x8xf32>
    %71 = arith.addf %68, %70 : vector<4x8x8xf32>
    %cst_40 = arith.constant dense<0xFF800000> : vector<4x8xf32>
    %72 = vector.multi_reduction <maximumf>, %71, %cst_40 [2] : vector<4x8x8xf32> to vector<4x8xf32>
    %73 = vector.shape_cast %72 : vector<4x8xf32> to vector<4x8x1xf32>
    %74 = vector.broadcast %73 : vector<4x8x1xf32> to vector<4x8x8xf32>
    %75 = arith.subf %71, %74 : vector<4x8x8xf32>
    %76 = math.exp %75 : vector<4x8x8xf32>
    %cst_41 = arith.constant dense<0.000000e+00> : vector<4x8xf32>
    %77 = vector.multi_reduction <add>, %76, %cst_41 [2] : vector<4x8x8xf32> to vector<4x8xf32>
    %78 = vector.shape_cast %77 : vector<4x8xf32> to vector<4x8x1xf32>
    %79 = tpu.reciprocal %78 {approx = true} : vector<4x8x1xf32> -> vector<4x8x1xf32>
    %80 = vector.broadcast %79 : vector<4x8x1xf32> to vector<4x8x8xf32>
    %81 = arith.mulf %76, %80 : vector<4x8x8xf32>
    %82 = arith.truncf %81 : vector<4x8x8xf32> to vector<4x8x8xbf16>
    %cst_42 = arith.constant dense<0.000000e+00> : vector<4x8x8xf32>
    %83 = tpu.matmul %82, %67, %cst_42 {dimension_numbers = #tpu.dot_dimension_numbers<[2], [1], [1], [2], [0, 0, 0, 1, 1, 2], [0], [0]>} : vector<4x8x8xbf16>, vector<4x8x8xbf16>, vector<4x8x8xf32> -> vector<4x8x8xf32>
    %84 = vector.extract_strided_slice %83 {offsets = [0, 0, 0], sizes = [1, 8, 8], strides = [1, 1, 1]} : vector<4x8x8xf32> to vector<1x8x8xf32>
    %85 = vector.shape_cast %84 : vector<1x8x8xf32> to vector<8x8xf32>
    %86 = arith.truncf %85 : vector<8x8xf32> to vector<8x8xbf16>
    %c0_43 = arith.constant 0 : index
    %c0_44 = arith.constant 0 : index
    %87 = vector.load %arg17[%c0_43, %c0_44] : memref<8x32xbf16, #tpu.memory_space<vmem>>, vector<8x8xbf16>
    tpu.vector_store %arg17[%c0_43, %c0_44], %86 {strides = array<i32>} : memref<8x32xbf16, #tpu.memory_space<vmem>>, vector<8x8xbf16>,
    %88 = vector.extract_strided_slice %83 {offsets = [1, 0, 0], sizes = [1, 8, 8], strides = [1, 1, 1]} : vector<4x8x8xf32> to vector<1x8x8xf32>
    %89 = vector.shape_cast %88 : vector<1x8x8xf32> to vector<8x8xf32>
    %90 = arith.truncf %89 : vector<8x8xf32> to vector<8x8xbf16>
    %c0_45 = arith.constant 0 : index
    %c8 = arith.constant 8 : index
    %91 = vector.load %arg17[%c0_45, %c8] : memref<8x32xbf16, #tpu.memory_space<vmem>>, vector<8x8xbf16>
    tpu.vector_store %arg17[%c0_45, %c8], %90 {strides = array<i32>} : memref<8x32xbf16, #tpu.memory_space<vmem>>, vector<8x8xbf16>,
    %92 = vector.extract_strided_slice %83 {offsets = [2, 0, 0], sizes = [1, 8, 8], strides = [1, 1, 1]} : vector<4x8x8xf32> to vector<1x8x8xf32>
    %93 = vector.shape_cast %92 : vector<1x8x8xf32> to vector<8x8xf32>
    %94 = arith.truncf %93 : vector<8x8xf32> to vector<8x8xbf16>
    %c0_46 = arith.constant 0 : index
    %c16 = arith.constant 16 : index
    %95 = vector.load %arg17[%c0_46, %c16] : memref<8x32xbf16, #tpu.memory_space<vmem>>, vector<8x8xbf16>
    tpu.vector_store %arg17[%c0_46, %c16], %94 {strides = array<i32>} : memref<8x32xbf16, #tpu.memory_space<vmem>>, vector<8x8xbf16>,
    %96 = vector.extract_strided_slice %83 {offsets = [3, 0, 0], sizes = [1, 8, 8], strides = [1, 1, 1]} : vector<4x8x8xf32> to vector<1x8x8xf32>
    %97 = vector.shape_cast %96 : vector<1x8x8xf32> to vector<8x8xf32>
    %98 = arith.truncf %97 : vector<8x8xf32> to vector<8x8xbf16>
    %c0_47 = arith.constant 0 : index
    %c24 = arith.constant 24 : index
    %99 = vector.load %arg17[%c0_47, %c24] : memref<8x32xbf16, #tpu.memory_space<vmem>>, vector<8x8xbf16>
    tpu.vector_store %arg17[%c0_47, %c24], %98 {strides = array<i32>} : memref<8x32xbf16, #tpu.memory_space<vmem>>, vector<8x8xbf16>,
    %c0_48 = arith.constant 0 : index
    %c0_49 = arith.constant 0 : index
    %100 = vector.load %arg17[%c0_48, %c0_49] : memref<8x32xbf16, #tpu.memory_space<vmem>>, vector<8x32xbf16>
    %c0_50 = arith.constant 0 : index
    %c0_51 = arith.constant 0 : index
    %101 = vector.load %arg11[%c0_50, %c0_51] : memref<32x32xbf16, #tpu.memory_space<vmem>>, vector<32x32xbf16>
    %cst_52 = arith.constant dense<0.000000e+00> : vector<8x32xf32>
    %102 = tpu.matmul %100, %101, %cst_52 {dimension_numbers = #tpu.dot_dimension_numbers<[1], [0], [0], [1], [0, 0, 1, 1], [], []>} : vector<8x32xbf16>, vector<32x32xbf16>, vector<8x32xf32> -> vector<8x32xf32>
    %c0_53 = arith.constant 0 : index
    %c0_54 = arith.constant 0 : index
    %103 = vector.load %arg12[%c0_53, %c0_54] : memref<1x32xf32, #tpu.memory_space<vmem>>, vector<1x32xf32>
    %104 = vector.broadcast %103 : vector<1x32xf32> to vector<8x32xf32>
    %105 = arith.addf %102, %104 : vector<8x32xf32>
    %106 = arith.addf %4, %105 : vector<8x32xf32>
    %c0_55 = arith.constant 0 : index
    %c0_56 = arith.constant 0 : index
    %c0_57 = arith.constant 0 : index
    %107 = vector.load %arg13[%c0_55, %c0_56, %c0_57] : memref<1x8x32xf32, #tpu.memory_space<vmem>>, vector<1x8x32xf32>
    %108 = vector.shape_cast %107 : vector<1x8x32xf32> to vector<8x32xf32>
    %109 = vector.shape_cast %106 : vector<8x32xf32> to vector<1x8x32xf32>
    tpu.vector_store %arg13[%c0_55, %c0_56, %c0_57], %109 {strides = array<i32>} : memref<1x8x32xf32, #tpu.memory_space<vmem>>, vector<1x8x32xf32>,
    return
  }
  func.func @transform_0(%arg0: i32, %arg1: i32) -> (i32, i32, i32) {
    %c0_i32 = arith.constant 0 : i32
    %c0_i32_0 = arith.constant 0 : i32
    %c0_i32_1 = arith.constant 0 : i32
    return %arg0, %c0_i32, %c0_i32_0 : i32, i32, i32
  }
  func.func @transform_1(%arg0: i32, %arg1: i32) -> (i32, i32, i32) {
    %c0_i32 = arith.constant 0 : i32
    %c0_i32_0 = arith.constant 0 : i32
    return %arg0, %arg1, %c0_i32 : i32, i32, i32
  }
  func.func @transform_2(%arg0: i32, %arg1: i32) -> (i32, i32, i32) {
    %c0_i32 = arith.constant 0 : i32
    %c0_i32_0 = arith.constant 0 : i32
    %c0_i32_1 = arith.constant 0 : i32
    return %arg0, %c0_i32, %c0_i32_0 : i32, i32, i32
  }
  func.func @transform_3(%arg0: i32, %arg1: i32) -> (i32, i32) {
    %c0_i32 = arith.constant 0 : i32
    %c0_i32_0 = arith.constant 0 : i32
    %c0_i32_1 = arith.constant 0 : i32
    return %c0_i32, %c0_i32_0 : i32, i32
  }
  func.func @transform_4(%arg0: i32, %arg1: i32) -> (i32, i32) {
    %c0_i32 = arith.constant 0 : i32
    %c0_i32_0 = arith.constant 0 : i32
    %c0_i32_1 = arith.constant 0 : i32
    return %c0_i32, %c0_i32_0 : i32, i32
  }
  func.func @transform_5(%arg0: i32, %arg1: i32) -> (i32, i32) {
    %c0_i32 = arith.constant 0 : i32
    %c0_i32_0 = arith.constant 0 : i32
    %c0_i32_1 = arith.constant 0 : i32
    return %c0_i32, %c0_i32_0 : i32, i32
  }
  func.func @transform_6(%arg0: i32, %arg1: i32) -> (i32, i32) {
    %c0_i32 = arith.constant 0 : i32
    %c0_i32_0 = arith.constant 0 : i32
    %c0_i32_1 = arith.constant 0 : i32
    return %c0_i32, %c0_i32_0 : i32, i32
  }
  func.func @transform_7(%arg0: i32, %arg1: i32) -> (i32, i32) {
    %c0_i32 = arith.constant 0 : i32
    %c0_i32_0 = arith.constant 0 : i32
    %c0_i32_1 = arith.constant 0 : i32
    return %c0_i32, %c0_i32_0 : i32, i32
  }
  func.func @transform_8(%arg0: i32, %arg1: i32) -> (i32, i32) {
    %c0_i32 = arith.constant 0 : i32
    %c0_i32_0 = arith.constant 0 : i32
    %c0_i32_1 = arith.constant 0 : i32
    return %c0_i32, %c0_i32_0 : i32, i32
  }
  func.func @transform_9(%arg0: i32, %arg1: i32) -> (i32, i32) {
    %c0_i32 = arith.constant 0 : i32
    %c0_i32_0 = arith.constant 0 : i32
    %c0_i32_1 = arith.constant 0 : i32
    return %c0_i32, %c0_i32_0 : i32, i32
  }
  func.func @transform_10(%arg0: i32, %arg1: i32) -> (i32, i32) {
    %c0_i32 = arith.constant 0 : i32
    %c0_i32_0 = arith.constant 0 : i32
    %c0_i32_1 = arith.constant 0 : i32
    return %c0_i32, %c0_i32_0 : i32, i32
  }
  func.func @transform_11(%arg0: i32, %arg1: i32) -> (i32, i32, i32) {
    %c0_i32 = arith.constant 0 : i32
    %c0_i32_0 = arith.constant 0 : i32
    return %arg0, %arg1, %c0_i32 : i32, i32, i32
  }
}

module attributes {stable_mosaic.version = 11 : i64} {
  func.func @_cross_attn_block_kernel(%arg0: i32, %arg1: i32, %arg2: memref<1x8x32xf32, #tpu.memory_space<vmem>>, %arg3: memref<1x16x32xf32, #tpu.memory_space<vmem>>, %arg4: memref<1x32xf32, #tpu.memory_space<vmem>>, %arg5: memref<1x32xf32, #tpu.memory_space<vmem>>, %arg6: memref<32x32xbf16, #tpu.memory_space<vmem>>, %arg7: memref<1x32xf32, #tpu.memory_space<vmem>>, %arg8: memref<32x32xbf16, #tpu.memory_space<vmem>>, %arg9: memref<1x32xf32, #tpu.memory_space<vmem>>, %arg10: memref<32x32xbf16, #tpu.memory_space<vmem>>, %arg11: memref<1x32xf32, #tpu.memory_space<vmem>>, %arg12: memref<32x32xbf16, #tpu.memory_space<vmem>>, %arg13: memref<1x32xf32, #tpu.memory_space<vmem>>, %arg14: memref<1x1xf32, #tpu.memory_space<vmem>>, %arg15: memref<1x8x32xf32, #tpu.memory_space<vmem>>, %arg16: memref<4x16x8xbf16, #tpu.memory_space<vmem>>, %arg17: memref<4x16x8xbf16, #tpu.memory_space<vmem>>, %arg18: memref<4x8x8xbf16, #tpu.memory_space<vmem>>, %arg19: memref<8x32xbf16, #tpu.memory_space<vmem>>) attributes {dimension_semantics = [#tpu.dimension_semantics<parallel>, #tpu.dimension_semantics<arbitrary>], iteration_bounds = array<i64: 2, 1>, scalar_prefetch = 0 : i64, scratch_operands = 4 : i64, tpu.core_type = #tpu.core_type<tc>, window_params = [{transform_indices = @transform_0, window_bounds = array<i64: 1, 8, 32>}, {transform_indices = @transform_1, window_bounds = array<i64: 1, 16, 32>}, {pipeline_mode = #tpu.pipeline_mode<synchronous>, transform_indices = @transform_2, window_bounds = array<i64: 1, 32>}, {pipeline_mode = #tpu.pipeline_mode<synchronous>, transform_indices = @transform_3, window_bounds = array<i64: 1, 32>}, {pipeline_mode = #tpu.pipeline_mode<synchronous>, transform_indices = @transform_4, window_bounds = array<i64: 32, 32>}, {pipeline_mode = #tpu.pipeline_mode<synchronous>, transform_indices = @transform_5, window_bounds = array<i64: 1, 32>}, {pipeline_mode = #tpu.pipeline_mode<synchronous>, transform_indices = @transform_6, window_bounds = array<i64: 32, 32>}, {pipeline_mode = #tpu.pipeline_mode<synchronous>, transform_indices = @transform_7, window_bounds = array<i64: 1, 32>}, {pipeline_mode = #tpu.pipeline_mode<synchronous>, transform_indices = @transform_8, window_bounds = array<i64: 32, 32>}, {pipeline_mode = #tpu.pipeline_mode<synchronous>, transform_indices = @transform_9, window_bounds = array<i64: 1, 32>}, {pipeline_mode = #tpu.pipeline_mode<synchronous>, transform_indices = @transform_10, window_bounds = array<i64: 32, 32>}, {pipeline_mode = #tpu.pipeline_mode<synchronous>, transform_indices = @transform_11, window_bounds = array<i64: 1, 32>}, {pipeline_mode = #tpu.pipeline_mode<synchronous>, transform_indices = @transform_12, window_bounds = array<i64: 1, 1>}, {transform_indices = @transform_13, window_bounds = array<i64: 1, 8, 32>}]} {
    %c0_i32 = arith.constant 0 : i32
    %0 = arith.cmpi eq, %arg1, %c0_i32 : i32
    %1 = arith.extui %0 : i1 to i32
    %c0_i32_0 = arith.constant 0 : i32
    %2 = arith.cmpi ne, %1, %c0_i32_0 : i32
    scf.if %2 {
      %c0_55 = arith.constant 0 : index
      %c0_56 = arith.constant 0 : index
      %c0_57 = arith.constant 0 : index
      %97 = vector.load %arg3[%c0_55, %c0_56, %c0_57] : memref<1x16x32xf32, #tpu.memory_space<vmem>>, vector<1x16x32xf32>
      %98 = vector.shape_cast %97 : vector<1x16x32xf32> to vector<16x32xf32>
      %99 = arith.truncf %98 : vector<16x32xf32> to vector<16x32xbf16>
      %c0_58 = arith.constant 0 : index
      %c0_59 = arith.constant 0 : index
      %100 = vector.load %arg8[%c0_58, %c0_59] : memref<32x32xbf16, #tpu.memory_space<vmem>>, vector<32x32xbf16>
      %cst_60 = arith.constant dense<0.000000e+00> : vector<16x32xf32>
      %101 = tpu.matmul %99, %100, %cst_60 {dimension_numbers = #tpu.dot_dimension_numbers<[1], [0], [0], [1], [0, 0, 1, 1], [], []>} : vector<16x32xbf16>, vector<32x32xbf16>, vector<16x32xf32> -> vector<16x32xf32>
      %c0_61 = arith.constant 0 : index
      %c0_62 = arith.constant 0 : index
      %102 = vector.load %arg9[%c0_61, %c0_62] : memref<1x32xf32, #tpu.memory_space<vmem>>, vector<1x32xf32>
      %103 = vector.broadcast %102 : vector<1x32xf32> to vector<16x32xf32>
      %104 = arith.addf %101, %103 : vector<16x32xf32>
      %c0_63 = arith.constant 0 : index
      %c0_64 = arith.constant 0 : index
      %105 = vector.load %arg10[%c0_63, %c0_64] : memref<32x32xbf16, #tpu.memory_space<vmem>>, vector<32x32xbf16>
      %cst_65 = arith.constant dense<0.000000e+00> : vector<16x32xf32>
      %106 = tpu.matmul %99, %105, %cst_65 {dimension_numbers = #tpu.dot_dimension_numbers<[1], [0], [0], [1], [0, 0, 1, 1], [], []>} : vector<16x32xbf16>, vector<32x32xbf16>, vector<16x32xf32> -> vector<16x32xf32>
      %c0_66 = arith.constant 0 : index
      %c0_67 = arith.constant 0 : index
      %107 = vector.load %arg11[%c0_66, %c0_67] : memref<1x32xf32, #tpu.memory_space<vmem>>, vector<1x32xf32>
      %108 = vector.broadcast %107 : vector<1x32xf32> to vector<16x32xf32>
      %109 = arith.addf %106, %108 : vector<16x32xf32>
      %110 = vector.extract_strided_slice %104 {offsets = [0, 0], sizes = [16, 8], strides = [1, 1]} : vector<16x32xf32> to vector<16x8xf32>
      %111 = arith.truncf %110 : vector<16x8xf32> to vector<16x8xbf16>
      %c0_68 = arith.constant 0 : index
      %c0_69 = arith.constant 0 : index
      %c0_70 = arith.constant 0 : index
      %112 = vector.load %arg16[%c0_68, %c0_69, %c0_70] : memref<4x16x8xbf16, #tpu.memory_space<vmem>>, vector<1x16x8xbf16>
      %113 = vector.shape_cast %112 : vector<1x16x8xbf16> to vector<16x8xbf16>
      %114 = vector.shape_cast %111 : vector<16x8xbf16> to vector<1x16x8xbf16>
      tpu.vector_store %arg16[%c0_68, %c0_69, %c0_70], %114 {strides = array<i32>} : memref<4x16x8xbf16, #tpu.memory_space<vmem>>, vector<1x16x8xbf16>,
      %115 = vector.extract_strided_slice %109 {offsets = [0, 0], sizes = [16, 8], strides = [1, 1]} : vector<16x32xf32> to vector<16x8xf32>
      %116 = arith.truncf %115 : vector<16x8xf32> to vector<16x8xbf16>
      %c0_71 = arith.constant 0 : index
      %c0_72 = arith.constant 0 : index
      %c0_73 = arith.constant 0 : index
      %117 = vector.load %arg17[%c0_71, %c0_72, %c0_73] : memref<4x16x8xbf16, #tpu.memory_space<vmem>>, vector<1x16x8xbf16>
      %118 = vector.shape_cast %117 : vector<1x16x8xbf16> to vector<16x8xbf16>
      %119 = vector.shape_cast %116 : vector<16x8xbf16> to vector<1x16x8xbf16>
      tpu.vector_store %arg17[%c0_71, %c0_72, %c0_73], %119 {strides = array<i32>} : memref<4x16x8xbf16, #tpu.memory_space<vmem>>, vector<1x16x8xbf16>,
      %120 = vector.extract_strided_slice %104 {offsets = [0, 8], sizes = [16, 8], strides = [1, 1]} : vector<16x32xf32> to vector<16x8xf32>
      %121 = arith.truncf %120 : vector<16x8xf32> to vector<16x8xbf16>
      %c1_74 = arith.constant 1 : index
      %c0_75 = arith.constant 0 : index
      %c0_76 = arith.constant 0 : index
      %122 = vector.load %arg16[%c1_74, %c0_75, %c0_76] : memref<4x16x8xbf16, #tpu.memory_space<vmem>>, vector<1x16x8xbf16>
      %123 = vector.shape_cast %122 : vector<1x16x8xbf16> to vector<16x8xbf16>
      %124 = vector.shape_cast %121 : vector<16x8xbf16> to vector<1x16x8xbf16>
      tpu.vector_store %arg16[%c1_74, %c0_75, %c0_76], %124 {strides = array<i32>} : memref<4x16x8xbf16, #tpu.memory_space<vmem>>, vector<1x16x8xbf16>,
      %125 = vector.extract_strided_slice %109 {offsets = [0, 8], sizes = [16, 8], strides = [1, 1]} : vector<16x32xf32> to vector<16x8xf32>
      %126 = arith.truncf %125 : vector<16x8xf32> to vector<16x8xbf16>
      %c1_77 = arith.constant 1 : index
      %c0_78 = arith.constant 0 : index
      %c0_79 = arith.constant 0 : index
      %127 = vector.load %arg17[%c1_77, %c0_78, %c0_79] : memref<4x16x8xbf16, #tpu.memory_space<vmem>>, vector<1x16x8xbf16>
      %128 = vector.shape_cast %127 : vector<1x16x8xbf16> to vector<16x8xbf16>
      %129 = vector.shape_cast %126 : vector<16x8xbf16> to vector<1x16x8xbf16>
      tpu.vector_store %arg17[%c1_77, %c0_78, %c0_79], %129 {strides = array<i32>} : memref<4x16x8xbf16, #tpu.memory_space<vmem>>, vector<1x16x8xbf16>,
      %130 = vector.extract_strided_slice %104 {offsets = [0, 16], sizes = [16, 8], strides = [1, 1]} : vector<16x32xf32> to vector<16x8xf32>
      %131 = arith.truncf %130 : vector<16x8xf32> to vector<16x8xbf16>
      %c2_80 = arith.constant 2 : index
      %c0_81 = arith.constant 0 : index
      %c0_82 = arith.constant 0 : index
      %132 = vector.load %arg16[%c2_80, %c0_81, %c0_82] : memref<4x16x8xbf16, #tpu.memory_space<vmem>>, vector<1x16x8xbf16>
      %133 = vector.shape_cast %132 : vector<1x16x8xbf16> to vector<16x8xbf16>
      %134 = vector.shape_cast %131 : vector<16x8xbf16> to vector<1x16x8xbf16>
      tpu.vector_store %arg16[%c2_80, %c0_81, %c0_82], %134 {strides = array<i32>} : memref<4x16x8xbf16, #tpu.memory_space<vmem>>, vector<1x16x8xbf16>,
      %135 = vector.extract_strided_slice %109 {offsets = [0, 16], sizes = [16, 8], strides = [1, 1]} : vector<16x32xf32> to vector<16x8xf32>
      %136 = arith.truncf %135 : vector<16x8xf32> to vector<16x8xbf16>
      %c2_83 = arith.constant 2 : index
      %c0_84 = arith.constant 0 : index
      %c0_85 = arith.constant 0 : index
      %137 = vector.load %arg17[%c2_83, %c0_84, %c0_85] : memref<4x16x8xbf16, #tpu.memory_space<vmem>>, vector<1x16x8xbf16>
      %138 = vector.shape_cast %137 : vector<1x16x8xbf16> to vector<16x8xbf16>
      %139 = vector.shape_cast %136 : vector<16x8xbf16> to vector<1x16x8xbf16>
      tpu.vector_store %arg17[%c2_83, %c0_84, %c0_85], %139 {strides = array<i32>} : memref<4x16x8xbf16, #tpu.memory_space<vmem>>, vector<1x16x8xbf16>,
      %140 = vector.extract_strided_slice %104 {offsets = [0, 24], sizes = [16, 8], strides = [1, 1]} : vector<16x32xf32> to vector<16x8xf32>
      %141 = arith.truncf %140 : vector<16x8xf32> to vector<16x8xbf16>
      %c3_86 = arith.constant 3 : index
      %c0_87 = arith.constant 0 : index
      %c0_88 = arith.constant 0 : index
      %142 = vector.load %arg16[%c3_86, %c0_87, %c0_88] : memref<4x16x8xbf16, #tpu.memory_space<vmem>>, vector<1x16x8xbf16>
      %143 = vector.shape_cast %142 : vector<1x16x8xbf16> to vector<16x8xbf16>
      %144 = vector.shape_cast %141 : vector<16x8xbf16> to vector<1x16x8xbf16>
      tpu.vector_store %arg16[%c3_86, %c0_87, %c0_88], %144 {strides = array<i32>} : memref<4x16x8xbf16, #tpu.memory_space<vmem>>, vector<1x16x8xbf16>,
      %145 = vector.extract_strided_slice %109 {offsets = [0, 24], sizes = [16, 8], strides = [1, 1]} : vector<16x32xf32> to vector<16x8xf32>
      %146 = arith.truncf %145 : vector<16x8xf32> to vector<16x8xbf16>
      %c3_89 = arith.constant 3 : index
      %c0_90 = arith.constant 0 : index
      %c0_91 = arith.constant 0 : index
      %147 = vector.load %arg17[%c3_89, %c0_90, %c0_91] : memref<4x16x8xbf16, #tpu.memory_space<vmem>>, vector<1x16x8xbf16>
      %148 = vector.shape_cast %147 : vector<1x16x8xbf16> to vector<16x8xbf16>
      %149 = vector.shape_cast %146 : vector<16x8xbf16> to vector<1x16x8xbf16>
      tpu.vector_store %arg17[%c3_89, %c0_90, %c0_91], %149 {strides = array<i32>} : memref<4x16x8xbf16, #tpu.memory_space<vmem>>, vector<1x16x8xbf16>,
    } else {
    }
    %c0 = arith.constant 0 : index
    %c0_1 = arith.constant 0 : index
    %c0_2 = arith.constant 0 : index
    %3 = vector.load %arg2[%c0, %c0_1, %c0_2] : memref<1x8x32xf32, #tpu.memory_space<vmem>>, vector<1x8x32xf32>
    %4 = vector.shape_cast %3 : vector<1x8x32xf32> to vector<8x32xf32>
    %c0_3 = arith.constant 0 : index
    %c0_4 = arith.constant 0 : index
    %5 = vector.load %arg4[%c0_3, %c0_4] : memref<1x32xf32, #tpu.memory_space<vmem>>, vector<1x32xf32>
    %c0_5 = arith.constant 0 : index
    %c0_6 = arith.constant 0 : index
    %6 = vector.load %arg5[%c0_5, %c0_6] : memref<1x32xf32, #tpu.memory_space<vmem>>, vector<1x32xf32>
    %cst = arith.constant dense<0.000000e+00> : vector<8xf32>
    %7 = vector.multi_reduction <add>, %4, %cst [1] : vector<8x32xf32> to vector<8xf32>
    %8 = vector.shape_cast %7 : vector<8xf32> to vector<8x1xf32>
    %cst_7 = arith.constant 3.200000e+01 : f32
    %9 = vector.broadcast %cst_7 : f32 to vector<8x1xf32>
    %10 = arith.divf %8, %9 : vector<8x1xf32>
    %11 = vector.broadcast %10 : vector<8x1xf32> to vector<8x32xf32>
    %12 = arith.subf %4, %11 : vector<8x32xf32>
    %13 = arith.mulf %12, %12 : vector<8x32xf32>
    %cst_8 = arith.constant dense<0.000000e+00> : vector<8xf32>
    %14 = vector.multi_reduction <add>, %13, %cst_8 [1] : vector<8x32xf32> to vector<8xf32>
    %15 = vector.shape_cast %14 : vector<8xf32> to vector<8x1xf32>
    %cst_9 = arith.constant 3.200000e+01 : f32
    %16 = vector.broadcast %cst_9 : f32 to vector<8x1xf32>
    %17 = arith.divf %15, %16 : vector<8x1xf32>
    %18 = vector.broadcast %10 : vector<8x1xf32> to vector<8x32xf32>
    %19 = arith.subf %4, %18 : vector<8x32xf32>
    %cst_10 = arith.constant 9.99999974E-6 : f32
    %20 = vector.broadcast %cst_10 : f32 to vector<8x1xf32>
    %21 = arith.addf %17, %20 : vector<8x1xf32>
    %22 = math.rsqrt %21 : vector<8x1xf32>
    %23 = vector.broadcast %22 : vector<8x1xf32> to vector<8x32xf32>
    %24 = arith.mulf %19, %23 : vector<8x32xf32>
    %25 = vector.broadcast %5 : vector<1x32xf32> to vector<8x32xf32>
    %26 = arith.mulf %24, %25 : vector<8x32xf32>
    %27 = vector.broadcast %6 : vector<1x32xf32> to vector<8x32xf32>
    %28 = arith.addf %26, %27 : vector<8x32xf32>
    %29 = arith.truncf %28 : vector<8x32xf32> to vector<8x32xbf16>
    %c0_11 = arith.constant 0 : index
    %c0_12 = arith.constant 0 : index
    %30 = vector.load %arg6[%c0_11, %c0_12] : memref<32x32xbf16, #tpu.memory_space<vmem>>, vector<32x32xbf16>
    %cst_13 = arith.constant dense<0.000000e+00> : vector<8x32xf32>
    %31 = tpu.matmul %29, %30, %cst_13 {dimension_numbers = #tpu.dot_dimension_numbers<[1], [0], [0], [1], [0, 0, 1, 1], [], []>} : vector<8x32xbf16>, vector<32x32xbf16>, vector<8x32xf32> -> vector<8x32xf32>
    %c0_14 = arith.constant 0 : index
    %c0_15 = arith.constant 0 : index
    %32 = vector.load %arg7[%c0_14, %c0_15] : memref<1x32xf32, #tpu.memory_space<vmem>>, vector<1x32xf32>
    %33 = vector.broadcast %32 : vector<1x32xf32> to vector<8x32xf32>
    %34 = arith.addf %31, %33 : vector<8x32xf32>
    %35 = arith.truncf %34 : vector<8x32xf32> to vector<8x32xbf16>
    %36 = vector.extract_strided_slice %35 {offsets = [0, 0], sizes = [8, 8], strides = [1, 1]} : vector<8x32xbf16> to vector<8x8xbf16>
    %c0_16 = arith.constant 0 : index
    %c0_17 = arith.constant 0 : index
    %c0_18 = arith.constant 0 : index
    %37 = vector.load %arg18[%c0_16, %c0_17, %c0_18] : memref<4x8x8xbf16, #tpu.memory_space<vmem>>, vector<1x8x8xbf16>
    %38 = vector.shape_cast %37 : vector<1x8x8xbf16> to vector<8x8xbf16>
    %39 = vector.shape_cast %36 : vector<8x8xbf16> to vector<1x8x8xbf16>
    tpu.vector_store %arg18[%c0_16, %c0_17, %c0_18], %39 {strides = array<i32>} : memref<4x8x8xbf16, #tpu.memory_space<vmem>>, vector<1x8x8xbf16>,
    %40 = vector.extract_strided_slice %35 {offsets = [0, 8], sizes = [8, 8], strides = [1, 1]} : vector<8x32xbf16> to vector<8x8xbf16>
    %c1 = arith.constant 1 : index
    %c0_19 = arith.constant 0 : index
    %c0_20 = arith.constant 0 : index
    %41 = vector.load %arg18[%c1, %c0_19, %c0_20] : memref<4x8x8xbf16, #tpu.memory_space<vmem>>, vector<1x8x8xbf16>
    %42 = vector.shape_cast %41 : vector<1x8x8xbf16> to vector<8x8xbf16>
    %43 = vector.shape_cast %40 : vector<8x8xbf16> to vector<1x8x8xbf16>
    tpu.vector_store %arg18[%c1, %c0_19, %c0_20], %43 {strides = array<i32>} : memref<4x8x8xbf16, #tpu.memory_space<vmem>>, vector<1x8x8xbf16>,
    %44 = vector.extract_strided_slice %35 {offsets = [0, 16], sizes = [8, 8], strides = [1, 1]} : vector<8x32xbf16> to vector<8x8xbf16>
    %c2 = arith.constant 2 : index
    %c0_21 = arith.constant 0 : index
    %c0_22 = arith.constant 0 : index
    %45 = vector.load %arg18[%c2, %c0_21, %c0_22] : memref<4x8x8xbf16, #tpu.memory_space<vmem>>, vector<1x8x8xbf16>
    %46 = vector.shape_cast %45 : vector<1x8x8xbf16> to vector<8x8xbf16>
    %47 = vector.shape_cast %44 : vector<8x8xbf16> to vector<1x8x8xbf16>
    tpu.vector_store %arg18[%c2, %c0_21, %c0_22], %47 {strides = array<i32>} : memref<4x8x8xbf16, #tpu.memory_space<vmem>>, vector<1x8x8xbf16>,
    %48 = vector.extract_strided_slice %35 {offsets = [0, 24], sizes = [8, 8], strides = [1, 1]} : vector<8x32xbf16> to vector<8x8xbf16>
    %c3 = arith.constant 3 : index
    %c0_23 = arith.constant 0 : index
    %c0_24 = arith.constant 0 : index
    %49 = vector.load %arg18[%c3, %c0_23, %c0_24] : memref<4x8x8xbf16, #tpu.memory_space<vmem>>, vector<1x8x8xbf16>
    %50 = vector.shape_cast %49 : vector<1x8x8xbf16> to vector<8x8xbf16>
    %51 = vector.shape_cast %48 : vector<8x8xbf16> to vector<1x8x8xbf16>
    tpu.vector_store %arg18[%c3, %c0_23, %c0_24], %51 {strides = array<i32>} : memref<4x8x8xbf16, #tpu.memory_space<vmem>>, vector<1x8x8xbf16>,
    %c0_25 = arith.constant 0 : index
    %c0_26 = arith.constant 0 : index
    %c0_27 = arith.constant 0 : index
    %52 = vector.load %arg18[%c0_25, %c0_26, %c0_27] : memref<4x8x8xbf16, #tpu.memory_space<vmem>>, vector<4x8x8xbf16>
    %c0_28 = arith.constant 0 : index
    %c0_29 = arith.constant 0 : index
    %c0_30 = arith.constant 0 : index
    %53 = vector.load %arg16[%c0_28, %c0_29, %c0_30] : memref<4x16x8xbf16, #tpu.memory_space<vmem>>, vector<4x16x8xbf16>
    %c0_31 = arith.constant 0 : index
    %c0_32 = arith.constant 0 : index
    %c0_33 = arith.constant 0 : index
    %54 = vector.load %arg17[%c0_31, %c0_32, %c0_33] : memref<4x16x8xbf16, #tpu.memory_space<vmem>>, vector<4x16x8xbf16>
    %cst_34 = arith.constant dense<0.000000e+00> : vector<4x8x16xf32>
    %55 = tpu.matmul %52, %53, %cst_34 {dimension_numbers = #tpu.dot_dimension_numbers<[2], [2], [1], [1], [0, 0, 0, 1, 1, 1], [0], [0]>} : vector<4x8x8xbf16>, vector<4x16x8xbf16>, vector<4x8x16xf32> -> vector<4x8x16xf32>
    %cst_35 = arith.constant dense<0xFF800000> : vector<4x8xf32>
    %56 = vector.multi_reduction <maximumf>, %55, %cst_35 [2] : vector<4x8x16xf32> to vector<4x8xf32>
    %57 = vector.shape_cast %56 : vector<4x8xf32> to vector<4x8x1xf32>
    %58 = vector.broadcast %57 : vector<4x8x1xf32> to vector<4x8x16xf32>
    %59 = arith.subf %55, %58 : vector<4x8x16xf32>
    %60 = math.exp %59 : vector<4x8x16xf32>
    %cst_36 = arith.constant dense<0.000000e+00> : vector<4x8xf32>
    %61 = vector.multi_reduction <add>, %60, %cst_36 [2] : vector<4x8x16xf32> to vector<4x8xf32>
    %62 = vector.shape_cast %61 : vector<4x8xf32> to vector<4x8x1xf32>
    %63 = tpu.reciprocal %62 {approx = true} : vector<4x8x1xf32> -> vector<4x8x1xf32>
    %64 = vector.broadcast %63 : vector<4x8x1xf32> to vector<4x8x16xf32>
    %65 = arith.mulf %60, %64 : vector<4x8x16xf32>
    %66 = arith.truncf %65 : vector<4x8x16xf32> to vector<4x8x16xbf16>
    %cst_37 = arith.constant dense<0.000000e+00> : vector<4x8x8xf32>
    %67 = tpu.matmul %66, %54, %cst_37 {dimension_numbers = #tpu.dot_dimension_numbers<[2], [1], [1], [2], [0, 0, 0, 1, 1, 2], [0], [0]>} : vector<4x8x16xbf16>, vector<4x16x8xbf16>, vector<4x8x8xf32> -> vector<4x8x8xf32>
    %68 = vector.extract_strided_slice %67 {offsets = [0, 0, 0], sizes = [1, 8, 8], strides = [1, 1, 1]} : vector<4x8x8xf32> to vector<1x8x8xf32>
    %69 = vector.shape_cast %68 : vector<1x8x8xf32> to vector<8x8xf32>
    %70 = arith.truncf %69 : vector<8x8xf32> to vector<8x8xbf16>
    %c0_38 = arith.constant 0 : index
    %c0_39 = arith.constant 0 : index
    %71 = vector.load %arg19[%c0_38, %c0_39] : memref<8x32xbf16, #tpu.memory_space<vmem>>, vector<8x8xbf16>
    tpu.vector_store %arg19[%c0_38, %c0_39], %70 {strides = array<i32>} : memref<8x32xbf16, #tpu.memory_space<vmem>>, vector<8x8xbf16>,
    %72 = vector.extract_strided_slice %67 {offsets = [1, 0, 0], sizes = [1, 8, 8], strides = [1, 1, 1]} : vector<4x8x8xf32> to vector<1x8x8xf32>
    %73 = vector.shape_cast %72 : vector<1x8x8xf32> to vector<8x8xf32>
    %74 = arith.truncf %73 : vector<8x8xf32> to vector<8x8xbf16>
    %c0_40 = arith.constant 0 : index
    %c8 = arith.constant 8 : index
    %75 = vector.load %arg19[%c0_40, %c8] : memref<8x32xbf16, #tpu.memory_space<vmem>>, vector<8x8xbf16>
    tpu.vector_store %arg19[%c0_40, %c8], %74 {strides = array<i32>} : memref<8x32xbf16, #tpu.memory_space<vmem>>, vector<8x8xbf16>,
    %76 = vector.extract_strided_slice %67 {offsets = [2, 0, 0], sizes = [1, 8, 8], strides = [1, 1, 1]} : vector<4x8x8xf32> to vector<1x8x8xf32>
    %77 = vector.shape_cast %76 : vector<1x8x8xf32> to vector<8x8xf32>
    %78 = arith.truncf %77 : vector<8x8xf32> to vector<8x8xbf16>
    %c0_41 = arith.constant 0 : index
    %c16 = arith.constant 16 : index
    %79 = vector.load %arg19[%c0_41, %c16] : memref<8x32xbf16, #tpu.memory_space<vmem>>, vector<8x8xbf16>
    tpu.vector_store %arg19[%c0_41, %c16], %78 {strides = array<i32>} : memref<8x32xbf16, #tpu.memory_space<vmem>>, vector<8x8xbf16>,
    %80 = vector.extract_strided_slice %67 {offsets = [3, 0, 0], sizes = [1, 8, 8], strides = [1, 1, 1]} : vector<4x8x8xf32> to vector<1x8x8xf32>
    %81 = vector.shape_cast %80 : vector<1x8x8xf32> to vector<8x8xf32>
    %82 = arith.truncf %81 : vector<8x8xf32> to vector<8x8xbf16>
    %c0_42 = arith.constant 0 : index
    %c24 = arith.constant 24 : index
    %83 = vector.load %arg19[%c0_42, %c24] : memref<8x32xbf16, #tpu.memory_space<vmem>>, vector<8x8xbf16>
    tpu.vector_store %arg19[%c0_42, %c24], %82 {strides = array<i32>} : memref<8x32xbf16, #tpu.memory_space<vmem>>, vector<8x8xbf16>,
    %c0_43 = arith.constant 0 : index
    %c0_44 = arith.constant 0 : index
    %84 = vector.load %arg19[%c0_43, %c0_44] : memref<8x32xbf16, #tpu.memory_space<vmem>>, vector<8x32xbf16>
    %c0_45 = arith.constant 0 : index
    %c0_46 = arith.constant 0 : index
    %85 = vector.load %arg12[%c0_45, %c0_46] : memref<32x32xbf16, #tpu.memory_space<vmem>>, vector<32x32xbf16>
    %cst_47 = arith.constant dense<0.000000e+00> : vector<8x32xf32>
    %86 = tpu.matmul %84, %85, %cst_47 {dimension_numbers = #tpu.dot_dimension_numbers<[1], [0], [0], [1], [0, 0, 1, 1], [], []>} : vector<8x32xbf16>, vector<32x32xbf16>, vector<8x32xf32> -> vector<8x32xf32>
    %c0_48 = arith.constant 0 : index
    %c0_49 = arith.constant 0 : index
    %87 = vector.load %arg13[%c0_48, %c0_49] : memref<1x32xf32, #tpu.memory_space<vmem>>, vector<1x32xf32>
    %88 = vector.broadcast %87 : vector<1x32xf32> to vector<8x32xf32>
    %89 = arith.addf %86, %88 : vector<8x32xf32>
    %c0_50 = arith.constant 0 : index
    %c0_51 = arith.constant 0 : index
    %90 = vector.load %arg14[%c0_50, %c0_51] : memref<1x1xf32, #tpu.memory_space<vmem>>, vector<1x1xf32>
    %91 = vector.broadcast %90 : vector<1x1xf32> to vector<8x32xf32>
    %92 = arith.mulf %89, %91 : vector<8x32xf32>
    %93 = arith.addf %4, %92 : vector<8x32xf32>
    %c0_52 = arith.constant 0 : index
    %c0_53 = arith.constant 0 : index
    %c0_54 = arith.constant 0 : index
    %94 = vector.load %arg15[%c0_52, %c0_53, %c0_54] : memref<1x8x32xf32, #tpu.memory_space<vmem>>, vector<1x8x32xf32>
    %95 = vector.shape_cast %94 : vector<1x8x32xf32> to vector<8x32xf32>
    %96 = vector.shape_cast %93 : vector<8x32xf32> to vector<1x8x32xf32>
    tpu.vector_store %arg15[%c0_52, %c0_53, %c0_54], %96 {strides = array<i32>} : memref<1x8x32xf32, #tpu.memory_space<vmem>>, vector<1x8x32xf32>,
    return
  }
  func.func @transform_0(%arg0: i32, %arg1: i32) -> (i32, i32, i32) {
    %c0_i32 = arith.constant 0 : i32
    %c0_i32_0 = arith.constant 0 : i32
    return %arg0, %arg1, %c0_i32 : i32, i32, i32
  }
  func.func @transform_1(%arg0: i32, %arg1: i32) -> (i32, i32, i32) {
    %c0_i32 = arith.constant 0 : i32
    %c0_i32_0 = arith.constant 0 : i32
    %c0_i32_1 = arith.constant 0 : i32
    return %arg0, %c0_i32, %c0_i32_0 : i32, i32, i32
  }
  func.func @transform_2(%arg0: i32, %arg1: i32) -> (i32, i32) {
    %c0_i32 = arith.constant 0 : i32
    %c0_i32_0 = arith.constant 0 : i32
    %c0_i32_1 = arith.constant 0 : i32
    return %c0_i32, %c0_i32_0 : i32, i32
  }
  func.func @transform_3(%arg0: i32, %arg1: i32) -> (i32, i32) {
    %c0_i32 = arith.constant 0 : i32
    %c0_i32_0 = arith.constant 0 : i32
    %c0_i32_1 = arith.constant 0 : i32
    return %c0_i32, %c0_i32_0 : i32, i32
  }
  func.func @transform_4(%arg0: i32, %arg1: i32) -> (i32, i32) {
    %c0_i32 = arith.constant 0 : i32
    %c0_i32_0 = arith.constant 0 : i32
    %c0_i32_1 = arith.constant 0 : i32
    return %c0_i32, %c0_i32_0 : i32, i32
  }
  func.func @transform_5(%arg0: i32, %arg1: i32) -> (i32, i32) {
    %c0_i32 = arith.constant 0 : i32
    %c0_i32_0 = arith.constant 0 : i32
    %c0_i32_1 = arith.constant 0 : i32
    return %c0_i32, %c0_i32_0 : i32, i32
  }
  func.func @transform_6(%arg0: i32, %arg1: i32) -> (i32, i32) {
    %c0_i32 = arith.constant 0 : i32
    %c0_i32_0 = arith.constant 0 : i32
    %c0_i32_1 = arith.constant 0 : i32
    return %c0_i32, %c0_i32_0 : i32, i32
  }
  func.func @transform_7(%arg0: i32, %arg1: i32) -> (i32, i32) {
    %c0_i32 = arith.constant 0 : i32
    %c0_i32_0 = arith.constant 0 : i32
    %c0_i32_1 = arith.constant 0 : i32
    return %c0_i32, %c0_i32_0 : i32, i32
  }
  func.func @transform_8(%arg0: i32, %arg1: i32) -> (i32, i32) {
    %c0_i32 = arith.constant 0 : i32
    %c0_i32_0 = arith.constant 0 : i32
    %c0_i32_1 = arith.constant 0 : i32
    return %c0_i32, %c0_i32_0 : i32, i32
  }
  func.func @transform_9(%arg0: i32, %arg1: i32) -> (i32, i32) {
    %c0_i32 = arith.constant 0 : i32
    %c0_i32_0 = arith.constant 0 : i32
    %c0_i32_1 = arith.constant 0 : i32
    return %c0_i32, %c0_i32_0 : i32, i32
  }
  func.func @transform_10(%arg0: i32, %arg1: i32) -> (i32, i32) {
    %c0_i32 = arith.constant 0 : i32
    %c0_i32_0 = arith.constant 0 : i32
    %c0_i32_1 = arith.constant 0 : i32
    return %c0_i32, %c0_i32_0 : i32, i32
  }
  func.func @transform_11(%arg0: i32, %arg1: i32) -> (i32, i32) {
    %c0_i32 = arith.constant 0 : i32
    %c0_i32_0 = arith.constant 0 : i32
    %c0_i32_1 = arith.constant 0 : i32
    return %c0_i32, %c0_i32_0 : i32, i32
  }
  func.func @transform_12(%arg0: i32, %arg1: i32) -> (i32, i32) {
    %c0_i32 = arith.constant 0 : i32
    %c0_i32_0 = arith.constant 0 : i32
    %c0_i32_1 = arith.constant 0 : i32
    return %c0_i32, %c0_i32_0 : i32, i32
  }
  func.func @transform_13(%arg0: i32, %arg1: i32) -> (i32, i32, i32) {
    %c0_i32 = arith.constant 0 : i32
    %c0_i32_0 = arith.constant 0 : i32
    return %arg0, %arg1, %c0_i32 : i32, i32, i32
  }
}

module attributes {stable_mosaic.version = 11 : i64} {
  func.func @_ln_mlp_block_kernel(%arg0: i32, %arg1: i32, %arg2: memref<16x32xf32, #tpu.memory_space<vmem>>, %arg3: memref<1x32xf32, #tpu.memory_space<vmem>>, %arg4: memref<1x32xf32, #tpu.memory_space<vmem>>, %arg5: memref<32x128xbf16, #tpu.memory_space<vmem>>, %arg6: memref<1x128xf32, #tpu.memory_space<vmem>>, %arg7: memref<128x32xbf16, #tpu.memory_space<vmem>>, %arg8: memref<1x32xf32, #tpu.memory_space<vmem>>, %arg9: memref<1x1xf32, #tpu.memory_space<vmem>>, %arg10: memref<16x32xf32, #tpu.memory_space<vmem>>, %arg11: memref<16x32xbf16, #tpu.memory_space<vmem>>, %arg12: memref<16x32xf32, #tpu.memory_space<vmem>>) attributes {dimension_semantics = [#tpu.dimension_semantics<parallel>, #tpu.dimension_semantics<arbitrary>], iteration_bounds = array<i64: 1, 1>, scalar_prefetch = 0 : i64, scratch_operands = 2 : i64, tpu.core_type = #tpu.core_type<tc>, window_params = [{transform_indices = @transform_0, window_bounds = array<i64: 16, 32>}, {pipeline_mode = #tpu.pipeline_mode<synchronous>, transform_indices = @transform_1, window_bounds = array<i64: 1, 32>}, {pipeline_mode = #tpu.pipeline_mode<synchronous>, transform_indices = @transform_2, window_bounds = array<i64: 1, 32>}, {transform_indices = @transform_3, window_bounds = array<i64: 32, 128>}, {transform_indices = @transform_4, window_bounds = array<i64: 1, 128>}, {transform_indices = @transform_5, window_bounds = array<i64: 128, 32>}, {pipeline_mode = #tpu.pipeline_mode<synchronous>, transform_indices = @transform_6, window_bounds = array<i64: 1, 32>}, {pipeline_mode = #tpu.pipeline_mode<synchronous>, transform_indices = @transform_7, window_bounds = array<i64: 1, 1>}, {transform_indices = @transform_8, window_bounds = array<i64: 16, 32>}]} {
    %c0_i32 = arith.constant 0 : i32
    %0 = arith.cmpi eq, %arg1, %c0_i32 : i32
    %1 = arith.extui %0 : i1 to i32
    %c0_i32_0 = arith.constant 0 : i32
    %2 = arith.cmpi ne, %1, %c0_i32_0 : i32
    scf.if %2 {
      %c0_19 = arith.constant 0 : index
      %c0_20 = arith.constant 0 : index
      %31 = vector.load %arg2[%c0_19, %c0_20] : memref<16x32xf32, #tpu.memory_space<vmem>>, vector<16x32xf32>
      %c0_21 = arith.constant 0 : index
      %c0_22 = arith.constant 0 : index
      %32 = vector.load %arg3[%c0_21, %c0_22] : memref<1x32xf32, #tpu.memory_space<vmem>>, vector<1x32xf32>
      %c0_23 = arith.constant 0 : index
      %c0_24 = arith.constant 0 : index
      %33 = vector.load %arg4[%c0_23, %c0_24] : memref<1x32xf32, #tpu.memory_space<vmem>>, vector<1x32xf32>
      %cst_25 = arith.constant dense<0.000000e+00> : vector<16xf32>
      %34 = vector.multi_reduction <add>, %31, %cst_25 [1] : vector<16x32xf32> to vector<16xf32>
      %35 = vector.shape_cast %34 : vector<16xf32> to vector<16x1xf32>
      %cst_26 = arith.constant 3.200000e+01 : f32
      %36 = vector.broadcast %cst_26 : f32 to vector<16x1xf32>
      %37 = arith.divf %35, %36 : vector<16x1xf32>
      %38 = vector.broadcast %37 : vector<16x1xf32> to vector<16x32xf32>
      %39 = arith.subf %31, %38 : vector<16x32xf32>
      %40 = arith.mulf %39, %39 : vector<16x32xf32>
      %cst_27 = arith.constant dense<0.000000e+00> : vector<16xf32>
      %41 = vector.multi_reduction <add>, %40, %cst_27 [1] : vector<16x32xf32> to vector<16xf32>
      %42 = vector.shape_cast %41 : vector<16xf32> to vector<16x1xf32>
      %cst_28 = arith.constant 3.200000e+01 : f32
      %43 = vector.broadcast %cst_28 : f32 to vector<16x1xf32>
      %44 = arith.divf %42, %43 : vector<16x1xf32>
      %45 = vector.broadcast %37 : vector<16x1xf32> to vector<16x32xf32>
      %46 = arith.subf %31, %45 : vector<16x32xf32>
      %cst_29 = arith.constant 9.99999974E-6 : f32
      %47 = vector.broadcast %cst_29 : f32 to vector<16x1xf32>
      %48 = arith.addf %44, %47 : vector<16x1xf32>
      %49 = math.rsqrt %48 : vector<16x1xf32>
      %50 = vector.broadcast %49 : vector<16x1xf32> to vector<16x32xf32>
      %51 = arith.mulf %46, %50 : vector<16x32xf32>
      %52 = vector.broadcast %32 : vector<1x32xf32> to vector<16x32xf32>
      %53 = arith.mulf %51, %52 : vector<16x32xf32>
      %54 = vector.broadcast %33 : vector<1x32xf32> to vector<16x32xf32>
      %55 = arith.addf %53, %54 : vector<16x32xf32>
      %56 = arith.truncf %55 : vector<16x32xf32> to vector<16x32xbf16>
      %c0_30 = arith.constant 0 : index
      %c0_31 = arith.constant 0 : index
      %57 = vector.load %arg11[%c0_30, %c0_31] : memref<16x32xbf16, #tpu.memory_space<vmem>>, vector<16x32xbf16>
      tpu.vector_store %arg11[%c0_30, %c0_31], %56 {strides = array<i32>} : memref<16x32xbf16, #tpu.memory_space<vmem>>, vector<16x32xbf16>,
      %cst_32 = arith.constant 0.000000e+00 : f32
      %58 = vector.broadcast %cst_32 : f32 to vector<16x32xf32>
      %c0_33 = arith.constant 0 : index
      %c0_34 = arith.constant 0 : index
      %59 = vector.load %arg12[%c0_33, %c0_34] : memref<16x32xf32, #tpu.memory_space<vmem>>, vector<16x32xf32>
      tpu.vector_store %arg12[%c0_33, %c0_34], %58 {strides = array<i32>} : memref<16x32xf32, #tpu.memory_space<vmem>>, vector<16x32xf32>,
    } else {
    }
    %c0 = arith.constant 0 : index
    %c0_1 = arith.constant 0 : index
    %3 = vector.load %arg11[%c0, %c0_1] : memref<16x32xbf16, #tpu.memory_space<vmem>>, vector<16x32xbf16>
    %c0_2 = arith.constant 0 : index
    %c0_3 = arith.constant 0 : index
    %4 = vector.load %arg5[%c0_2, %c0_3] : memref<32x128xbf16, #tpu.memory_space<vmem>>, vector<32x128xbf16>
    %cst = arith.constant dense<0.000000e+00> : vector<16x128xf32>
    %5 = tpu.matmul %3, %4, %cst {dimension_numbers = #tpu.dot_dimension_numbers<[1], [0], [0], [1], [0, 0, 1, 1], [], []>} : vector<16x32xbf16>, vector<32x128xbf16>, vector<16x128xf32> -> vector<16x128xf32>
    %c0_4 = arith.constant 0 : index
    %c0_5 = arith.constant 0 : index
    %6 = vector.load %arg6[%c0_4, %c0_5] : memref<1x128xf32, #tpu.memory_space<vmem>>, vector<1x128xf32>
    %7 = vector.broadcast %6 : vector<1x128xf32> to vector<16x128xf32>
    %8 = arith.addf %5, %7 : vector<16x128xf32>
    %cst_6 = arith.constant 5.000000e-01 : f32
    %9 = vector.broadcast %cst_6 : f32 to vector<16x128xf32>
    %10 = arith.mulf %9, %8 : vector<16x128xf32>
    %cst_7 = arith.constant 4.471500e-02 : f32
    %11 = vector.broadcast %cst_7 : f32 to vector<16x128xf32>
    %12 = arith.mulf %11, %8 : vector<16x128xf32>
    %13 = arith.mulf %12, %8 : vector<16x128xf32>
    %14 = arith.mulf %13, %8 : vector<16x128xf32>
    %15 = arith.addf %8, %14 : vector<16x128xf32>
    %cst_8 = arith.constant 0.797884583 : f32
    %16 = vector.broadcast %cst_8 : f32 to vector<16x128xf32>
    %17 = arith.mulf %16, %15 : vector<16x128xf32>
    %18 = math.tanh %17 : vector<16x128xf32>
    %cst_9 = arith.constant 1.000000e+00 : f32
    %19 = vector.broadcast %cst_9 : f32 to vector<16x128xf32>
    %20 = arith.addf %19, %18 : vector<16x128xf32>
    %21 = arith.mulf %10, %20 : vector<16x128xf32>
    %22 = arith.truncf %21 : vector<16x128xf32> to vector<16x128xbf16>
    %c0_10 = arith.constant 0 : index
    %c0_11 = arith.constant 0 : index
    %23 = vector.load %arg12[%c0_10, %c0_11] : memref<16x32xf32, #tpu.memory_space<vmem>>, vector<16x32xf32>
    %c0_12 = arith.constant 0 : index
    %c0_13 = arith.constant 0 : index
    %24 = vector.load %arg7[%c0_12, %c0_13] : memref<128x32xbf16, #tpu.memory_space<vmem>>, vector<128x32xbf16>
    %cst_14 = arith.constant dense<0.000000e+00> : vector<16x32xf32>
    %25 = tpu.matmul %22, %24, %cst_14 {dimension_numbers = #tpu.dot_dimension_numbers<[1], [0], [0], [1], [0, 0, 1, 1], [], []>} : vector<16x128xbf16>, vector<128x32xbf16>, vector<16x32xf32> -> vector<16x32xf32>
    %26 = arith.addf %23, %25 : vector<16x32xf32>
    %c0_15 = arith.constant 0 : index
    %c0_16 = arith.constant 0 : index
    %27 = vector.load %arg12[%c0_15, %c0_16] : memref<16x32xf32, #tpu.memory_space<vmem>>, vector<16x32xf32>
    tpu.vector_store %arg12[%c0_15, %c0_16], %26 {strides = array<i32>} : memref<16x32xf32, #tpu.memory_space<vmem>>, vector<16x32xf32>,
    %c0_i32_17 = arith.constant 0 : i32
    %28 = arith.cmpi eq, %arg1, %c0_i32_17 : i32
    %29 = arith.extui %28 : i1 to i32
    %c0_i32_18 = arith.constant 0 : i32
    %30 = arith.cmpi ne, %29, %c0_i32_18 : i32
    scf.if %30 {
      %c0_19 = arith.constant 0 : index
      %c0_20 = arith.constant 0 : index
      %31 = vector.load %arg2[%c0_19, %c0_20] : memref<16x32xf32, #tpu.memory_space<vmem>>, vector<16x32xf32>
      %c0_21 = arith.constant 0 : index
      %c0_22 = arith.constant 0 : index
      %32 = vector.load %arg12[%c0_21, %c0_22] : memref<16x32xf32, #tpu.memory_space<vmem>>, vector<16x32xf32>
      %c0_23 = arith.constant 0 : index
      %c0_24 = arith.constant 0 : index
      %33 = vector.load %arg8[%c0_23, %c0_24] : memref<1x32xf32, #tpu.memory_space<vmem>>, vector<1x32xf32>
      %34 = vector.broadcast %33 : vector<1x32xf32> to vector<16x32xf32>
      %35 = arith.addf %32, %34 : vector<16x32xf32>
      %c0_25 = arith.constant 0 : index
      %c0_26 = arith.constant 0 : index
      %36 = vector.load %arg9[%c0_25, %c0_26] : memref<1x1xf32, #tpu.memory_space<vmem>>, vector<1x1xf32>
      %37 = vector.broadcast %36 : vector<1x1xf32> to vector<16x32xf32>
      %38 = arith.mulf %35, %37 : vector<16x32xf32>
      %39 = arith.addf %31, %38 : vector<16x32xf32>
      %c0_27 = arith.constant 0 : index
      %c0_28 = arith.constant 0 : index
      %40 = vector.load %arg10[%c0_27, %c0_28] : memref<16x32xf32, #tpu.memory_space<vmem>>, vector<16x32xf32>
      tpu.vector_store %arg10[%c0_27, %c0_28], %39 {strides = array<i32>} : memref<16x32xf32, #tpu.memory_space<vmem>>, vector<16x32xf32>,
    } else {
    }
    return
  }
  func.func @transform_0(%arg0: i32, %arg1: i32) -> (i32, i32) {
    %c0_i32 = arith.constant 0 : i32
    %c0_i32_0 = arith.constant 0 : i32
    return %arg0, %c0_i32 : i32, i32
  }
  func.func @transform_1(%arg0: i32, %arg1: i32) -> (i32, i32) {
    %c0_i32 = arith.constant 0 : i32
    %c0_i32_0 = arith.constant 0 : i32
    %c0_i32_1 = arith.constant 0 : i32
    return %c0_i32, %c0_i32_0 : i32, i32
  }
  func.func @transform_2(%arg0: i32, %arg1: i32) -> (i32, i32) {
    %c0_i32 = arith.constant 0 : i32
    %c0_i32_0 = arith.constant 0 : i32
    %c0_i32_1 = arith.constant 0 : i32
    return %c0_i32, %c0_i32_0 : i32, i32
  }
  func.func @transform_3(%arg0: i32, %arg1: i32) -> (i32, i32) {
    %c0_i32 = arith.constant 0 : i32
    %c0_i32_0 = arith.constant 0 : i32
    return %c0_i32, %arg1 : i32, i32
  }
  func.func @transform_4(%arg0: i32, %arg1: i32) -> (i32, i32) {
    %c0_i32 = arith.constant 0 : i32
    %c0_i32_0 = arith.constant 0 : i32
    return %c0_i32, %arg1 : i32, i32
  }
  func.func @transform_5(%arg0: i32, %arg1: i32) -> (i32, i32) {
    %c0_i32 = arith.constant 0 : i32
    %c0_i32_0 = arith.constant 0 : i32
    return %arg1, %c0_i32 : i32, i32
  }
  func.func @transform_6(%arg0: i32, %arg1: i32) -> (i32, i32) {
    %c0_i32 = arith.constant 0 : i32
    %c0_i32_0 = arith.constant 0 : i32
    %c0_i32_1 = arith.constant 0 : i32
    return %c0_i32, %c0_i32_0 : i32, i32
  }
  func.func @transform_7(%arg0: i32, %arg1: i32) -> (i32, i32) {
    %c0_i32 = arith.constant 0 : i32
    %c0_i32_0 = arith.constant 0 : i32
    %c0_i32_1 = arith.constant 0 : i32
    return %c0_i32, %c0_i32_0 : i32, i32
  }
  func.func @transform_8(%arg0: i32, %arg1: i32) -> (i32, i32) {
    %c0_i32 = arith.constant 0 : i32
    %c0_i32_0 = arith.constant 0 : i32
    return %arg0, %c0_i32 : i32, i32
  }
}

module attributes {stable_mosaic.version = 11 : i64} {
  func.func @_ln_mlp_block_kernel(%arg0: i32, %arg1: i32, %arg2: memref<16x32xf32, #tpu.memory_space<vmem>>, %arg3: memref<1x32xf32, #tpu.memory_space<vmem>>, %arg4: memref<1x32xf32, #tpu.memory_space<vmem>>, %arg5: memref<32x128xbf16, #tpu.memory_space<vmem>>, %arg6: memref<1x128xf32, #tpu.memory_space<vmem>>, %arg7: memref<128x32xbf16, #tpu.memory_space<vmem>>, %arg8: memref<1x32xf32, #tpu.memory_space<vmem>>, %arg9: memref<1x1xf32, #tpu.memory_space<vmem>>, %arg10: memref<16x32xf32, #tpu.memory_space<vmem>>, %arg11: memref<16x32xbf16, #tpu.memory_space<vmem>>, %arg12: memref<16x32xf32, #tpu.memory_space<vmem>>) attributes {dimension_semantics = [#tpu.dimension_semantics<parallel>, #tpu.dimension_semantics<arbitrary>], iteration_bounds = array<i64: 1, 1>, scalar_prefetch = 0 : i64, scratch_operands = 2 : i64, tpu.core_type = #tpu.core_type<tc>, window_params = [{transform_indices = @transform_0, window_bounds = array<i64: 16, 32>}, {pipeline_mode = #tpu.pipeline_mode<synchronous>, transform_indices = @transform_1, window_bounds = array<i64: 1, 32>}, {pipeline_mode = #tpu.pipeline_mode<synchronous>, transform_indices = @transform_2, window_bounds = array<i64: 1, 32>}, {transform_indices = @transform_3, window_bounds = array<i64: 32, 128>}, {transform_indices = @transform_4, window_bounds = array<i64: 1, 128>}, {transform_indices = @transform_5, window_bounds = array<i64: 128, 32>}, {pipeline_mode = #tpu.pipeline_mode<synchronous>, transform_indices = @transform_6, window_bounds = array<i64: 1, 32>}, {pipeline_mode = #tpu.pipeline_mode<synchronous>, transform_indices = @transform_7, window_bounds = array<i64: 1, 1>}, {transform_indices = @transform_8, window_bounds = array<i64: 16, 32>}]} {
    %c0_i32 = arith.constant 0 : i32
    %0 = arith.cmpi eq, %arg1, %c0_i32 : i32
    %1 = arith.extui %0 : i1 to i32
    %c0_i32_0 = arith.constant 0 : i32
    %2 = arith.cmpi ne, %1, %c0_i32_0 : i32
    scf.if %2 {
      %c0_19 = arith.constant 0 : index
      %c0_20 = arith.constant 0 : index
      %31 = vector.load %arg2[%c0_19, %c0_20] : memref<16x32xf32, #tpu.memory_space<vmem>>, vector<16x32xf32>
      %c0_21 = arith.constant 0 : index
      %c0_22 = arith.constant 0 : index
      %32 = vector.load %arg3[%c0_21, %c0_22] : memref<1x32xf32, #tpu.memory_space<vmem>>, vector<1x32xf32>
      %c0_23 = arith.constant 0 : index
      %c0_24 = arith.constant 0 : index
      %33 = vector.load %arg4[%c0_23, %c0_24] : memref<1x32xf32, #tpu.memory_space<vmem>>, vector<1x32xf32>
      %cst_25 = arith.constant dense<0.000000e+00> : vector<16xf32>
      %34 = vector.multi_reduction <add>, %31, %cst_25 [1] : vector<16x32xf32> to vector<16xf32>
      %35 = vector.shape_cast %34 : vector<16xf32> to vector<16x1xf32>
      %cst_26 = arith.constant 3.200000e+01 : f32
      %36 = vector.broadcast %cst_26 : f32 to vector<16x1xf32>
      %37 = arith.divf %35, %36 : vector<16x1xf32>
      %38 = vector.broadcast %37 : vector<16x1xf32> to vector<16x32xf32>
      %39 = arith.subf %31, %38 : vector<16x32xf32>
      %40 = arith.mulf %39, %39 : vector<16x32xf32>
      %cst_27 = arith.constant dense<0.000000e+00> : vector<16xf32>
      %41 = vector.multi_reduction <add>, %40, %cst_27 [1] : vector<16x32xf32> to vector<16xf32>
      %42 = vector.shape_cast %41 : vector<16xf32> to vector<16x1xf32>
      %cst_28 = arith.constant 3.200000e+01 : f32
      %43 = vector.broadcast %cst_28 : f32 to vector<16x1xf32>
      %44 = arith.divf %42, %43 : vector<16x1xf32>
      %45 = vector.broadcast %37 : vector<16x1xf32> to vector<16x32xf32>
      %46 = arith.subf %31, %45 : vector<16x32xf32>
      %cst_29 = arith.constant 9.99999974E-6 : f32
      %47 = vector.broadcast %cst_29 : f32 to vector<16x1xf32>
      %48 = arith.addf %44, %47 : vector<16x1xf32>
      %49 = math.rsqrt %48 : vector<16x1xf32>
      %50 = vector.broadcast %49 : vector<16x1xf32> to vector<16x32xf32>
      %51 = arith.mulf %46, %50 : vector<16x32xf32>
      %52 = vector.broadcast %32 : vector<1x32xf32> to vector<16x32xf32>
      %53 = arith.mulf %51, %52 : vector<16x32xf32>
      %54 = vector.broadcast %33 : vector<1x32xf32> to vector<16x32xf32>
      %55 = arith.addf %53, %54 : vector<16x32xf32>
      %56 = arith.truncf %55 : vector<16x32xf32> to vector<16x32xbf16>
      %c0_30 = arith.constant 0 : index
      %c0_31 = arith.constant 0 : index
      %57 = vector.load %arg11[%c0_30, %c0_31] : memref<16x32xbf16, #tpu.memory_space<vmem>>, vector<16x32xbf16>
      tpu.vector_store %arg11[%c0_30, %c0_31], %56 {strides = array<i32>} : memref<16x32xbf16, #tpu.memory_space<vmem>>, vector<16x32xbf16>,
      %cst_32 = arith.constant 0.000000e+00 : f32
      %58 = vector.broadcast %cst_32 : f32 to vector<16x32xf32>
      %c0_33 = arith.constant 0 : index
      %c0_34 = arith.constant 0 : index
      %59 = vector.load %arg12[%c0_33, %c0_34] : memref<16x32xf32, #tpu.memory_space<vmem>>, vector<16x32xf32>
      tpu.vector_store %arg12[%c0_33, %c0_34], %58 {strides = array<i32>} : memref<16x32xf32, #tpu.memory_space<vmem>>, vector<16x32xf32>,
    } else {
    }
    %c0 = arith.constant 0 : index
    %c0_1 = arith.constant 0 : index
    %3 = vector.load %arg11[%c0, %c0_1] : memref<16x32xbf16, #tpu.memory_space<vmem>>, vector<16x32xbf16>
    %c0_2 = arith.constant 0 : index
    %c0_3 = arith.constant 0 : index
    %4 = vector.load %arg5[%c0_2, %c0_3] : memref<32x128xbf16, #tpu.memory_space<vmem>>, vector<32x128xbf16>
    %cst = arith.constant dense<0.000000e+00> : vector<16x128xf32>
    %5 = tpu.matmul %3, %4, %cst {dimension_numbers = #tpu.dot_dimension_numbers<[1], [0], [0], [1], [0, 0, 1, 1], [], []>} : vector<16x32xbf16>, vector<32x128xbf16>, vector<16x128xf32> -> vector<16x128xf32>
    %c0_4 = arith.constant 0 : index
    %c0_5 = arith.constant 0 : index
    %6 = vector.load %arg6[%c0_4, %c0_5] : memref<1x128xf32, #tpu.memory_space<vmem>>, vector<1x128xf32>
    %7 = vector.broadcast %6 : vector<1x128xf32> to vector<16x128xf32>
    %8 = arith.addf %5, %7 : vector<16x128xf32>
    %cst_6 = arith.constant 5.000000e-01 : f32
    %9 = vector.broadcast %cst_6 : f32 to vector<16x128xf32>
    %10 = arith.mulf %9, %8 : vector<16x128xf32>
    %cst_7 = arith.constant 4.471500e-02 : f32
    %11 = vector.broadcast %cst_7 : f32 to vector<16x128xf32>
    %12 = arith.mulf %11, %8 : vector<16x128xf32>
    %13 = arith.mulf %12, %8 : vector<16x128xf32>
    %14 = arith.mulf %13, %8 : vector<16x128xf32>
    %15 = arith.addf %8, %14 : vector<16x128xf32>
    %cst_8 = arith.constant 0.797884583 : f32
    %16 = vector.broadcast %cst_8 : f32 to vector<16x128xf32>
    %17 = arith.mulf %16, %15 : vector<16x128xf32>
    %18 = math.tanh %17 : vector<16x128xf32>
    %cst_9 = arith.constant 1.000000e+00 : f32
    %19 = vector.broadcast %cst_9 : f32 to vector<16x128xf32>
    %20 = arith.addf %19, %18 : vector<16x128xf32>
    %21 = arith.mulf %10, %20 : vector<16x128xf32>
    %22 = arith.truncf %21 : vector<16x128xf32> to vector<16x128xbf16>
    %c0_10 = arith.constant 0 : index
    %c0_11 = arith.constant 0 : index
    %23 = vector.load %arg12[%c0_10, %c0_11] : memref<16x32xf32, #tpu.memory_space<vmem>>, vector<16x32xf32>
    %c0_12 = arith.constant 0 : index
    %c0_13 = arith.constant 0 : index
    %24 = vector.load %arg7[%c0_12, %c0_13] : memref<128x32xbf16, #tpu.memory_space<vmem>>, vector<128x32xbf16>
    %cst_14 = arith.constant dense<0.000000e+00> : vector<16x32xf32>
    %25 = tpu.matmul %22, %24, %cst_14 {dimension_numbers = #tpu.dot_dimension_numbers<[1], [0], [0], [1], [0, 0, 1, 1], [], []>} : vector<16x128xbf16>, vector<128x32xbf16>, vector<16x32xf32> -> vector<16x32xf32>
    %26 = arith.addf %23, %25 : vector<16x32xf32>
    %c0_15 = arith.constant 0 : index
    %c0_16 = arith.constant 0 : index
    %27 = vector.load %arg12[%c0_15, %c0_16] : memref<16x32xf32, #tpu.memory_space<vmem>>, vector<16x32xf32>
    tpu.vector_store %arg12[%c0_15, %c0_16], %26 {strides = array<i32>} : memref<16x32xf32, #tpu.memory_space<vmem>>, vector<16x32xf32>,
    %c0_i32_17 = arith.constant 0 : i32
    %28 = arith.cmpi eq, %arg1, %c0_i32_17 : i32
    %29 = arith.extui %28 : i1 to i32
    %c0_i32_18 = arith.constant 0 : i32
    %30 = arith.cmpi ne, %29, %c0_i32_18 : i32
    scf.if %30 {
      %c0_19 = arith.constant 0 : index
      %c0_20 = arith.constant 0 : index
      %31 = vector.load %arg2[%c0_19, %c0_20] : memref<16x32xf32, #tpu.memory_space<vmem>>, vector<16x32xf32>
      %c0_21 = arith.constant 0 : index
      %c0_22 = arith.constant 0 : index
      %32 = vector.load %arg12[%c0_21, %c0_22] : memref<16x32xf32, #tpu.memory_space<vmem>>, vector<16x32xf32>
      %c0_23 = arith.constant 0 : index
      %c0_24 = arith.constant 0 : index
      %33 = vector.load %arg8[%c0_23, %c0_24] : memref<1x32xf32, #tpu.memory_space<vmem>>, vector<1x32xf32>
      %34 = vector.broadcast %33 : vector<1x32xf32> to vector<16x32xf32>
      %35 = arith.addf %32, %34 : vector<16x32xf32>
      %c0_25 = arith.constant 0 : index
      %c0_26 = arith.constant 0 : index
      %36 = vector.load %arg9[%c0_25, %c0_26] : memref<1x1xf32, #tpu.memory_space<vmem>>, vector<1x1xf32>
      %37 = vector.broadcast %36 : vector<1x1xf32> to vector<16x32xf32>
      %38 = arith.mulf %35, %37 : vector<16x32xf32>
      %39 = arith.addf %31, %38 : vector<16x32xf32>
      %c0_27 = arith.constant 0 : index
      %c0_28 = arith.constant 0 : index
      %40 = vector.load %arg10[%c0_27, %c0_28] : memref<16x32xf32, #tpu.memory_space<vmem>>, vector<16x32xf32>
      tpu.vector_store %arg10[%c0_27, %c0_28], %39 {strides = array<i32>} : memref<16x32xf32, #tpu.memory_space<vmem>>, vector<16x32xf32>,
    } else {
    }
    return
  }
  func.func @transform_0(%arg0: i32, %arg1: i32) -> (i32, i32) {
    %c0_i32 = arith.constant 0 : i32
    %c0_i32_0 = arith.constant 0 : i32
    return %arg0, %c0_i32 : i32, i32
  }
  func.func @transform_1(%arg0: i32, %arg1: i32) -> (i32, i32) {
    %c0_i32 = arith.constant 0 : i32
    %c0_i32_0 = arith.constant 0 : i32
    %c0_i32_1 = arith.constant 0 : i32
    return %c0_i32, %c0_i32_0 : i32, i32
  }
  func.func @transform_2(%arg0: i32, %arg1: i32) -> (i32, i32) {
    %c0_i32 = arith.constant 0 : i32
    %c0_i32_0 = arith.constant 0 : i32
    %c0_i32_1 = arith.constant 0 : i32
    return %c0_i32, %c0_i32_0 : i32, i32
  }
  func.func @transform_3(%arg0: i32, %arg1: i32) -> (i32, i32) {
    %c0_i32 = arith.constant 0 : i32
    %c0_i32_0 = arith.constant 0 : i32
    return %c0_i32, %arg1 : i32, i32
  }
  func.func @transform_4(%arg0: i32, %arg1: i32) -> (i32, i32) {
    %c0_i32 = arith.constant 0 : i32
    %c0_i32_0 = arith.constant 0 : i32
    return %c0_i32, %arg1 : i32, i32
  }
  func.func @transform_5(%arg0: i32, %arg1: i32) -> (i32, i32) {
    %c0_i32 = arith.constant 0 : i32
    %c0_i32_0 = arith.constant 0 : i32
    return %arg1, %c0_i32 : i32, i32
  }
  func.func @transform_6(%arg0: i32, %arg1: i32) -> (i32, i32) {
    %c0_i32 = arith.constant 0 : i32
    %c0_i32_0 = arith.constant 0 : i32
    %c0_i32_1 = arith.constant 0 : i32
    return %c0_i32, %c0_i32_0 : i32, i32
  }
  func.func @transform_7(%arg0: i32, %arg1: i32) -> (i32, i32) {
    %c0_i32 = arith.constant 0 : i32
    %c0_i32_0 = arith.constant 0 : i32
    %c0_i32_1 = arith.constant 0 : i32
    return %c0_i32, %c0_i32_0 : i32, i32
  }
  func.func @transform_8(%arg0: i32, %arg1: i32) -> (i32, i32) {
    %c0_i32 = arith.constant 0 : i32
    %c0_i32_0 = arith.constant 0 : i32
    return %arg0, %c0_i32 : i32, i32
  }
}

</mosaic_0001>

<bundles_post_ra>
// kernel: tpu_custom_call.1
= control target key start
LH: loop header
LB: loop body
LE: loop exit
PB: predicated region body
PF: predicated region fallthrough
CT: control target
= control target key end

     0   :  { %6 = vsyncpa [#allocation3], 0  ;;  %s287_s0 = inlined_call_operand.hbm [shape: f32[8,128], index: 0, kind: input, shape index: {}]   ;;  %s288_s1 = inlined_call_operand.hbm [shape: f32[8,128], index: 1, kind: output, shape index: {}]  }
   0x1   :  { %7 = vsyncpa [#allocation4], 0  ;;  %s270_s6 = smov 0  }
   0x2 LB: > { %s149_s7 = sadd.s32 4294967295, %s256_s6   ;;  %p150_p0 = scmp.ge.s32.totalorder %s256_s6, 1  ;;  %s256_s6 = sphi %s270_s6, %s13_s6  }
   0x3   : > { %p60_p1 = scmp.lt.s32.totalorder %s256_s6, 3  ;;  %s72_s10 = sshll.u32 %s287_s0, 4  ;;  %s73_s10 = int_to_ptr.hbm [resolvable:$true] %s72_s10 }
   0x4   : > { %p170_p3 = scmp.eq.s32.totalorder %s149_s7, 0  ;;  %s258_s11 = smov [#allocation2]  }
   0x5   : > { %p61_p2 = pnand %p150_p0, %p60_p1  ;;  %s74_s12 = sshll.u32 %s258_s11, 4  ;;  %s75_s12 = int_to_ptr.vmem [resolvable:$true] %s74_s12 }
   0x7   : > { %p166_p4 = pneg %p61_p2  ;;  %87 = sbr.rel (%p61_p2) target bundleno = 20 (0x14), region = 24 }
   0x9   : > { %p167_p5 = pnand %p170_p3, %p166_p4 }
   0xb   : > { %169 = dma.hbm_to_vmem [thread:$0]  (!%p167_p5), %s73_s10, 128, %s75_s12, [#allocation3]  }
   0xc   : > { %247 = dma.done.wait (%p170_p3), [#allocation3], 128  }
   0xd   : > { %249 = vsyncadd (%p170_p3), [#allocation3], 4294967168  ;;  %s259_s13 = smov [#allocation5]   ;;  %s109_s17 = sshll.u32 %s288_s1, 4  ;;  %v98_v0 = vld [vmem:[#allocation2] sm:$0xff]  ;;  %s110_s17 = int_to_ptr.hbm [resolvable:$true] %s109_s17 }
   0xe   : > { %s107_s14 = sshll.u32 %s259_s13, 4  ;;  %p172_p6 = scmp.eq.s32.totalorder %s149_s7, 1  ;;  %v99_v1 = vadd.f32 1.0, %v98_v0  ;;  %s108_s14 = int_to_ptr.vmem [resolvable:$true] %s107_s14 }
  0x10   : > { %100 = vst [vmem:[#allocation5] sm:$0xff] %v99_v1 }
  0x11   : > { %163 = dma.vmem_to_hbm [thread:$0]  (%p172_p6), %s108_s14, 128, %s110_s17, [#allocation4]  }
  0x12   : > { %251 = dma.done.wait (%p172_p6), [#allocation4], 128  }
  0x13   : > { %253 = vsyncadd (%p172_p6), [#allocation4], 4294967168 }
  0x14 PF: > { %s13_s6 = sadd.s32 1, %s256_s6  }
  0x15   : > { %p10_p7 = scmp.ge.s32.totalorder %s13_s6, 4  }
  0x17   :  { %12 = sbr.rel (!%p10_p7) target bundleno = 2 (0x2), region = 53 }
  0x1c   :  { %123 = vsyncpa [#allocation3], 1 }
  0x1d   :  { %125 = vsyncpa [#allocation3 + $0x1], 1 }
  0x1e   :  { %126 = vsyncpa [#allocation4], 1 }
  0x1f   :  { %128 = vsyncpa [#allocation4 + $0x1], 1 }

// kernel: modified_lm_block_forward.7
= control target key start
LH: loop header
LB: loop body
LE: loop exit
PB: predicated region body
PF: predicated region fallthrough
CT: control target
= control target key end

     0   :  { %s533_s0 = inlined_call_operand.vmem [shape: f32[16,32], index: 0, kind: input, shape index: {}]   ;;  %s534_s1 = inlined_call_operand.vmem [shape: f32[1,32], index: 1, kind: input, shape index: {}]   ;;  %s535_s2 = inlined_call_operand.vmem [shape: f32[1,32], index: 2, kind: input, shape index: {}, may-alias: {2,6}]   ;;  %s536_s3 = inlined_call_operand.vmem [shape: bf16[32,128], index: 3, kind: input, shape index: {}]   ;;  %s537_s4 = inlined_call_operand.vmem [shape: f32[1,128], index: 4, kind: input, shape index: {}]   ;;  %s538_s5 = inlined_call_operand.vmem [shape: bf16[128,32], index: 5, kind: input, shape index: {}]   ;;  %s539_s6 = inlined_call_operand.vmem [shape: f32[1,32], index: 6, kind: input, shape index: {}, may-alias: {2,6}]   ;;  %s540_s7 = inlined_call_operand.<no memory space> [shape: f32[1,1], index: 7, kind: input, shape index: {}]   ;;  %s541_s8 = inlined_call_operand.hbm [shape: f32[16,32], index: 8, kind: output, shape index: {}]  }
   0x1   :  { %v13_v0 = vstv %s540_s7 }
   0x2   :  { %14 = vst [vmem:[#allocation4] sm:$0x1] %v13_v0 }
   0x3   :  { %v464_v1 = vld [vmem:[%s533_s0] sm:$0xff]  ;;  %vm41_vm0 = vcmask 261120  }
   0x4   :  { %v42_v2 = vsel %vm41_vm0, %v464_v1, 0.0 }
   0x5   :  { %43 = vadd.xlane.f32.xlu0 %v42_v2 }
   0x6   :  { %15 = vsyncpa [#allocation6], 0  ;;  %v471_v3 = vld [vmem:[%s533_s0 + $0x8] sm:$0xff]  ;;  %v407_v5 = vmov 32.0   ;;  %v348_v28 = vld [vmem:[%s536_s3] sm:$0xff]  ;;  %vm105_vm6 = vcmask 257024  }
   0x7   :  { %v45_v4 = vsel %vm41_vm0, %v471_v3, 0.0  ;;  %371 = vrcp.f32 %v407_v5  ;;  %v349_v25 = vld [vmem:[%s536_s3 + $0x8] sm:$0xff]  ;;  %v366_v38 = vld [vmem:[%s534_s1] ss:$0 sm:$0xff]  ;;  %v357_v55 = vld [vmem:[%s538_s5 + $0x38] sm:$0xff]  ;;  %s410_s10 = smov [#allocation5]  }
   0x8   :  { %147 = vmatpush.bf16.msra.mxu0 %v349_v25  ;;  %v367_v41 = vld [vmem:[%s535_s2] ss:$0 sm:$0xff]  ;;  %240 = vmatpush.bf16.msra.mxu1 %v357_v55  ;;  %v356_v56 = vld [vmem:[%s538_s5 + $0x30] sm:$0xff]  ;;  %v355_v57 = vld [vmem:[%s538_s5 + $0x28] sm:$0xff]  ;;  %s288_s0 = sshll.u32 %s410_s10, 4  ;;  %s411_s12 = smov 128   ;;  %s289_s0 = int_to_ptr.vmem [resolvable:$true] %s288_s0 }
   0x9   :  { %v354_v58 = vld [vmem:[%s538_s5 + $0x20] sm:$0xff]  ;;  %v353_v59 = vld [vmem:[%s538_s5 + $0x18] sm:$0xff]  ;;  %v352_v60 = vld [vmem:[%s538_s5 + $0x10] sm:$0xff]  ;;  %s412_s13 = smov 8  }
   0xa   :  { %v351_v61 = vld [vmem:[%s538_s5 + $0x8] sm:$0xff]  ;;  %v350_v62 = vld [vmem:[%s538_s5] sm:$0xff] }
   0xb   :  { %v368_v63 = vld [vmem:[%s537_s4] ss:$0 sm:$0xff] }
   0xc   :  { %148 = vmatpush.bf16.msra.mxu0 %v348_v28  ;;  %241 = vmatpush.bf16.msra.mxu1 %v356_v56 }
   0xd   :  { %46 = vadd.xlane.f32.xlu0 %v45_v4  ;;  %v372_v6 = vpop.eup %371  ;;  %v369_v4 = vld [vmem:[#allocation4] ss:$0 sm:$0xff] }
   0xe   :  { %v49_v7 = vmul.f32 32.0, %v372_v6  ;;  %vm53_vm1 = vweird.f32 %v372_v6 }
  0x10   :  { %v50_v8 = vsub.f32 1.0, %v49_v7  ;;  %242 = vmatpush.bf16.msra.mxu1 %v355_v57  ;;  %v409_v7 = vmov 0.0  }
  0x11   :  { %108 = vst.msk [vmem:[#allocation3] sm:$0xff] %vm41_vm0, %v409_v7 }
  0x12   :  { %v51_v9 = vmul.f32 %v372_v6, %v50_v8  ;;  %109 = vst.msk [vmem:[#allocation3 + $0x8] sm:$0xff] %vm41_vm0, %v409_v7 }
  0x14   :  { %v52_v10 = vadd.f32 %v372_v6, %v51_v9  ;;  %243 = vmatpush.bf16.msra.mxu1 %v354_v58 }
  0x16   :  { %v54_v11 = vsel %vm53_vm1, %v372_v6, %v52_v10  ;;  %v408_v6 = vmov 0  }
  0x17   :  { %364 = vset.pattern.permute.xlu2 %v408_v6  ;;  %365 = vset.pattern.permute.xlu0 %v408_v6 }
  0x18   :  { %244 = vmatpush.bf16.msra.mxu1 %v353_v59  ;;  %275 = vperm.xlu2 %364, %v369_v4   ;;  %v174_v28 = vld [vmem:[#allocation3] sm:$0xff] }
  0x1c   :  { %245 = vmatpush.bf16.msra.mxu1 %v352_v60 }
  0x20   :  { %246 = vmatpush.bf16.msra.mxu1 %v351_v61 }
  0x24   :  { %247 = vmatpush.bf16.msra.mxu1 %v350_v62 }
  0x78   :  { %v44_v12 = vpop.xlane.xlu0 %43 }
  0x79   :  { %v55_v13 = vmul.f32 %v54_v11, %v44_v12 }
  0x7b   :  { %v57_v14 = vsub.f32 %v464_v1, %v55_v13 }
  0x7d   :  { %v59_v15 = vmul.f32 %v57_v14, %v57_v14 }
  0x7f   :  { %v61_v16 = vsel %vm41_vm0, %v59_v15, 0.0 }
  0x80   :  { %62 = vadd.xlane.f32.xlu1 %v61_v16  ;;  %v47_v17 = vpop.xlane.xlu0 %46 }
  0x81   :  { %v56_v18 = vmul.f32 %v54_v11, %v47_v17 }
  0x83   :  { %v58_v19 = vsub.f32 %v471_v3, %v56_v18 }
  0x85   :  { %v60_v20 = vmul.f32 %v58_v19, %v58_v19 }
  0x87   :  { %v64_v21 = vsel %vm41_vm0, %v60_v20, 0.0 }
  0x88   :  { %65 = vadd.xlane.f32.xlu1 %v64_v21 }
  0xf3   :  { %v63_v22 = vpop.xlane.xlu1 %62 }
  0xf4   :  { %v67_v23 = vmul.f32 %v63_v22, %v54_v11 }
  0xf6   :  { %v69_v24 = vadd.f32 1e-05, %v67_v23 }
  0xf8   :  { %373 = vrsqrt.f32 %v69_v24  ;;  %vm77_vm3 = vweird.f32 %v69_v24 }
  0xfb   :  { %v66_v26 = vpop.xlane.xlu1 %65 }
  0xfc   :  { %v68_v27 = vmul.f32 %v66_v26, %v54_v11 }
  0xfe   :  { %v374_v29 = vpop.eup %373  ;;  %v70_v30 = vadd.f32 1e-05, %v68_v27 }
  0xff   :  { %v72_v31 = vmul.f32 %v374_v29, %v69_v24  ;;  %vm78_vm2 = vweird.f32 %v374_v29 }
 0x100   :  { %375 = vrsqrt.f32 %v70_v30  ;;  %vm79_vm4 = vmor %vm77_vm3, %vm78_vm2  ;;  %vm87_vm7 = vweird.f32 %v70_v30 }
 0x101   :  { %v73_v32 = vmul.f32 %v374_v29, %v72_v31  ;;  %v175_v31 = vld [vmem:[#allocation3 + $0x8] sm:$0xff] }
 0x103   :  { %v74_v33 = vmul.f32 0.5, %v73_v32  ;;  %v370_v32 = vld [vmem:[%s539_s6] ss:$0 sm:$0xff]  ;;  %s290_s6 = sshll.u32 %s541_s8, 4  ;;  %s291_s6 = int_to_ptr.hbm [resolvable:$true] %s290_s6 }
 0x105   :  { %v75_v34 = vsub.f32 1.5, %v74_v33 }
 0x106   :  { %v376_v35 = vpop.eup %375 }
 0x107   :  { %v76_v36 = vmul.f32 %v374_v29, %v75_v34  ;;  %v82_v37 = vmul.f32 %v376_v35, %v70_v30  ;;  %vm88_vm5 = vweird.f32 %v376_v35 }
 0x108   :  { %vm89_vm8 = vmor %vm87_vm7, %vm88_vm5 }
 0x109   :  { %v80_v39 = vsel %vm79_vm4, %v374_v29, %v76_v36  ;;  %v83_v40 = vmul.f32 %v376_v35, %v82_v37 }
 0x10a   :  { %v91_v42 = vmul.f32 %v80_v39, %v57_v14 }
 0x10b   :  { %v84_v43 = vmul.f32 0.5, %v83_v40 }
 0x10c   :  { %v96_v44 = vmul.f32 %v366_v38, %v91_v42 }
 0x10d   :  { %v85_v45 = vsub.f32 1.5, %v84_v43 }
 0x10e   :  { %v101_v46 = vadd.f32 %v367_v41, %v96_v44 }
 0x10f   :  { %v86_v47 = vmul.f32 %v376_v35, %v85_v45 }
 0x110   :  { %v103_v48 = vpack.c.bf16 %v101_v46, %v101_v46 }
 0x111   :  { %v90_v49 = vsel %vm89_vm8, %v376_v35, %v86_v47  ;;  %v276_v35 = vpop.permute.xlu2 %275 }
 0x112   :  { %106 = vst.msk [vmem:[#allocation2] sm:$0xf] %vm105_vm6, %v103_v48  ;;  %v92_v50 = vmul.f32 %v90_v49, %v58_v19 }
 0x114   :  { %v97_v51 = vmul.f32 %v366_v38, %v92_v50 }
 0x116   :  { %v102_v52 = vadd.f32 %v367_v41, %v97_v51 }
 0x118   :  { %v104_v53 = vpack.c.bf16 %v102_v52, %v102_v52 }
 0x11a   :  { %107 = vst.msk [vmem:[#allocation2 + $0x4] sm:$0xf] %vm105_vm6, %v104_v53 }
 0x121   :  { %v347_v54 = vld [vmem:[#allocation2] sm:$0xff] }
 0x122   :  { %314 = vmatmul.msk.bf16.vlgmr.msra.gmra.mxu0 %vm41_vm0, %v347_v54 }
 0x19f   :  { %v150_v0 = vpop.f32.mrf.mxu0 }
 0x1a0   :  { %v151_v2 = vadd.f32 %v368_v63, %v150_v0 }
 0x1a2   :  { %v157_v5 = vmul.f32 0.044715, %v151_v2  ;;  %v155_v22 = vmul.f32 0.5, %v151_v2 }
 0x1a4   :  { %v159_v8 = vmul.f32 %v157_v5, %v151_v2 }
 0x1a6   :  { %v161_v9 = vmul.f32 %v159_v8, %v151_v2 }
 0x1a7   :  { %v152_v10 = vpop.f32.mrf.mxu0 }
 0x1a8   :  { %v153_v11 = vadd.f32 %v368_v63, %v152_v10  ;;  %v163_v12 = vadd.f32 %v161_v9, %v151_v2 }
 0x1aa   :  { %v158_v13 = vmul.f32 0.044715, %v153_v11  ;;  %v165_v15 = vmul.f32 0.7978846, %v163_v12  ;;  %v156_v23 = vmul.f32 0.5, %v153_v11 }
 0x1ac   :  { %v160_v14 = vmul.f32 %v158_v13, %v153_v11  ;;  %377 = vtanh.f32 %v165_v15 }
 0x1ae   :  { %v162_v16 = vmul.f32 %v160_v14, %v153_v11 }
 0x1b0   :  { %v164_v17 = vadd.f32 %v162_v16, %v153_v11 }
 0x1b2   :  { %v166_v18 = vmul.f32 0.7978846, %v164_v17  ;;  %v378_v19 = vpop.eup %377 }
 0x1b3   :  { %v169_v20 = vadd.f32 1.0, %v378_v19 }
 0x1b4   :  { %379 = vtanh.f32 %v166_v18 }
 0x1b5   :  { %v171_v25 = vmul.f32 %v169_v20, %v155_v22 }
 0x1ba   :  { %v380_v21 = vpop.eup %379 }
 0x1bb   :  { %v170_v24 = vadd.f32 1.0, %v380_v21 }
 0x1bd   :  { %v172_v26 = vmul.f32 %v170_v24, %v156_v23 }
 0x1bf   :  { %v173_v27 = vpack.c.bf16 %v172_v26, %v171_v25 }
 0x1c1   :  { %248 = vmatmul.bf16.vlgmr.msra.gmra.mxu1 %v173_v27 }
 0x23e   :  { %v249_v29 = vpop.f32.mrf.mxu1 }
 0x23f   :  { %v254_v30 = vadd.f32 %v249_v29, %v174_v28 }
 0x241   :  { %256 = vst.msk [vmem:[#allocation3] sm:$0xff] %vm41_vm0, %v254_v30 }
 0x246   :  { %v251_v33 = vpop.f32.mrf.mxu1 }
 0x247   :  { %v255_v34 = vadd.f32 %v251_v33, %v175_v31 }
 0x248   :  { %v263_v36 = vld [vmem:[#allocation3] sm:$0xff] }
 0x249   :  { %257 = vst.msk [vmem:[#allocation3 + $0x8] sm:$0xff] %vm41_vm0, %v255_v34  ;;  %v269_v37 = vadd.f32 %v370_v32, %v263_v36 }
 0x24b   :  { %v278_v38 = vmul.f32 %v276_v35, %v269_v37 }
 0x24d   :  { %v280_v39 = vadd.f32 %v278_v38, %v464_v1 }
 0x24f   :  { %282 = vst.msk [vmem:[#allocation5] sm:$0xff] %vm41_vm0, %v280_v39 }
 0x250   :  { %v264_v40 = vld [vmem:[#allocation3 + $0x8] sm:$0xff] }
 0x251   :  { %v270_v41 = vadd.f32 %v370_v32, %v264_v40 }
 0x253   :  { %v279_v42 = vmul.f32 %v276_v35, %v270_v41 }
 0x255   :  { %v281_v43 = vadd.f32 %v279_v42, %v471_v3 }
 0x257   :  { %283 = vst.msk [vmem:[#allocation5 + $0x8] sm:$0xff] %vm41_vm0, %v281_v43 }
 0x258   :  { %296 = dma.vmem_to_hbm [thread:$0]  %s289_s0, 256, %s291_s6, [#allocation6], %s411_s12, %s411_s12, %s412_s13  }
 0x259   :  { %405 = dma.done.wait [#allocation6], 256  }
 0x25a   :  { %406 = vsyncadd [#allocation6], 4294967040 }
 0x25b   :  { %301 = vsyncpa [#allocation6], 1 }

// kernel: modified_lm_block_forward.5
= control target key start
LH: loop header
LB: loop body
LE: loop exit
PB: predicated region body
PF: predicated region fallthrough
CT: control target
= control target key end

     0   :  { %s517_s0 = inlined_call_operand.vmem [shape: f32[16,32], index: 0, kind: input, shape index: {}]   ;;  %s518_s1 = inlined_call_operand.vmem [shape: f32[1,32], index: 1, kind: input, shape index: {}]   ;;  %s519_s2 = inlined_call_operand.vmem [shape: f32[1,32], index: 2, kind: input, shape index: {}, may-alias: {2,6}]   ;;  %s520_s3 = inlined_call_operand.vmem [shape: bf16[32,128], index: 3, kind: input, shape index: {}]   ;;  %s521_s4 = inlined_call_operand.vmem [shape: f32[1,128], index: 4, kind: input, shape index: {}]   ;;  %s522_s5 = inlined_call_operand.hbm [shape: bf16[128,32], index: 5, kind: input, shape index: {}]   ;;  %s523_s6 = inlined_call_operand.vmem [shape: f32[1,32], index: 6, kind: input, shape index: {}, may-alias: {2,6}]   ;;  %s524_s7 = inlined_call_operand.<no memory space> [shape: f32[1,1], index: 7, kind: input, shape index: {}]   ;;  %s525_s8 = inlined_call_operand.vmem [shape: f32[16,32], index: 8, kind: output, shape index: {}]  }
   0x1   :  { %v13_v0 = vstv %s524_s7 }
   0x2   :  { %14 = vst [vmem:[#allocation4] sm:$0x1] %v13_v0 }
   0x3   :  { %15 = vsyncpa [#allocation6], 0  ;;  %s30_s9 = sshll.u32 %s522_s5, 4  ;;  %s409_s10 = smov [#allocation5]   ;;  %s31_s9 = int_to_ptr.hbm [resolvable:$true] %s30_s9 }
   0x4   :  { %s32_s11 = sshll.u32 %s409_s10, 4  ;;  %s410_s12 = smov 64   ;;  %s33_s11 = int_to_ptr.vmem [resolvable:$true] %s32_s11 }
   0x5   :  { %s411_s13 = smov 4  }
   0x6   :  { %38 = dma.hbm_to_vmem [thread:$0]  %s31_s9, 1024, %s33_s11, [#allocation6], %s410_s12, %s410_s12, %s411_s13  }
   0x7   :  { %407 = dma.done.wait [#allocation6], 1024  }
   0x8   :  { %408 = vsyncadd [#allocation6], 4294966272  ;;  %vm56_vm0 = vcmask 261120   ;;  %v469_v1 = vld [vmem:[%s517_s0] sm:$0xff]  ;;  %v476_v3 = vld [vmem:[%s517_s0 + $0x8] sm:$0xff]  ;;  %v412_v5 = vmov 32.0  }
   0x9   :  { %v57_v2 = vsel %vm56_vm0, %v469_v1, 0.0  ;;  %v60_v4 = vsel %vm56_vm0, %v476_v3, 0.0  ;;  %373 = vrcp.f32 %v412_v5  ;;  %v351_v25 = vld [vmem:[%s520_s3 + $0x8] sm:$0xff]  ;;  %v350_v28 = vld [vmem:[%s520_s3] sm:$0xff]  ;;  %vm120_vm6 = vcmask 257024   ;;  %v359_v55 = vld [vmem:[#allocation5 + $0x38] sm:$0xff] }
   0xa   :  { %58 = vadd.xlane.f32.xlu0 %v57_v2  ;;  %162 = vmatpush.bf16.msra.mxu0 %v351_v25  ;;  %v368_v38 = vld [vmem:[%s518_s1] ss:$0 sm:$0xff]  ;;  %v358_v56 = vld [vmem:[#allocation5 + $0x30] sm:$0xff]  ;;  %v357_v57 = vld [vmem:[#allocation5 + $0x28] sm:$0xff] }
   0xb   :  { %v369_v41 = vld [vmem:[%s519_s2] ss:$0 sm:$0xff]  ;;  %255 = vmatpush.bf16.msra.mxu1 %v359_v55  ;;  %v355_v59 = vld [vmem:[#allocation5 + $0x18] sm:$0xff]  ;;  %v354_v60 = vld [vmem:[#allocation5 + $0x10] sm:$0xff] }
   0xc   :  { %v356_v58 = vld [vmem:[#allocation5 + $0x20] sm:$0xff]  ;;  %v353_v61 = vld [vmem:[#allocation5 + $0x8] sm:$0xff] }
   0xd   :  { %v352_v62 = vld [vmem:[#allocation5] sm:$0xff] }
   0xe   :  { %163 = vmatpush.bf16.msra.mxu0 %v350_v28  ;;  %v370_v63 = vld [vmem:[%s521_s4] ss:$0 sm:$0xff] }
   0xf   :  { %v374_v6 = vpop.eup %373  ;;  %256 = vmatpush.bf16.msra.mxu1 %v358_v56 }
  0x10   :  { %v64_v7 = vmul.f32 32.0, %v374_v6  ;;  %vm68_vm1 = vweird.f32 %v374_v6 }
  0x12   :  { %61 = vadd.xlane.f32.xlu0 %v60_v4  ;;  %v65_v8 = vsub.f32 1.0, %v64_v7  ;;  %v371_v4 = vld [vmem:[#allocation4] ss:$0 sm:$0xff]  ;;  %v414_v7 = vmov 0.0  }
  0x13   :  { %257 = vmatpush.bf16.msra.mxu1 %v357_v57  ;;  %123 = vst.msk [vmem:[#allocation3] sm:$0xff] %vm56_vm0, %v414_v7 }
  0x14   :  { %v66_v9 = vmul.f32 %v374_v6, %v65_v8  ;;  %124 = vst.msk [vmem:[#allocation3 + $0x8] sm:$0xff] %vm56_vm0, %v414_v7 }
  0x16   :  { %v67_v10 = vadd.f32 %v374_v6, %v66_v9 }
  0x17   :  { %258 = vmatpush.bf16.msra.mxu1 %v356_v58 }
  0x18   :  { %v69_v11 = vsel %vm68_vm1, %v374_v6, %v67_v10  ;;  %v413_v6 = vmov 0  }
  0x19   :  { %366 = vset.pattern.permute.xlu2 %v413_v6  ;;  %367 = vset.pattern.permute.xlu0 %v413_v6 }
  0x1a   :  { %290 = vperm.xlu2 %366, %v371_v4   ;;  %v189_v28 = vld [vmem:[#allocation3] sm:$0xff] }
  0x1b   :  { %259 = vmatpush.bf16.msra.mxu1 %v355_v59 }
  0x1f   :  { %260 = vmatpush.bf16.msra.mxu1 %v354_v60 }
  0x23   :  { %261 = vmatpush.bf16.msra.mxu1 %v353_v61 }
  0x27   :  { %262 = vmatpush.bf16.msra.mxu1 %v352_v62 }
  0x7d   :  { %v59_v12 = vpop.xlane.xlu0 %58 }
  0x7e   :  { %v70_v13 = vmul.f32 %v69_v11, %v59_v12 }
  0x80   :  { %v72_v14 = vsub.f32 %v469_v1, %v70_v13 }
  0x82   :  { %v74_v15 = vmul.f32 %v72_v14, %v72_v14 }
  0x84   :  { %v76_v16 = vsel %vm56_vm0, %v74_v15, 0.0 }
  0x85   :  { %77 = vadd.xlane.f32.xlu1 %v76_v16  ;;  %v62_v17 = vpop.xlane.xlu0 %61 }
  0x86   :  { %v71_v18 = vmul.f32 %v69_v11, %v62_v17 }
  0x88   :  { %v73_v19 = vsub.f32 %v476_v3, %v71_v18 }
  0x8a   :  { %v75_v20 = vmul.f32 %v73_v19, %v73_v19 }
  0x8c   :  { %v79_v21 = vsel %vm56_vm0, %v75_v20, 0.0 }
  0x8d   :  { %80 = vadd.xlane.f32.xlu1 %v79_v21 }
  0xf8   :  { %v78_v22 = vpop.xlane.xlu1 %77 }
  0xf9   :  { %v82_v23 = vmul.f32 %v78_v22, %v69_v11 }
  0xfb   :  { %v84_v24 = vadd.f32 1e-05, %v82_v23 }
  0xfd   :  { %375 = vrsqrt.f32 %v84_v24  ;;  %vm92_vm3 = vweird.f32 %v84_v24 }
 0x100   :  { %v81_v26 = vpop.xlane.xlu1 %80 }
 0x101   :  { %v83_v27 = vmul.f32 %v81_v26, %v69_v11 }
 0x103   :  { %v376_v29 = vpop.eup %375  ;;  %v85_v30 = vadd.f32 1e-05, %v83_v27 }
 0x104   :  { %v87_v31 = vmul.f32 %v376_v29, %v84_v24  ;;  %vm93_vm2 = vweird.f32 %v376_v29 }
 0x105   :  { %377 = vrsqrt.f32 %v85_v30  ;;  %vm94_vm4 = vmor %vm92_vm3, %vm93_vm2  ;;  %vm102_vm7 = vweird.f32 %v85_v30 }
 0x106   :  { %v88_v32 = vmul.f32 %v376_v29, %v87_v31  ;;  %v190_v31 = vld [vmem:[#allocation3 + $0x8] sm:$0xff] }
 0x108   :  { %v89_v33 = vmul.f32 0.5, %v88_v32  ;;  %v372_v32 = vld [vmem:[%s523_s6] ss:$0 sm:$0xff] }
 0x10a   :  { %v90_v34 = vsub.f32 1.5, %v89_v33 }
 0x10b   :  { %v378_v35 = vpop.eup %377 }
 0x10c   :  { %v91_v36 = vmul.f32 %v376_v29, %v90_v34  ;;  %v97_v37 = vmul.f32 %v378_v35, %v85_v30  ;;  %vm103_vm5 = vweird.f32 %v378_v35 }
 0x10d   :  { %vm104_vm8 = vmor %vm102_vm7, %vm103_vm5 }
 0x10e   :  { %v95_v39 = vsel %vm94_vm4, %v376_v29, %v91_v36  ;;  %v98_v40 = vmul.f32 %v378_v35, %v97_v37 }
 0x10f   :  { %v106_v42 = vmul.f32 %v95_v39, %v72_v14 }
 0x110   :  { %v99_v43 = vmul.f32 0.5, %v98_v40 }
 0x111   :  { %v111_v44 = vmul.f32 %v368_v38, %v106_v42 }
 0x112   :  { %v100_v45 = vsub.f32 1.5, %v99_v43 }
 0x113   :  { %v116_v46 = vadd.f32 %v369_v41, %v111_v44 }
 0x114   :  { %v101_v47 = vmul.f32 %v378_v35, %v100_v45 }
 0x115   :  { %v118_v48 = vpack.c.bf16 %v116_v46, %v116_v46 }
 0x116   :  { %v105_v49 = vsel %vm104_vm8, %v378_v35, %v101_v47  ;;  %v291_v35 = vpop.permute.xlu2 %290 }
 0x117   :  { %121 = vst.msk [vmem:[#allocation2] sm:$0xf] %vm120_vm6, %v118_v48  ;;  %v107_v50 = vmul.f32 %v105_v49, %v73_v19 }
 0x119   :  { %v112_v51 = vmul.f32 %v368_v38, %v107_v50 }
 0x11b   :  { %v117_v52 = vadd.f32 %v369_v41, %v112_v51 }
 0x11d   :  { %v119_v53 = vpack.c.bf16 %v117_v52, %v117_v52 }
 0x11f   :  { %122 = vst.msk [vmem:[#allocation2 + $0x4] sm:$0xf] %vm120_vm6, %v119_v53 }
 0x126   :  { %v349_v54 = vld [vmem:[#allocation2] sm:$0xff] }
 0x127   :  { %316 = vmatmul.msk.bf16.vlgmr.msra.gmra.mxu0 %vm56_vm0, %v349_v54 }
 0x1a4   :  { %v165_v0 = vpop.f32.mrf.mxu0 }
 0x1a5   :  { %v166_v2 = vadd.f32 %v370_v63, %v165_v0 }
 0x1a7   :  { %v172_v5 = vmul.f32 0.044715, %v166_v2  ;;  %v170_v22 = vmul.f32 0.5, %v166_v2 }
 0x1a9   :  { %v174_v8 = vmul.f32 %v172_v5, %v166_v2 }
 0x1ab   :  { %v176_v9 = vmul.f32 %v174_v8, %v166_v2 }
 0x1ac   :  { %v167_v10 = vpop.f32.mrf.mxu0 }
 0x1ad   :  { %v168_v11 = vadd.f32 %v370_v63, %v167_v10  ;;  %v178_v12 = vadd.f32 %v176_v9, %v166_v2 }
 0x1af   :  { %v173_v13 = vmul.f32 0.044715, %v168_v11  ;;  %v180_v15 = vmul.f32 0.7978846, %v178_v12  ;;  %v171_v23 = vmul.f32 0.5, %v168_v11 }
 0x1b1   :  { %v175_v14 = vmul.f32 %v173_v13, %v168_v11  ;;  %379 = vtanh.f32 %v180_v15 }
 0x1b3   :  { %v177_v16 = vmul.f32 %v175_v14, %v168_v11 }
 0x1b5   :  { %v179_v17 = vadd.f32 %v177_v16, %v168_v11 }
 0x1b7   :  { %v181_v18 = vmul.f32 0.7978846, %v179_v17  ;;  %v380_v19 = vpop.eup %379 }
 0x1b8   :  { %v184_v20 = vadd.f32 1.0, %v380_v19 }
 0x1b9   :  { %381 = vtanh.f32 %v181_v18 }
 0x1ba   :  { %v186_v25 = vmul.f32 %v184_v20, %v170_v22 }
 0x1bf   :  { %v382_v21 = vpop.eup %381 }
 0x1c0   :  { %v185_v24 = vadd.f32 1.0, %v382_v21 }
 0x1c2   :  { %v187_v26 = vmul.f32 %v185_v24, %v171_v23 }
 0x1c4   :  { %v188_v27 = vpack.c.bf16 %v187_v26, %v186_v25 }
 0x1c6   :  { %263 = vmatmul.bf16.vlgmr.msra.gmra.mxu1 %v188_v27 }
 0x243   :  { %v264_v29 = vpop.f32.mrf.mxu1 }
 0x244   :  { %v269_v30 = vadd.f32 %v264_v29, %v189_v28 }
 0x246   :  { %271 = vst.msk [vmem:[#allocation3] sm:$0xff] %vm56_vm0, %v269_v30 }
 0x24b   :  { %v266_v33 = vpop.f32.mrf.mxu1 }
 0x24c   :  { %v270_v34 = vadd.f32 %v266_v33, %v190_v31 }
 0x24d   :  { %v278_v36 = vld [vmem:[#allocation3] sm:$0xff] }
 0x24e   :  { %272 = vst.msk [vmem:[#allocation3 + $0x8] sm:$0xff] %vm56_vm0, %v270_v34  ;;  %v284_v37 = vadd.f32 %v372_v32, %v278_v36 }
 0x250   :  { %v293_v38 = vmul.f32 %v291_v35, %v284_v37 }
 0x252   :  { %v295_v39 = vadd.f32 %v293_v38, %v469_v1 }
 0x254   :  { %297 = vst.msk [vmem:[%s525_s8] sm:$0xff] %vm56_vm0, %v295_v39 }
 0x255   :  { %v279_v40 = vld [vmem:[#allocation3 + $0x8] sm:$0xff] }
 0x256   :  { %v285_v41 = vadd.f32 %v372_v32, %v279_v40 }
 0x258   :  { %v294_v42 = vmul.f32 %v291_v35, %v285_v41 }
 0x25a   :  { %v296_v43 = vadd.f32 %v294_v42, %v476_v3 }
 0x25c   :  { %298 = vst.msk [vmem:[%s525_s8 + $0x8] sm:$0xff] %vm56_vm0, %v296_v43 }
 0x25d   :  { %303 = vsyncpa [#allocation6], 1 }

// kernel: modified_lm_block_forward.6
= control target key start
LH: loop header
LB: loop body
LE: loop exit
PB: predicated region body
PF: predicated region fallthrough
CT: control target
= control target key end

     0   :  { %16 = vsyncpa [#allocation7], 0  ;;  %s1589_s0 = inlined_call_operand.vmem [shape: f32[2,8,32], index: 0, kind: input, shape index: {}, may-alias: {0,1}]   ;;  %s1590_s1 = inlined_call_operand.vmem [shape: f32[2,8,32], index: 1, kind: input, shape index: {}, may-alias: {0,1}]   ;;  %s1591_s2 = inlined_call_operand.vmem [shape: f32[2,1,8], index: 2, kind: input, shape index: {}]   ;;  %s1592_s3 = inlined_call_operand.vmem [shape: f32[1,32], index: 3, kind: input, shape index: {}]   ;;  %s1593_s4 = inlined_call_operand.vmem [shape: f32[1,32], index: 4, kind: input, shape index: {}, may-alias: {4,6,10}]   ;;  %s1594_s5 = inlined_call_operand.hbm [shape: bf16[32,32], index: 5, kind: input, shape index: {}]   ;;  %s1595_s6 = inlined_call_operand.vmem [shape: f32[1,32], index: 6, kind: input, shape index: {}, may-alias: {4,6,10}]   ;;  %s1596_s7 = inlined_call_operand.hbm [shape: bf16[32,64], index: 7, kind: input, shape index: {}]   ;;  %s1597_s8 = inlined_call_operand.vmem [shape: f32[1,64], index: 8, kind: input, shape index: {}]   ;;  %s1598_s9 = inlined_call_operand.vmem [shape: bf16[32,32], index: 9, kind: input, shape index: {}]   ;;  %s1599_s10 = inlined_call_operand.vmem [shape: f32[1,32], index: 10, kind: input, shape index: {}, may-alias: {4,6,10}]   ;;  %s1600_s11 = inlined_call_operand.vmem [shape: f32[2,8,32], index: 11, kind: output, shape index: {}]  }
   0x1   :  { %17 = vsyncpa [#allocation9], 0  ;;  %s1416_s17 = smov 0   ;;  %s1418_s18 = smov 0  }
   0x2   :  { %s1420_s19 = smov 0  }
   0x3 LB: > { %s1104_s20 = sadd.s32 4294967295, %s1338_s19   ;;  %s35_s21 = sadd.s32 1, %s1334_s18  ;;  %s1338_s19 = sphi %s1420_s19, %s23_s19   ;;  %s1334_s18 = sphi %s1418_s18, %s1604_s18   ;;  %s1330_s17 = sphi %s1416_s17, %s1603_s17  }
   0x4   : > { %p37_p0 = scmp.ge.s32.totalorder %s35_s21, 2  ;;  %p1106_p1 = scmp.ge.s32.totalorder %s1338_s19, 1 }
   0x5   : > { %p316_p2 = scmp.lt.s32.totalorder %s1338_s19, 3  ;;  %p1441_p4 = scmp.eq.s32.totalorder %s1104_s20, 0 }
   0x6   : > { %s1606_s21 = smov (%p37_p0, %s35_s21), 0  ;;  %s333_s26 = sshll.u32 %s1594_s5, 4  ;;  %s334_s26 = int_to_ptr.hbm [resolvable:$true] %s333_s26 }
   0x7   : > { %p1437_p3 = pnand %p1106_p1, %p316_p2  ;;  %s1340_s27 = smov [#allocation6]  }
   0x8   : > { %s335_s28 = sshll.u32 %s1340_s27, 4  ;;  %s350_s12 = sshll.u32 %s1596_s7, 4  ;;  %s336_s28 = int_to_ptr.vmem [resolvable:$true] %s335_s28  ;;  %s351_s12 = int_to_ptr.hbm [resolvable:$true] %s350_s12 }
   0x9   : > { %p1167_p5 = pneg %p1437_p3  ;;  %s1341_s13 = smov 64  }
   0xa   : > { %s1342_s14 = smov 4   ;;  %s1343_s15 = smov [#allocation8]  }
   0xb   : > { %p1168_p6 = pnand %p1441_p4, %p1167_p5  ;;  %s352_s16 = sshll.u32 %s1343_s15, 4  ;;  %s353_s16 = int_to_ptr.vmem [resolvable:$true] %s352_s16 }
   0xc   : > { %400 = sbr.rel (%p1437_p3) target bundleno = 1332 (0x534), region = 64 }
   0xd   : > { %1170 = dma.hbm_to_vmem [thread:$0]  (!%p1168_p6), %s334_s26, 256, %s336_s28, [#allocation7], %s1341_s13, %s1341_s13, %s1342_s14  }
   0xe   : > { %1173 = dma.hbm_to_vmem [thread:$0]  (!%p1168_p6), %s351_s12, 256, %s353_s16, [#allocation9], %s1341_s13, %s1341_s13, %s1342_s14  }
  0x11   : > { %1321 = dma.done.wait (%p1441_p4), [#allocation7], 256  }
  0x12   : > { %1323 = vsyncadd (%p1441_p4), [#allocation7], 4294967040 }
  0x13   : > { %1325 = dma.done.wait (%p1441_p4), [#allocation9], 256  }
  0x14   : > { %1327 = vsyncadd (%p1441_p4), [#allocation9], 4294967040  ;;  %p457_p7 = scmp.lt.s32.totalorder %s1330_s17, 1  ;;  %vm486_vm0 = vcmask 261120   ;;  %v1344_v4 = vmov 32.0   ;;  %v1154_v21 = vld [vmem:[#allocation8 + $0x8] sm:$0xff] }
  0x15   : > { %1226 = vrcp.f32 %v1344_v4  ;;  %554 = vmatpush.bf16.msra.mxu0 %v1154_v21  ;;  %v1153_v22 = vld [vmem:[#allocation8] sm:$0xff]  ;;  %v1156_v23 = vld [vmem:[#allocation6 + $0x8] sm:$0xff]  ;;  %v1155_v25 = vld [vmem:[#allocation6] sm:$0xff]  ;;  %vm562_vm8 = vcmask 60416   ;;  %s1345_s28 = smov 112   ;;  %s1346_s29 = smov 120  }
  0x16   : > { %s1608_s17 = smov (!%p457_p7, %s1330_s17), 1  ;;  %670 = vmatpush.bf16.msra.mxu1 %v1156_v23  ;;  %v1219_v39 = vld [vmem:[%s1592_s3] ss:$0 sm:$0xff]  ;;  %s1347_s13 = smov 104   ;;  %vm722_vm9 = vcmask 64512   ;;  %vm850_vm11 = vcmask 1043456  }
  0x17   : > { %s1470_s20 = sshll.u32 %s1608_s17, 3  ;;  %s470_s23 = scalar_lea.vmem %s1591_s2, %s1608_s17  ;;  %v1220_v43 = vld [vmem:[%s1593_s4] ss:$0 sm:$0xff]  ;;  %vm931_vm12 = vcmask 126016   ;;  %vm938_vm13 = vcmask 191616   ;;  %vm945_vm14 = vcmask 257216  }
  0x18   : > { %s460_s25 = scalar_lea.vmem %s1589_s0, %s1470_s20  ;;  %s467_s30 = scalar_lea.vmem %s1590_s1, %s1470_s20  ;;  %v1221_v50 = vld [vmem:[%s1592_s3] ss:$0 sm:$0xff] }
  0x19   : > { %v483_v0 = vld [vmem:[%s460_s25] sm:$0xff]  ;;  %555 = vmatpush.bf16.msra.mxu0 %v1153_v22  ;;  %s1349_s17 = smov 88   ;;  %s1351_s16 = smov 96  }
  0x1a   : > { %v487_v1 = vsel %vm486_vm0, %v483_v0, 0.0  ;;  %v1485_v2 = vld [vmem:[%s467_s30] sm:$0xff]  ;;  %671 = vmatpush.bf16.msra.mxu1 %v1155_v25  ;;  %s1352_s22 = smov 72   ;;  %s1353_s24 = smov 16  }
  0x1b   : > { %488 = vadd.xlane.f32.xlu0 %v487_v1  ;;  %v603_v3 = vsel %vm486_vm0, %v1485_v2, 0.0  ;;  %v1227_v5 = vpop.eup %1226  ;;  %v1222_v53 = vld [vmem:[%s1593_s4] ss:$0 sm:$0xff]  ;;  %s1354_s25 = smov 8   ;;  %s1355_s26 = smov 24  }
  0x1c   : > { %v491_v6 = vmul.f32 32.0, %v1227_v5  ;;  %vm495_vm1 = vweird.f32 %v1227_v5  ;;  %v1223_v57 = vld [vmem:[%s1597_s8] ss:$0 sm:$0xff] }
  0x1d   : > { %v1224_v61 = vld [vmem:[%s1595_s6] ss:$0 sm:$0xff] }
  0x1e   : > { %v492_v7 = vsub.f32 1.0, %v491_v6  ;;  %v1218_v25 = vld [vmem:[%s470_s23] ss:$0 sm:$0xff]  ;;  %s1350_s23 = smov 80  }
  0x20   : > { %v493_v8 = vmul.f32 %v1227_v5, %v492_v7 }
  0x22   : > { %v494_v9 = vadd.f32 %v1227_v5, %v493_v8 }
  0x23   : > { %604 = vadd.xlane.f32.xlu0 %v603_v3 }
  0x24   : > { %v496_v10 = vsel %vm495_vm1, %v1227_v5, %v494_v9 }
  0x8e   : > { %v489_v11 = vpop.xlane.xlu0 %488 }
  0x8f   : > { %v497_v12 = vmul.f32 %v496_v10, %v489_v11 }
  0x91   : > { %v498_v13 = vsub.f32 %v483_v0, %v497_v12 }
  0x93   : > { %v499_v14 = vmul.f32 %v498_v13, %v498_v13 }
  0x95   : > { %v500_v15 = vsel %vm486_vm0, %v499_v14, 0.0 }
  0x96   : > { %501 = vadd.xlane.f32.xlu1 %v500_v15  ;;  %v605_v16 = vpop.xlane.xlu0 %604 }
  0x97   : > { %v613_v17 = vmul.f32 %v605_v16, %v496_v10 }
  0x99   : > { %v614_v18 = vsub.f32 %v1485_v2, %v613_v17 }
  0x9b   : > { %v615_v19 = vmul.f32 %v614_v18, %v614_v18 }
  0x9d   : > { %v616_v20 = vsel %vm486_vm0, %v615_v19, 0.0 }
  0x9e   : > { %617 = vadd.xlane.f32.xlu1 %v616_v20  ;;  %v697_v20 = vlaneseq }
  0xa0   : > { %v698_v23 = vshrl.u32 %v697_v20, 7 }
 0x109   : > { %v502_v24 = vpop.xlane.xlu1 %501 }
 0x10a   : > { %v503_v26 = vmul.f32 %v502_v24, %v496_v10  ;;  %v702_v24 = vand.u32 127, %v697_v20 }
 0x10c   : > { %v504_v27 = vadd.f32 1e-05, %v503_v26  ;;  %vm703_vm10 = vcmp.le.s32.totalorder %v702_v24, %v698_v23  ;;  %v1348_v26 = vmov -1e+09  }
 0x10e   : > { %1228 = vrsqrt.f32 %v504_v27  ;;  %vm511_vm3 = vweird.f32 %v504_v27 }
 0x111   : > { %v618_v28 = vpop.xlane.xlu1 %617 }
 0x112   : > { %v619_v29 = vmul.f32 %v618_v28, %v496_v10 }
 0x114   : > { %v1229_v30 = vpop.eup %1228  ;;  %v620_v31 = vadd.f32 1e-05, %v619_v29 }
 0x115   : > { %v506_v32 = vmul.f32 %v1229_v30, %v504_v27  ;;  %vm512_vm2 = vweird.f32 %v1229_v30  ;;  %v704_v27 = vsel %vm703_vm10, 0.0, %v1348_v26 }
 0x116   : > { %1230 = vrsqrt.f32 %v620_v31  ;;  %vm513_vm4 = vmor %vm511_vm3, %vm512_vm2  ;;  %vm627_vm5 = vweird.f32 %v620_v31  ;;  %v709_v28 = vadd.f32 %v1218_v25, %v704_v27 }
 0x117   : > { %v507_v33 = vmul.f32 %v1229_v30, %v506_v32 }
 0x119   : > { %v508_v34 = vmul.f32 0.5, %v507_v33 }
 0x11b   : > { %v509_v35 = vsub.f32 1.5, %v508_v34 }
 0x11c   : > { %v1231_v36 = vpop.eup %1230 }
 0x11d   : > { %v510_v37 = vmul.f32 %v1229_v30, %v509_v35  ;;  %v622_v38 = vmul.f32 %v1231_v36, %v620_v31  ;;  %vm628_vm6 = vweird.f32 %v1231_v36 }
 0x11e   : > { %vm629_vm7 = vmor %vm627_vm5, %vm628_vm6 }
 0x11f   : > { %v514_v40 = vsel %vm513_vm4, %v1229_v30, %v510_v37  ;;  %v623_v41 = vmul.f32 %v1231_v36, %v622_v38 }
 0x120   : > { %v515_v42 = vmul.f32 %v514_v40, %v498_v13 }
 0x121   : > { %v624_v44 = vmul.f32 0.5, %v623_v41 }
 0x122   : > { %v519_v45 = vmul.f32 %v1219_v39, %v515_v42 }
 0x123   : > { %v625_v46 = vsub.f32 1.5, %v624_v44 }
 0x124   : > { %v523_v47 = vadd.f32 %v1220_v43, %v519_v45 }
 0x125   : > { %v626_v48 = vmul.f32 %v1231_v36, %v625_v46 }
 0x126   : > { %v524_v49 = vpack.c.bf16 %v523_v47, %v523_v47 }
 0x127   : > { %v630_v51 = vsel %vm629_vm7, %v1231_v36, %v626_v48 }
 0x128   : > { %1124 = vmatmul.msk.bf16.vlgmr.msra.gmra.mxu0 %vm486_vm0, %v524_v49  ;;  %v631_v52 = vmul.f32 %v630_v51, %v614_v18 }
 0x12a   : > { %v635_v54 = vmul.f32 %v1221_v50, %v631_v52 }
 0x12c   : > { %v639_v55 = vadd.f32 %v1222_v53, %v635_v54 }
 0x12e   : > { %v640_v56 = vpack.c.bf16 %v639_v55, %v639_v55 }
 0x130   : > { %1133 = vmatmul.msk.bf16.vlgmr.msra.gmra.mxu1 %vm486_vm0, %v640_v56 }
 0x1a5   : > { %v557_v58 = vpop.f32.mrf.mxu0 }
 0x1a6   : > { %v558_v59 = vadd.f32 %v1223_v57, %v557_v58 }
 0x1a8   : > { %v1509_v60 = vpack.c.bf16 %v558_v59, %v558_v59 }
 0x1aa   : > { %579 = vrot.lane.b32.xlu0 %v1509_v60, %s1345_s28  ;;  %569 = vrot.lane.b32.xlu2 %v1509_v60, %s1346_s29  ;;  %563 = vst.msk [vmem:[#allocation2] sm:$0xf] %vm562_vm8, %v1509_v60 }
 0x1ab   : > { %589 = vrot.lane.b32.xlu1 %v1509_v60, %s1347_s13 }
 0x1ad   : > { %v559_v62 = vpop.f32.mrf.mxu0  ;;  %v673_v63 = vpop.f32.mrf.mxu1 }
 0x1ae   : > { %v674_v0 = vadd.f32 %v1224_v61, %v673_v63 }
 0x1b0   : > { %v677_v1 = vpack.c.bf16 %v674_v0, %v674_v0 }
 0x1b1   : > { %v714_v3 = vld [vmem:[#allocation2] sm:$0xf] }
 0x1b2   : > { %679 = vst.msk [vmem:[#allocation4] sm:$0xf] %vm562_vm8, %v677_v1  ;;  %681 = vrot.lane.b32.xlu2 %v677_v1, %s1346_s29  ;;  %v727_v4 = vsel %vm722_vm9, %v714_v3, 0 }
 0x1b3   : > { %736 = vmatpush.bf16.xpose.msra.mxu2 %v727_v4 }
 0x1b5   : > { %v675_v5 = vpop.f32.mrf.mxu1 }
 0x1b9   : > { %v710_v6 = vld [vmem:[#allocation4] sm:$0xf] }
 0x1ba   : > { %686 = vrot.lane.b32.xlu2 %v677_v1, %s1345_s28  ;;  %1134 = vmatmul.msk.bf16.vlgmr.msra.gmra.mxu2 %vm722_vm9, %v710_v6 }
 0x1c2   : > { %691 = vrot.lane.b32.xlu2 %v677_v1, %s1347_s13 }
 0x204   : > { %v570_v7 = vpop.permute.xlu2 %569 }
 0x205   : > { %573 = vst.msk [vmem:[#allocation2 + $0x4] sm:$0xf] %vm562_vm8, %v570_v7 }
 0x20c   : > { %v682_v8 = vpop.permute.xlu2 %681  ;;  %v715_v9 = vld [vmem:[#allocation2 + $0x4] sm:$0xf] }
 0x20d   : > { %685 = vst.msk [vmem:[#allocation4 + $0x4] sm:$0xf] %vm562_vm8, %v682_v8  ;;  %v746_v10 = vsel %vm722_vm9, %v715_v9, 0 }
 0x20e   : > { %755 = vmatpush.bf16.xpose.msra.mxu3 %v746_v10 }
 0x214   : > { %v687_v11 = vpop.permute.xlu2 %686  ;;  %v711_v12 = vld [vmem:[#allocation4 + $0x4] sm:$0xf] }
 0x215   : > { %690 = vst.msk [vmem:[#allocation4 + $0x8] sm:$0xf] %vm562_vm8, %v687_v11  ;;  %1135 = vmatmul.msk.bf16.vlgmr.msra.gmra.mxu3 %vm722_vm9, %v711_v12 }
 0x21c   : > { %v692_v13 = vpop.permute.xlu2 %691  ;;  %v580_v14 = vpop.permute.xlu0 %579  ;;  %v712_v22 = vld [vmem:[#allocation4 + $0x8] sm:$0xf] }
 0x21d   : > { %695 = vst.msk [vmem:[#allocation4 + $0xc] sm:$0xf] %vm562_vm8, %v692_v13  ;;  %v590_v15 = vpop.permute.xlu1 %589 }
 0x21e   : > { %593 = vst.msk [vmem:[#allocation2 + $0xc] sm:$0xf] %vm562_vm8, %v590_v15 }
 0x21f   : > { %583 = vst.msk [vmem:[#allocation2 + $0x8] sm:$0xf] %vm562_vm8, %v580_v14 }
 0x224   : > { %v713_v21 = vld [vmem:[#allocation4 + $0xc] sm:$0xf] }
 0x225   : > { %v717_v16 = vld [vmem:[#allocation2 + $0xc] sm:$0xf] }
 0x226   : > { %v716_v17 = vld [vmem:[#allocation2 + $0x8] sm:$0xf]  ;;  %v784_v18 = vsel %vm722_vm9, %v717_v16, 0 }
 0x227   : > { %v765_v19 = vsel %vm722_vm9, %v716_v17, 0  ;;  %793 = vmatpush.bf16.xpose.msrb.mxu1 %v784_v18 }
 0x228   : > { %774 = vmatpush.bf16.xpose.msrb.mxu0 %v765_v19 }
 0x22e   : > { %1137 = vmatmul.msk.bf16.vlgmr.msrb.gmra.mxu1 %vm722_vm9, %v713_v21 }
 0x22f   : > { %1136 = vmatmul.msk.bf16.vlgmr.msrb.gmra.mxu0 %vm722_vm9, %v712_v22 }
 0x23d   : > { %v738_v29 = vpop.f32.mrf.mxu2 }
 0x23e   : > { %v739_v30 = vadd.f32 %v738_v29, %v709_v28 }
 0x240   : > { %v799_v36 = vsel %vm722_vm9, %v739_v30, -inf }
 0x245   : > { %v740_v31 = vpop.f32.mrf.mxu2 }
 0x298   : > { %v757_v32 = vpop.f32.mrf.mxu3 }
 0x299   : > { %v758_v33 = vadd.f32 %v757_v32, %v709_v28 }
 0x29b   : > { %v802_v34 = vsel %vm722_vm9, %v758_v33, -inf }
 0x29c   : > { %803 = vmax.xlane.f32.xlu2 %v802_v34 }
 0x2a0   : > { %v759_v35 = vpop.f32.mrf.mxu3 }
 0x2a4   : > { %800 = vmax.xlane.f32.xlu2 %v799_v36 }
 0x2ab   : > { %v795_v37 = vpop.f32.mrf.mxu1 }
 0x2ac   : > { %v776_v38 = vpop.f32.mrf.mxu0  ;;  %v796_v39 = vadd.f32 %v795_v37, %v709_v28 }
 0x2ad   : > { %v777_v40 = vadd.f32 %v776_v38, %v709_v28 }
 0x2ae   : > { %v808_v41 = vsel %vm722_vm9, %v796_v39, -inf }
 0x2af   : > { %809 = vmax.xlane.f32.xlu1 %v808_v41  ;;  %v805_v42 = vsel %vm722_vm9, %v777_v40, -inf }
 0x2b0   : > { %806 = vmax.xlane.f32.xlu0 %v805_v42  ;;  %v1158_v42 = vld [vmem:[%s1598_s9 + $0x8] sm:$0xff] }
 0x2b3   : > { %v797_v43 = vpop.f32.mrf.mxu1 }
 0x2b4   : > { %v778_v44 = vpop.f32.mrf.mxu0  ;;  %v1157_v43 = vld [vmem:[%s1598_s9] sm:$0xff] }
 0x2c4   : > { %574 = vrot.lane.b32.xlu0 %v1509_v60, %s1349_s17  ;;  %s477_s17 = scalar_lea.vmem %s1600_s11, %s1470_s20 }
 0x2c8   : > { %584 = vrot.lane.b32.xlu1 %v1509_v60, %s1350_s23 }
 0x2d0   : > { %565 = vrot.lane.b32.xlu1 %v1509_v60, %s1351_s16 }
 0x30f   : > { %v804_v45 = vpop.xlane.xlu2 %803 }
 0x310   : > { %v812_v56 = vsub.f32 %v758_v33, %v804_v45 }
 0x312   : > { %v817_v58 = vmul.f32 1.442695, %v812_v56 }
 0x317   : > { %v801_v46 = vpop.xlane.xlu2 %800 }
 0x318   : > { %v811_v47 = vsub.f32 %v739_v30, %v801_v46 }
 0x31a   : > { %v815_v48 = vmul.f32 1.442695, %v811_v47 }
 0x31c   : > { %1232 = vpow2.f32 %v815_v48  ;;  %v1225_v48 = vld [vmem:[%s1599_s10] ss:$0 sm:$0xff] }
 0x322   : > { %v1233_v49 = vpop.eup %1232  ;;  %v810_v50 = vpop.xlane.xlu1 %809 }
 0x323   : > { %v814_v51 = vsub.f32 %v796_v39, %v810_v50  ;;  %v807_v52 = vpop.xlane.xlu0 %806  ;;  %v823_v53 = vsel %vm722_vm9, %v1233_v49, 0.0 }
 0x324   : > { %v813_v54 = vsub.f32 %v777_v40, %v807_v52  ;;  %824 = vadd.xlane.f32.xlu1 %v823_v53 }
 0x325   : > { %v821_v55 = vmul.f32 1.442695, %v814_v51 }
 0x326   : > { %v819_v57 = vmul.f32 1.442695, %v813_v54 }
 0x327   : > { %1234 = vpow2.f32 %v821_v55 }
 0x328   : > { %1236 = vpow2.f32 %v819_v57 }
 0x329   : > { %1238 = vpow2.f32 %v817_v58 }
 0x32d   : > { %v1235_v59 = vpop.eup %1234 }
 0x32e   : > { %v1237_v61 = vpop.eup %1236  ;;  %v832_v62 = vsel %vm722_vm9, %v1235_v59, 0.0 }
 0x32f   : > { %833 = vadd.xlane.f32.xlu0 %v832_v62  ;;  %v829_v63 = vsel %vm722_vm9, %v1237_v61, 0.0  ;;  %v1239_v0 = vpop.eup %1238 }
 0x330   : > { %830 = vadd.xlane.f32.xlu2 %v829_v63  ;;  %v826_v3 = vsel %vm722_vm9, %v1239_v0, 0.0 }
 0x336   : > { %v575_v1 = vpop.permute.xlu0 %574 }
 0x337   : > { %578 = vst.msk [vmem:[#allocation3 + $0x4] sm:$0xf] %vm562_vm8, %v575_v1 }
 0x338   : > { %827 = vadd.xlane.f32.xlu2 %v826_v3 }
 0x33a   : > { %v585_v4 = vpop.permute.xlu1 %584 }
 0x33b   : > { %588 = vst.msk [vmem:[#allocation3 + $0x8] sm:$0xf] %vm562_vm8, %v585_v4 }
 0x33e   : > { %v719_v5 = vld [vmem:[#allocation3 + $0x4] sm:$0xf] }
 0x33f   : > { %v871_v6 = vsel %vm850_vm11, %v719_v5, 0 }
 0x340   : > { %880 = vmatpush.bf16.msrb.mxu3 %v871_v6 }
 0x342   : > { %v566_v7 = vpop.permute.xlu1 %565  ;;  %v720_v8 = vld [vmem:[#allocation3 + $0x8] sm:$0xf] }
 0x343   : > { %568 = vst.msk [vmem:[#allocation3] sm:$0xf] %vm562_vm8, %v566_v7  ;;  %v890_v9 = vsel %vm850_vm11, %v720_v8, 0 }
 0x344   : > { %899 = vmatpush.bf16.msra.mxu0 %v890_v9 }
 0x34a   : > { %v718_v10 = vld [vmem:[#allocation3] sm:$0xf] }
 0x34b   : > { %v852_v11 = vsel %vm850_vm11, %v718_v10, 0 }
 0x34c   : > { %861 = vmatpush.bf16.msrb.mxu2 %v852_v11 }
 0x350   : > { %594 = vrot.lane.b32.xlu2 %v1509_v60, %s1352_s22  ;;  %977 = vmatpush.bf16.msra.mxu2 %v1158_v42 }
 0x354   : > { %978 = vmatpush.bf16.msra.mxu2 %v1157_v43 }
 0x397   : > { %v825_v12 = vpop.xlane.xlu1 %824 }
 0x398   : > { %1240 = vrcp.f32 %v825_v12 }
 0x39e   : > { %v1241_v13 = vpop.eup %1240 }
 0x39f   : > { %v839_v14 = vmul.f32 %v1241_v13, %v1233_v49 }
 0x3a1   : > { %v843_v15 = vpack.c.bf16 %v839_v14, %v839_v14 }
 0x3a2   : > { %v834_v21 = vpop.xlane.xlu0 %833 }
 0x3a3   : > { %v831_v16 = vpop.xlane.xlu2 %830  ;;  %1138 = vmatmul.msk.bf16.vlgmr.msrb.gmra.mxu2 %vm722_vm9, %v843_v15 }
 0x3a4   : > { %1242 = vrcp.f32 %v831_v16 }
 0x3aa   : > { %v1243_v17 = vpop.eup %1242 }
 0x3ab   : > { %v841_v18 = vmul.f32 %v1243_v17, %v1237_v61  ;;  %v828_v19 = vpop.xlane.xlu2 %827 }
 0x3ac   : > { %1244 = vrcp.f32 %v828_v19 }
 0x3ad   : > { %v845_v20 = vpack.c.bf16 %v841_v18, %v841_v18  ;;  %1246 = vrcp.f32 %v834_v21 }
 0x3af   : > { %1140 = vmatmul.msk.bf16.vlgmr.msra.gmra.mxu0 %vm722_vm9, %v845_v20 }
 0x3b2   : > { %v1245_v22 = vpop.eup %1244 }
 0x3b3   : > { %v840_v60 = vmul.f32 %v1245_v22, %v1239_v0  ;;  %v595_v23 = vpop.permute.xlu2 %594  ;;  %v1247_v25 = vpop.eup %1246 }
 0x3b4   : > { %598 = vst.msk [vmem:[#allocation3 + $0xc] sm:$0xf] %vm562_vm8, %v595_v23  ;;  %v842_v26 = vmul.f32 %v1247_v25, %v1235_v59 }
 0x3b5   : > { %v844_v24 = vpack.c.bf16 %v840_v60, %v840_v60 }
 0x3b6   : > { %v846_v29 = vpack.c.bf16 %v842_v26, %v842_v26 }
 0x3b7   : > { %1139 = vmatmul.msk.bf16.vlgmr.msrb.gmra.mxu3 %vm722_vm9, %v844_v24 }
 0x3bb   : > { %v721_v27 = vld [vmem:[#allocation3 + $0xc] sm:$0xf] }
 0x3bc   : > { %v909_v28 = vsel %vm850_vm11, %v721_v27, 0 }
 0x3bd   : > { %918 = vmatpush.bf16.msra.mxu1 %v909_v28 }
 0x3c0   : > { %1141 = vmatmul.msk.bf16.vlgmr.msra.gmra.mxu1 %vm722_vm9, %v846_v29 }
 0x426   : > { %v863_v30 = vpop.f32.mrf.mxu2 }
 0x427   : > { %v924_v31 = vpack.c.bf16 %v863_v30, %v863_v30 }
 0x429   : > { %925 = vst.msk [vmem:[#allocation5] sm:$0xf] %vm562_vm8, %v924_v31 }
 0x42c   : > { %v901_v32 = vpop.f32.mrf.mxu0 }
 0x42d   : > { %v933_v33 = vpack.c.bf16 %v901_v32, %v901_v32 }
 0x42e   : > { %v865_v34 = vpop.f32.mrf.mxu2 }
 0x42f   : > { %935 = vrot.lane.b32.xlu2 %v933_v33, %s1353_s24 }
 0x434   : > { %v903_v35 = vpop.f32.mrf.mxu0 }
 0x43a   : > { %v882_v36 = vpop.f32.mrf.mxu3 }
 0x43b   : > { %v926_v37 = vpack.c.bf16 %v882_v36, %v882_v36 }
 0x43d   : > { %928 = vrot.lane.b32.xlu2 %v926_v37, %s1354_s25  ;;  %v920_v38 = vpop.f32.mrf.mxu1 }
 0x43e   : > { %v940_v40 = vpack.c.bf16 %v920_v38, %v920_v38 }
 0x442   : > { %v884_v39 = vpop.f32.mrf.mxu3 }
 0x445   : > { %942 = vrot.lane.b32.xlu2 %v940_v40, %s1355_s26  ;;  %v922_v41 = vpop.f32.mrf.mxu1 }
 0x489   : > { %v936_v44 = vpop.permute.xlu2 %935 }
 0x497   : > { %v929_v45 = vpop.permute.xlu2 %928 }
 0x498   : > { %932 = vst.msk [vmem:[#allocation5] sm:$0xf] %vm931_vm12, %v929_v45 }
 0x499   : > { %939 = vst.msk [vmem:[#allocation5] sm:$0xf] %vm938_vm13, %v936_v44 }
 0x49f   : > { %v943_v46 = vpop.permute.xlu2 %942 }
 0x4a0   : > { %946 = vst.msk [vmem:[#allocation5] sm:$0xf] %vm945_vm14, %v943_v46 }
 0x4a7   : > { %v947_v47 = vld [vmem:[#allocation5] sm:$0xf] }
 0x4a8   : > { %1150 = vmatmul.msk.bf16.vlgmr.msra.gmra.mxu2 %vm486_vm0, %v947_v47 }
 0x52b   : > { %v980_v49 = vpop.f32.mrf.mxu2 }
 0x52c   : > { %v981_v50 = vadd.f32 %v1225_v48, %v980_v49 }
 0x52e   : > { %v984_v51 = vadd.f32 %v981_v50, %v1485_v2 }
 0x530   : > { %985 = vst.msk [vmem:[%s477_s17] sm:$0xff] %vm486_vm0, %v984_v51 }
 0x533   : > { %v982_v52 = vpop.f32.mrf.mxu2 }
 0x534 PF: > { %s23_s19 = sadd.s32 1, %s1338_s19   ;;  %s1603_s17 = smov %s1334_s18 }
 0x535   : > { %p20_p8 = scmp.ge.s32.totalorder %s23_s19, 4   ;;  %s1604_s18 = smov %s1606_s21 }
 0x537   :  { %22 = sbr.rel (!%p20_p8) target bundleno = 3 (0x3), region = 122 }
 0x53c   :  { %1011 = vsyncpa [#allocation7], 1 }
 0x53d   :  { %1013 = vsyncpa [#allocation7 + $0x1], 1 }
 0x53e   :  { %1014 = vsyncpa [#allocation9], 1 }

// kernel: modified_lm_block_forward.4
= control target key start
LH: loop header
LB: loop body
LE: loop exit
PB: predicated region body
PF: predicated region fallthrough
CT: control target
= control target key end

     0   :  { %s2153_s0 = inlined_call_operand.hbm [shape: f32[2,8,32], index: 0, kind: input, shape index: {}]   ;;  %s2154_s1 = inlined_call_operand.hbm [shape: f32[2,16,32], index: 1, kind: input, shape index: {}]   ;;  %s2155_s2 = inlined_call_operand.vmem [shape: f32[1,32], index: 2, kind: input, shape index: {}]   ;;  %s2156_s3 = inlined_call_operand.vmem [shape: f32[1,32], index: 3, kind: input, shape index: {}, may-alias: {3,5,7,9,11}]   ;;  %s2157_s4 = inlined_call_operand.hbm [shape: bf16[32,32], index: 4, kind: input, shape index: {}]   ;;  %s2158_s5 = inlined_call_operand.vmem [shape: f32[1,32], index: 5, kind: input, shape index: {}, may-alias: {3,5,7,9,11}]   ;;  %s2159_s6 = inlined_call_operand.hbm [shape: bf16[32,32], index: 6, kind: input, shape index: {}]   ;;  %s2160_s7 = inlined_call_operand.vmem [shape: f32[1,32], index: 7, kind: input, shape index: {}, may-alias: {3,5,7,9,11}]   ;;  %s2161_s8 = inlined_call_operand.hbm [shape: bf16[32,32], index: 8, kind: input, shape index: {}]   ;;  %s2162_s9 = inlined_call_operand.vmem [shape: f32[1,32], index: 9, kind: input, shape index: {}, may-alias: {3,5,7,9,11}]   ;;  %s2163_s10 = inlined_call_operand.hbm [shape: bf16[32,32], index: 10, kind: input, shape index: {}]   ;;  %s2164_s11 = inlined_call_operand.vmem [shape: f32[1,32], index: 11, kind: input, shape index: {}, may-alias: {3,5,7,9,11}]   ;;  %s2165_s12 = inlined_call_operand.<no memory space> [shape: f32[1,1], index: 12, kind: input, shape index: {}]   ;;  %s2166_s13 = inlined_call_operand.vmem [shape: f32[2,8,32], index: 13, kind: output, shape index: {}]  }
   0x1   :  { %2169 = sst [smem:[#allocation24_spill]] %s2153_s0  ;;  %v18_v0 = vstv %s2165_s12 }
   0x2   :  { %2170 = sst [smem:[#allocation25_spill]] %s2157_s4  ;;  %19 = vst [vmem:[#allocation6] sm:$0x1] %v18_v0 }
   0x3   :  { %2171 = sst [smem:[#allocation26_spill]] %s2159_s6 }
   0x4   :  { %2172 = sst [smem:[#allocation27_spill]] %s2161_s8 }
   0x5   :  { %2173 = sst [smem:[#allocation28_spill]] %s2163_s10 }
   0x6   :  { %2174 = sst [smem:[#allocation29_spill]] %s2164_s11 }
   0x7   :  { %2175 = sst [smem:[#allocation30_spill]] %s2166_s13 }
   0x8   :  { %20 = vsyncpa [#allocation8], 0 }
   0x9   :  { %22 = vsyncpa [#allocation8 + $0x1], 0 }
   0xa   :  { %23 = vsyncpa [#allocation10], 0 }
   0xb   :  { %25 = vsyncpa [#allocation10 + $0x1], 0 }
   0xc   :  { %26 = vsyncpa [#allocation13], 0 }
   0xd   :  { %27 = vsyncpa [#allocation16], 0  ;;  %s1899_s27 = smov 0   ;;  %s1901_s28 = smov 0  }
   0xe   :  { %s1903_s29 = smov 0   ;;  %s1905_s30 = smov 0  }
   0xf   :  { %s1907_s14 = smov 0   ;;  %s1909_s15 = smov 0  }
  0x10 LB: > { %s2167_s12 = sadd.s32 4294967295, %s1808_s15   ;;  %p1306_p0 = scmp.ge.s32.totalorder %s1808_s15, 1  ;;  %s1808_s15 = sphi %s1909_s15, %s33_s15   ;;  %s1804_s14 = sphi %s1907_s14, %s2198_s14   ;;  %s1800_s30 = sphi %s1905_s30, %s2197_s30   ;;  %s1796_s29 = sphi %s1903_s29, %s2196_s29   ;;  %s1792_s28 = sphi %s1901_s28, %s2195_s28   ;;  %s1788_s27 = sphi %s1899_s27, %s2194_s27  }
  0x11   : > { %p1933_p1 = scmp.eq.s32.totalorder %s2167_s12, 0  ;;  %p363_p2 = scmp.lt.s32.totalorder %s1808_s15, 3 }
  0x12   : > { %s2177_s4 = sld [smem:[#allocation25_spill]]  ;;  %s1810_s21 = smov [#allocation11]  }
  0x13   : > { %p1941_p3 = pnand %p1306_p0, %p363_p2  ;;  %s382_s22 = sshll.u32 %s1810_s21, 4  ;;  %s383_s22 = int_to_ptr.vmem [resolvable:$true] %s382_s22 }
  0x14   : > { %s2180_s6 = sld [smem:[#allocation26_spill]]  ;;  %s1811_s17 = smov 64  }
  0x15   : > { %p1440_p4 = pneg %p1941_p3  ;;  %s1812_s18 = smov 4  }
  0x16   : > { %s1813_s21 = smov [#allocation12]   ;;  %s2181_s8 = sld [smem:[#allocation27_spill]] }
  0x17   : > { %p1949_p5 = pnand %p1440_p4, %p1933_p1  ;;  %s399_s12 = sshll.u32 %s1813_s21, 4  ;;  %s400_s12 = int_to_ptr.vmem [resolvable:$true] %s399_s12 }
  0x18   : > { %s380_s19 = sshll.u32 %s2177_s4, 4  ;;  %s2182_s10 = sld [smem:[#allocation28_spill]]  ;;  %s381_s19 = int_to_ptr.hbm [resolvable:$true] %s380_s19 }
  0x19   : > { %1443 = dma.hbm_to_vmem [thread:$0]  (!%p1949_p5), %s381_s19, 256, %s383_s22, [#allocation10], %s1811_s17, %s1811_s17, %s1812_s18  }
  0x1a   : > { %s397_s26 = sshll.u32 %s2180_s6, 4  ;;  %s1814_s22 = smov [#allocation14]   ;;  %s398_s26 = int_to_ptr.hbm [resolvable:$true] %s397_s26 }
  0x1b   : > { %1446 = dma.hbm_to_vmem [thread:$0]  (!%p1949_p5), %s398_s26, 256, %s400_s12, [#allocation13], %s1811_s17, %s1811_s17, %s1812_s18  }
  0x1c   : > { %s414_s11 = sshll.u32 %s2181_s8, 4  ;;  %s416_s21 = sshll.u32 %s1814_s22, 4  ;;  %s415_s11 = int_to_ptr.hbm [resolvable:$true] %s414_s11  ;;  %s417_s21 = int_to_ptr.vmem [resolvable:$true] %s416_s21 }
  0x1d   : > { %1449 = dma.hbm_to_vmem [thread:$0]  (!%p1949_p5), %s415_s11, 256, %s417_s21, [#allocation13], %s1811_s17, %s1811_s17, %s1812_s18  }
  0x1e   : > { %s431_s19 = sshll.u32 %s2182_s10, 4  ;;  %s1815_s4 = smov [#allocation15]   ;;  %s432_s19 = int_to_ptr.hbm [resolvable:$true] %s431_s19 }
  0x1f   : > { %s433_s13 = sshll.u32 %s1815_s4, 4  ;;  %s45_s12 = sadd.s32 1, %s1804_s14  ;;  %s434_s13 = int_to_ptr.vmem [resolvable:$true] %s433_s13 }
  0x20   : > { %1452 = dma.hbm_to_vmem [thread:$0]  (!%p1949_p5), %s432_s19, 256, %s434_s13, [#allocation16], %s1811_s17, %s1811_s17, %s1812_s18  }
  0x21   : > { %s54_s26 = sadd.s32 1, %s1796_s29  ;;  %p47_p6 = scmp.ge.s32.totalorder %s45_s12, 2 }
  0x22   : > { %p61_p7 = scmp.ne.s32.totalorder %s1796_s29, %s1792_s28  ;;  %p62_p8 = scmp.eq.s32.totalorder %s1808_s15, 0 }
  0x23   : > { %p67_p9 = scmp.ne.s32.totalorder %s1792_s28, %s1788_s27  ;;  %s2200_s12 = smov (%p47_p6, %s45_s12), 0 }
  0x24   : > { %2183 = sst [smem:[#allocation22_spill]] %s2200_s12  ;;  %p1979_p10 = por %p62_p8, %p61_p7 }
  0x25   : > { %p1985_p11 = por %p1933_p1, %p67_p9  ;;  %s49_s23 = ssub.s32 %s1804_s14, %s2200_s12 }
  0x26   : > { %p1464_p12 = scmp.lt.s32.totalorder %s1808_s15, 2  ;;  %p52_p13 = scmp.eq.s32.totalorder %s49_s23, 0 }
  0x27   : > { %s453_s17 = sand.u32 1, %s1796_s29   ;;  %s1313_s25 = sshll.u32 %s1804_s14, 3 }
  0x28   : > { %s1312_s18 = sshll.u32 %s453_s17, 3  ;;  %s2187_s0 = sld [smem:[#allocation24_spill]] }
  0x29   : > { %s1994_s27 = scalar_select %p52_p13, %s1796_s29, %s54_s26  }
  0x2a   : > { %s457_s4 = scalar_lea.vmem [#allocation7], %s1312_s18  ;;  %p2002_p0 = pnand %p1464_p12, %p1979_p10 }
  0x2b   : > { %2186 = sst [smem:[#allocation23_spill]] %s1994_s27  ;;  %s466_s13 = sshll.u32 %s457_s4, 4  ;;  %s467_s13 = int_to_ptr.vmem [resolvable:$true] %s466_s13 }
  0x2c   : > { %s1314_s23 = sshll.u32 %s453_s17, 4  ;;  %s1403_s26 = sshll.u32 %s1804_s14, 4 }
  0x2d   : > { %s454_s10 = scalar_lea.sflag [#allocation8], %s453_s17  ;;  %s477_s12 = scalar_lea.vmem [#allocation9], %s1314_s23 }
  0x2e   : > { %s462_s21 = scalar_lea.hbm %s2187_s0, %s1313_s25  ;;  %s485_s19 = sshll.u32 %s477_s12, 4  ;;  %s486_s19 = int_to_ptr.vmem [resolvable:$true] %s485_s19 }
  0x2f   : > { %s464_s6 = sshll.u32 %s462_s21, 4  ;;  %s473_s25 = sand.u32 1, %s1808_s15   ;;  %s465_s6 = int_to_ptr.hbm [resolvable:$true] %s464_s6 }
  0x30   : > { %1456 = dma.hbm_to_vmem [thread:$0]  (!%p2002_p0), %s465_s6, 128, %s467_s13, %s454_s10  }
  0x31   : > { %s482_s21 = scalar_lea.hbm %s2154_s1, %s1403_s26  ;;  %s474_s4 = scalar_lea.sflag [#allocation10], %s473_s25 }
  0x32   : > { %s483_s24 = sshll.u32 %s482_s21, 4  ;;  %s1816_s0 = smov 128   ;;  %s484_s24 = int_to_ptr.hbm [resolvable:$true] %s483_s24 }
  0x33   : > { %s1817_s27 = smov 8   ;;  %497 = sbr.rel (%p1941_p3) target bundleno = 1382 (0x566), region = 72 }
  0x34   : > { %1459 = dma.hbm_to_vmem [thread:$0]  (!%p2002_p0), %s484_s24, 256, %s486_s19, %s474_s4, %s1816_s0, %s1816_s0, %s1817_s27  }
  0x35   : > { %s499_s6 = sand.u32 (!%p1941_p3), 1, %s1792_s28  }
  0x36   : > { %s1318_s10 = sshll.u32 (!%p1941_p3), %s499_s6, 3  ;;  %s500_s12 = scalar_lea.sflag (!%p1941_p3), [#allocation8], %s499_s6 }
  0x37   : > { %s503_s17 = scalar_lea.vmem (!%p1941_p3), [#allocation7], %s1318_s10 }
  0x38   : > { %1767 = dma.done.wait (%p1985_p11), %s500_s12, 128  }
  0x39   : > { %1769 = vsyncadd (%p1985_p11), %s500_s12, 4294967168  ;;  %s2189_s13 = sadd.s32 4294967295, %s1808_s15   ;;  %s1319_s8 = sshll.u32 %s499_s6, 4 }
  0x3a   : > { %s509_s23 = sand.u32 1, %s2189_s13   ;;  %s513_s27 = scalar_lea.vmem [#allocation9], %s1319_s8 }
  0x3b   : > { %s510_s0 = scalar_lea.sflag [#allocation10], %s509_s23 }
  0x3c   : > { %1771 = dma.done.wait (%p1985_p11), %s510_s0, 256  }
  0x3d   : > { %1773 = vsyncadd (%p1985_p11), %s510_s0, 4294967040 }
  0x3e   : > { %1775 = dma.done.wait (%p1933_p1), [#allocation10], 256  }
  0x3f   : > { %1777 = vsyncadd (%p1933_p1), [#allocation10], 4294967040 }
  0x40   : > { %1779 = dma.done.wait (%p1933_p1), [#allocation13], 512  }
  0x41   : > { %1781 = vsyncadd (%p1933_p1), [#allocation13], 4294966784 }
  0x42   : > { %1783 = dma.done.wait (%p1933_p1), [#allocation16], 256  }
  0x43   : > { %1785 = vsyncadd (%p1933_p1), [#allocation16], 4294967040  ;;  %vm619_vm0 = vcmask 261120   ;;  %v2040_v1 = vld [vmem:[%s503_s17] sm:$0xff]  ;;  %v1818_v3 = vmov 32.0   ;;  %v596_v6 = vld [vmem:[%s513_s27] sm:$0xff] }
  0x44   : > { %v742_v2 = vsel %vm619_vm0, %v2040_v1, 0.0  ;;  %1542 = vrcp.f32 %v1818_v3  ;;  %v1405_v4 = vld [vmem:[#allocation12 + $0x8] sm:$0xff]  ;;  %v1404_v5 = vld [vmem:[#allocation12] sm:$0xff]  ;;  %v1409_v20 = vld [vmem:[#allocation11 + $0x8] sm:$0xff]  ;;  %vm673_vm2 = vcmask 60416   ;;  %s1819_s11 = smov 104  }
  0x45   : > { %743 = vadd.xlane.f32.xlu0 %v742_v2  ;;  %629 = vmatpush.bf16.msra.mxu0 %v1405_v4  ;;  %v597_v7 = vld [vmem:[%s513_s27 + $0x8] sm:$0xff]  ;;  %v1408_v21 = vld [vmem:[#allocation11] sm:$0xff]  ;;  %s1820_s26 = smov 120   ;;  %vm860_vm4 = vcmask 64512   ;;  %s1821_s18 = smov 112   ;;  %vm952_vm7 = vcmask 130048  }
  0x46   : > { %v2044_v9 = vpack.c.bf16 %v597_v7, %v596_v6  ;;  %809 = vmatpush.bf16.msra.mxu2 %v1409_v20  ;;  %v1537_v22 = vld [vmem:[%s2160_s7] ss:$0 sm:$0xff]  ;;  %v1407_v49 = vld [vmem:[#allocation14 + $0x8] sm:$0xff]  ;;  %v1406_v50 = vld [vmem:[#allocation14] sm:$0xff]  ;;  %s1822_s12 = smov 8   ;;  %s1823_s17 = smov 24  }
  0x47   : > { %v1535_v39 = vld [vmem:[%s2155_s2] ss:$0 sm:$0xff]  ;;  %663 = vmatpush.bf16.msra.mxu1 %v1407_v49  ;;  %s1824_s13 = smov 16   ;;  %vm1096_vm8 = vcmask 126016   ;;  %vm1103_vm9 = vcmask 191616   ;;  %vm1110_vm10 = vcmask 257216  }
  0x48   : > { %v1536_v43 = vld [vmem:[%s2156_s3] ss:$0 sm:$0xff]  ;;  %p584_p1 = scmp.lt.s32.totalorder %s1800_s30, 1  ;;  %s2190_s0 = sld [smem:[#allocation29_spill]] }
  0x49   : > { %630 = vmatpush.bf16.msra.mxu0 %v1404_v5  ;;  %v1538_v53 = vld [vmem:[%s2158_s5] ss:$0 sm:$0xff] }
  0x4a   : > { %v1543_v8 = vpop.eup %1542  ;;  %810 = vmatpush.bf16.msra.mxu2 %v1408_v21  ;;  %s2202_s30 = smov (!%p584_p1, %s1800_s30), 1 }
  0x4b   : > { %v746_v10 = vmul.f32 32.0, %v1543_v8  ;;  %vm750_vm1 = vweird.f32 %v1543_v8  ;;  %664 = vmatpush.bf16.msra.mxu1 %v1406_v50  ;;  %s1324_s27 = sshll.u32 %s2202_s30, 3 }
  0x4c   : > { %1333 = vmatmul.msk.bf16.vlgmr.msra.gmra.mxu0 %vm619_vm0, %v2044_v9 }
  0x4d   : > { %v747_v11 = vsub.f32 1.0, %v746_v10 }
  0x4e   : > { %1342 = vmatmul.msk.bf16.vlgmr.msra.gmra.mxu1 %vm619_vm0, %v2044_v9 }
  0x4f   : > { %v748_v12 = vmul.f32 %v1543_v8, %v747_v11 }
  0x51   : > { %v749_v13 = vadd.f32 %v1543_v8, %v748_v12 }
  0x53   : > { %v751_v14 = vsel %vm750_vm1, %v1543_v8, %v749_v13  ;;  %v1539_v8 = vld [vmem:[%s2162_s9] ss:$0 sm:$0xff] }
  0xb8   : > { %v744_v15 = vpop.xlane.xlu0 %743 }
  0xb9   : > { %v752_v16 = vmul.f32 %v751_v14, %v744_v15 }
  0xbb   : > { %v753_v17 = vsub.f32 %v2040_v1, %v752_v16 }
  0xbd   : > { %v754_v18 = vmul.f32 %v753_v17, %v753_v17 }
  0xbf   : > { %v755_v19 = vsel %vm619_vm0, %v754_v18, 0.0 }
  0xc0   : > { %756 = vadd.xlane.f32.xlu0 %v755_v19 }
  0xc9   : > { %v632_v23 = vpop.f32.mrf.mxu0 }
  0xca   : > { %v633_v26 = vadd.f32 %v1537_v22, %v632_v23 }
  0xcb   : > { %v666_v9 = vpop.f32.mrf.mxu1 }
  0xcc   : > { %v671_v28 = vpack.c.bf16 %v633_v26, %v633_v26  ;;  %v667_v10 = vadd.f32 %v1539_v8, %v666_v9 }
  0xce   : > { %674 = vst.msk [vmem:[#allocation2] sm:$0xf] %vm673_vm2, %v671_v28  ;;  %720 = vrot.lane.b32.xlu1 %v671_v28, %s1819_s11  ;;  %682 = vrot.lane.b32.xlu2 %v671_v28, %s1820_s26  ;;  %v676_v11 = vpack.c.bf16 %v667_v10, %v667_v10 }
  0xd0   : > { %678 = vst.msk [vmem:[#allocation3] sm:$0xf] %vm673_vm2, %v676_v11 }
  0xd1   : > { %v634_v29 = vpop.f32.mrf.mxu0 }
  0xd2   : > { %v635_v30 = vadd.f32 %v1537_v22, %v634_v29 }
  0xd4   : > { %v672_v31 = vpack.c.bf16 %v635_v30, %v635_v30 }
  0xd6   : > { %675 = vst.msk [vmem:[#allocation2 + $0x4] sm:$0xf] %vm673_vm2, %v672_v31  ;;  %722 = vrot.lane.b32.xlu1 %v672_v31, %s1819_s11  ;;  %684 = vrot.lane.b32.xlu2 %v672_v31, %s1820_s26 }
  0xdd   : > { %v1410_v37 = vld [vmem:[#allocation2] sm:$0xff] }
  0xde   : > { %702 = vrot.lane.b32.xlu1 %v671_v28, %s1821_s18  ;;  %704 = vrot.lane.b32.xlu2 %v672_v31, %s1821_s18  ;;  %v865_v40 = vsel %vm860_vm4, %v1410_v37, 0 }
  0xdf   : > { %874 = vmatpush.bf16.xpose.msra.mxu3 %v865_v40 }
 0x128   : > { %v683_v47 = vpop.permute.xlu2 %682 }
 0x129   : > { %689 = vst.msk [vmem:[#allocation2 + $0x8] sm:$0xf] %vm673_vm2, %v683_v47 }
 0x130   : > { %v685_v51 = vpop.permute.xlu2 %684 }
 0x131   : > { %690 = vst.msk [vmem:[#allocation2 + $0xc] sm:$0xf] %vm673_vm2, %v685_v51 }
 0x133   : > { %v757_v24 = vpop.xlane.xlu0 %756 }
 0x134   : > { %v758_v25 = vmul.f32 %v757_v24, %v751_v14  ;;  %v668_v14 = vpop.f32.mrf.mxu1 }
 0x135   : > { %v669_v15 = vadd.f32 %v1539_v8, %v668_v14 }
 0x136   : > { %v759_v27 = vadd.f32 1e-05, %v758_v25 }
 0x137   : > { %v677_v16 = vpack.c.bf16 %v669_v15, %v669_v15 }
 0x138   : > { %1544 = vrsqrt.f32 %v759_v27  ;;  %vm766_vm5 = vweird.f32 %v759_v27  ;;  %v705_v54 = vpop.permute.xlu2 %704  ;;  %v1411_v56 = vld [vmem:[#allocation2 + $0x8] sm:$0xff] }
 0x139   : > { %710 = vst.msk [vmem:[#allocation2 + $0x14] sm:$0xf] %vm673_vm2, %v705_v54  ;;  %v889_v57 = vsel %vm860_vm4, %v1411_v56, 0 }
 0x13a   : > { %898 = vmatpush.bf16.xpose.msrb.mxu0 %v889_v57  ;;  %679 = vst.msk [vmem:[#allocation3 + $0x4] sm:$0xf] %vm673_vm2, %v677_v16 }
 0x13e   : > { %v1545_v32 = vpop.eup %1544 }
 0x13f   : > { %v761_v33 = vmul.f32 %v1545_v32, %v759_v27  ;;  %vm767_vm3 = vweird.f32 %v1545_v32 }
 0x140   : > { %vm768_vm6 = vmor %vm766_vm5, %vm767_vm3  ;;  %v721_v48 = vpop.permute.xlu1 %720 }
 0x141   : > { %v762_v34 = vmul.f32 %v1545_v32, %v761_v33  ;;  %727 = vst.msk [vmem:[#allocation2 + $0x18] sm:$0xf] %vm673_vm2, %v721_v48  ;;  %v1414_v20 = vld [vmem:[#allocation3] sm:$0xff] }
 0x142   : > { %1017 = vmatpush.bf16.msrb.mxu3 %v1414_v20 }
 0x143   : > { %v763_v35 = vmul.f32 0.5, %v762_v34 }
 0x145   : > { %v764_v36 = vsub.f32 1.5, %v763_v35 }
 0x147   : > { %v765_v38 = vmul.f32 %v1545_v32, %v764_v36 }
 0x148   : > { %v723_v52 = vpop.permute.xlu1 %722 }
 0x149   : > { %v769_v41 = vsel %vm768_vm6, %v1545_v32, %v765_v38  ;;  %728 = vst.msk [vmem:[#allocation2 + $0x1c] sm:$0xf] %vm673_vm2, %v723_v52 }
 0x14a   : > { %v770_v42 = vmul.f32 %v769_v41, %v753_v17 }
 0x14c   : > { %v774_v44 = vmul.f32 %v1535_v39, %v770_v42 }
 0x14e   : > { %v778_v45 = vadd.f32 %v1536_v43, %v774_v44 }
 0x150   : > { %v779_v46 = vpack.c.bf16 %v778_v45, %v778_v45  ;;  %v703_v55 = vpop.permute.xlu1 %702  ;;  %v1413_v2 = vld [vmem:[#allocation2 + $0x18] sm:$0xff] }
 0x151   : > { %709 = vst.msk [vmem:[#allocation2 + $0x10] sm:$0xf] %vm673_vm2, %v703_v55  ;;  %v937_v3 = vsel %vm860_vm4, %v1413_v2, 0 }
 0x152   : > { %1351 = vmatmul.msk.bf16.vlgmr.msra.gmra.mxu2 %vm619_vm0, %v779_v46 }
 0x153   : > { %946 = vmatpush.bf16.xpose.msrb.mxu2 %v937_v3 }
 0x158   : > { %v1412_v61 = vld [vmem:[#allocation2 + $0x10] sm:$0xff] }
 0x159   : > { %v913_v63 = vsel %vm860_vm4, %v1412_v61, 0 }
 0x15a   : > { %922 = vmatpush.bf16.xpose.msrb.mxu1 %v913_v63 }
 0x1d5   : > { %v812_v58 = vpop.f32.mrf.mxu2 }
 0x1d6   : > { %v813_v59 = vadd.f32 %v1538_v53, %v812_v58 }
 0x1d8   : > { %v816_v60 = vpack.c.bf16 %v813_v59, %v813_v59 }
 0x1da   : > { %818 = vst.msk [vmem:[#allocation4] sm:$0xf] %vm673_vm2, %v816_v60  ;;  %830 = vrot.lane.b32.xlu0 %v816_v60, %s1819_s11  ;;  %825 = vrot.lane.b32.xlu2 %v816_v60, %s1821_s18 }
 0x1db   : > { %820 = vrot.lane.b32.xlu1 %v816_v60, %s1820_s26 }
 0x1dd   : > { %v814_v62 = vpop.f32.mrf.mxu2 }
 0x1e1   : > { %v835_v0 = vld [vmem:[#allocation4] sm:$0xf] }
 0x1e2   : > { %1356 = vmatmul.msk.bf16.vlgmr.msra.gmra.mxu3 %vm860_vm4, %v835_v0 }
 0x1e3   : > { %729 = vrot.lane.b32.xlu1 %v676_v11, %s1819_s11 }
 0x234   : > { %v826_v4 = vpop.permute.xlu2 %825 }
 0x235   : > { %829 = vst.msk [vmem:[#allocation4 + $0x8] sm:$0xf] %vm673_vm2, %v826_v4 }
 0x23c   : > { %v837_v5 = vld [vmem:[#allocation4 + $0x8] sm:$0xf] }
 0x23d   : > { %1366 = vmatmul.msk.bf16.vlgmr.msrb.gmra.mxu1 %vm860_vm4, %v837_v5 }
 0x24c   : > { %v831_v6 = vpop.permute.xlu0 %830 }
 0x24d   : > { %834 = vst.msk [vmem:[#allocation4 + $0xc] sm:$0xf] %vm673_vm2, %v831_v6  ;;  %v821_v7 = vpop.permute.xlu1 %820 }
 0x24e   : > { %824 = vst.msk [vmem:[#allocation4 + $0x4] sm:$0xf] %vm673_vm2, %v821_v7 }
 0x254   : > { %v838_v12 = vld [vmem:[#allocation4 + $0xc] sm:$0xf] }
 0x255   : > { %v836_v13 = vld [vmem:[#allocation4 + $0x4] sm:$0xf]  ;;  %1371 = vmatmul.msk.bf16.vlgmr.msrb.gmra.mxu2 %vm860_vm4, %v838_v12  ;;  %v730_v30 = vpop.permute.xlu1 %729 }
 0x256   : > { %1361 = vmatmul.msk.bf16.vlgmr.msrb.gmra.mxu0 %vm860_vm4, %v836_v13  ;;  %736 = vst.msk [vmem:[#allocation3 + $0x18] sm:$0xf] %vm673_vm2, %v730_v30 }
 0x265   : > { %v876_v17 = vpop.f32.mrf.mxu3 }
 0x266   : > { %v953_v18 = vsel %vm952_vm7, %v876_v17, -inf }
 0x267   : > { %954 = vmax.xlane.f32.xlu2 %v953_v18 }
 0x26d   : > { %v878_v19 = vpop.f32.mrf.mxu3 }
 0x2ba   : > { %v924_v21 = vpop.f32.mrf.mxu1 }
 0x2bb   : > { %v959_v22 = vsel %vm952_vm7, %v924_v21, -inf }
 0x2bc   : > { %960 = vmax.xlane.f32.xlu0 %v959_v22 }
 0x2c2   : > { %v926_v23 = vpop.f32.mrf.mxu1 }
 0x2d0   : > { %731 = vrot.lane.b32.xlu0 %v677_v16, %s1819_s11  ;;  %s2191_s11 = sld [smem:[#allocation30_spill]] }
 0x2d3   : > { %v900_v24 = vpop.f32.mrf.mxu0 }
 0x2d4   : > { %v956_v25 = vsel %vm952_vm7, %v900_v24, -inf }
 0x2d5   : > { %957 = vmax.xlane.f32.xlu2 %v956_v25  ;;  %v1418_v25 = vld [vmem:[#allocation15] sm:$0xff] }
 0x2d8   : > { %v948_v26 = vpop.f32.mrf.mxu2  ;;  %695 = vrot.lane.b32.xlu0 %v677_v16, %s1820_s26 }
 0x2d9   : > { %v962_v27 = vsel %vm952_vm7, %v948_v26, -inf }
 0x2da   : > { %963 = vmax.xlane.f32.xlu1 %v962_v27  ;;  %v955_v31 = vpop.xlane.xlu2 %954  ;;  %v1825_v27 = vmov 0  }
 0x2db   : > { %v902_v28 = vpop.f32.mrf.mxu0  ;;  %v965_v32 = vsub.f32 %v876_v17, %v955_v31  ;;  %1533 = vset.pattern.permute.xlu1 %v1825_v27  ;;  %1534 = vset.pattern.permute.xlu0 %v1825_v27 }
 0x2dd   : > { %v969_v33 = vmul.f32 1.442695, %v965_v32  ;;  %v1541_v32 = vld [vmem:[%s2190_s0] ss:$0 sm:$0xff] }
 0x2df   : > { %1546 = vpow2.f32 %v969_v33 }
 0x2e0   : > { %v950_v29 = vpop.f32.mrf.mxu2  ;;  %713 = vrot.lane.b32.xlu0 %v677_v16, %s1821_s18 }
 0x2e5   : > { %v1547_v34 = vpop.eup %1546 }
 0x2e6   : > { %v977_v35 = vsel %vm952_vm7, %v1547_v34, 0.0 }
 0x2ed   : > { %693 = vrot.lane.b32.xlu2 %v676_v11, %s1820_s26  ;;  %s590_s26 = scalar_lea.vmem %s2191_s11, %s1324_s27 }
 0x2f3   : > { %711 = vrot.lane.b32.xlu1 %v676_v11, %s1821_s18 }
 0x30a   : > { %978 = vadd.xlane.f32.xlu0 %v977_v35 }
 0x32f   : > { %v961_v36 = vpop.xlane.xlu0 %960 }
 0x330   : > { %v967_v45 = vsub.f32 %v924_v21, %v961_v36 }
 0x332   : > { %v973_v50 = vmul.f32 1.442695, %v967_v45 }
 0x342   : > { %v732_v37 = vpop.permute.xlu0 %731 }
 0x343   : > { %737 = vst.msk [vmem:[#allocation3 + $0x1c] sm:$0xf] %vm673_vm2, %v732_v37 }
 0x348   : > { %v958_v38 = vpop.xlane.xlu2 %957 }
 0x349   : > { %v966_v39 = vsub.f32 %v900_v24, %v958_v38  ;;  %v1419_v24 = vld [vmem:[#allocation15 + $0x8] sm:$0xff] }
 0x34a   : > { %v696_v40 = vpop.permute.xlu0 %695  ;;  %v1417_v41 = vld [vmem:[#allocation3 + $0x18] sm:$0xff]  ;;  %1142 = vmatpush.bf16.msra.mxu3 %v1419_v24 }
 0x34b   : > { %v971_v42 = vmul.f32 1.442695, %v966_v39  ;;  %701 = vst.msk [vmem:[#allocation3 + $0xc] sm:$0xf] %vm673_vm2, %v696_v40  ;;  %1083 = vmatpush.bf16.msra.mxu2 %v1417_v41 }
 0x34d   : > { %1548 = vpow2.f32 %v971_v42  ;;  %v964_v43 = vpop.xlane.xlu1 %963 }
 0x34e   : > { %v968_v44 = vsub.f32 %v948_v26, %v964_v43  ;;  %1143 = vmatpush.bf16.msra.mxu3 %v1418_v25  ;;  %v1540_v26 = vld [vmem:[#allocation6] ss:$0 sm:$0xff] }
 0x350   : > { %v975_v46 = vmul.f32 1.442695, %v968_v44  ;;  %v694_v47 = vpop.permute.xlu2 %693 }
 0x351   : > { %700 = vst.msk [vmem:[#allocation3 + $0x8] sm:$0xf] %vm673_vm2, %v694_v47 }
 0x352   : > { %1550 = vpow2.f32 %v975_v46  ;;  %v714_v48 = vpop.permute.xlu0 %713 }
 0x353   : > { %v1549_v49 = vpop.eup %1548  ;;  %719 = vst.msk [vmem:[#allocation3 + $0x14] sm:$0xf] %vm673_vm2, %v714_v48  ;;  %1552 = vpow2.f32 %v973_v50 }
 0x354   : > { %v980_v51 = vsel %vm952_vm7, %v1549_v49, 0.0 }
 0x355   : > { %981 = vadd.xlane.f32.xlu1 %v980_v51 }
 0x358   : > { %v1551_v52 = vpop.eup %1550  ;;  %v1415_v53 = vld [vmem:[#allocation3 + $0x8] sm:$0xff] }
 0x359   : > { %v986_v54 = vsel %vm952_vm7, %v1551_v52, 0.0  ;;  %1039 = vmatpush.bf16.msra.mxu0 %v1415_v53  ;;  %v1553_v55 = vpop.eup %1552 }
 0x35a   : > { %987 = vadd.xlane.f32.xlu2 %v986_v54  ;;  %v983_v56 = vsel %vm952_vm7, %v1553_v55, 0.0 }
 0x362   : > { %984 = vadd.xlane.f32.xlu2 %v983_v56 }
 0x365   : > { %v712_v57 = vpop.permute.xlu1 %711 }
 0x366   : > { %718 = vst.msk [vmem:[#allocation3 + $0x10] sm:$0xf] %vm673_vm2, %v712_v57 }
 0x36d   : > { %v1416_v58 = vld [vmem:[#allocation3 + $0x10] sm:$0xff] }
 0x36e   : > { %1061 = vmatpush.bf16.msra.mxu1 %v1416_v58 }
 0x37d   : > { %v979_v59 = vpop.xlane.xlu0 %978 }
 0x37e   : > { %1554 = vrcp.f32 %v979_v59 }
 0x384   : > { %v1555_v60 = vpop.eup %1554 }
 0x385   : > { %v993_v61 = vmul.f32 %v1555_v60, %v1547_v34 }
 0x387   : > { %v997_v62 = vpack.c.bf16 %v993_v61, %v993_v61 }
 0x389   : > { %1376 = vmatmul.msk.bf16.vlgmr.msrb.gmra.mxu3 %vm952_vm7, %v997_v62 }
 0x3c8   : > { %v982_v63 = vpop.xlane.xlu1 %981 }
 0x3c9   : > { %1556 = vrcp.f32 %v982_v63 }
 0x3cd   : > { %v988_v0 = vpop.xlane.xlu2 %987 }
 0x3ce   : > { %1558 = vrcp.f32 %v988_v0 }
 0x3cf   : > { %v1557_v2 = vpop.eup %1556 }
 0x3d0   : > { %v994_v3 = vmul.f32 %v1557_v2, %v1549_v49 }
 0x3d2   : > { %v998_v4 = vpack.c.bf16 %v994_v3, %v994_v3 }
 0x3d4   : > { %v1559_v5 = vpop.eup %1558  ;;  %1381 = vmatmul.msk.bf16.vlgmr.msra.gmra.mxu0 %vm952_vm7, %v998_v4 }
 0x3d5   : > { %v996_v6 = vmul.f32 %v1559_v5, %v1551_v52  ;;  %v985_v7 = vpop.xlane.xlu2 %984 }
 0x3d6   : > { %1560 = vrcp.f32 %v985_v7 }
 0x3d7   : > { %v1000_v8 = vpack.c.bf16 %v996_v6, %v996_v6 }
 0x3d9   : > { %1391 = vmatmul.msk.bf16.vlgmr.msra.gmra.mxu2 %vm952_vm7, %v1000_v8 }
 0x3dc   : > { %v1561_v9 = vpop.eup %1560 }
 0x3dd   : > { %v995_v10 = vmul.f32 %v1561_v9, %v1553_v55 }
 0x3df   : > { %v999_v11 = vpack.c.bf16 %v995_v10, %v995_v10 }
 0x3e1   : > { %1386 = vmatmul.msk.bf16.vlgmr.msra.gmra.mxu1 %vm952_vm7, %v999_v11 }
 0x40c   : > { %v1019_v12 = vpop.f32.mrf.mxu3 }
 0x40d   : > { %v1089_v13 = vpack.c.bf16 %v1019_v12, %v1019_v12 }
 0x40f   : > { %1090 = vst.msk [vmem:[#allocation5] sm:$0xf] %vm673_vm2, %v1089_v13 }
 0x414   : > { %v1021_v14 = vpop.f32.mrf.mxu3 }
 0x451   : > { %v1041_v15 = vpop.f32.mrf.mxu0 }
 0x452   : > { %v1091_v16 = vpack.c.bf16 %v1041_v15, %v1041_v15 }
 0x454   : > { %1093 = vrot.lane.b32.xlu1 %v1091_v16, %s1822_s12 }
 0x459   : > { %v1043_v17 = vpop.f32.mrf.mxu0 }
 0x45c   : > { %v1085_v18 = vpop.f32.mrf.mxu2  ;;  %1153 = vperm.xlu1 %1533, %v1540_v26  }
 0x45d   : > { %v1105_v19 = vpack.c.bf16 %v1085_v18, %v1085_v18 }
 0x45e   : > { %v1063_v20 = vpop.f32.mrf.mxu1 }
 0x45f   : > { %v1098_v21 = vpack.c.bf16 %v1063_v20, %v1063_v20  ;;  %1107 = vrot.lane.b32.xlu0 %v1105_v19, %s1823_s17 }
 0x461   : > { %1100 = vrot.lane.b32.xlu2 %v1098_v21, %s1824_s13 }
 0x464   : > { %v1087_v22 = vpop.f32.mrf.mxu2 }
 0x466   : > { %v1065_v23 = vpop.f32.mrf.mxu1 }
 0x4bb   : > { %v1101_v29 = vpop.permute.xlu2 %1100 }
 0x4c6   : > { %v1094_v28 = vpop.permute.xlu1 %1093 }
 0x4c7   : > { %1097 = vst.msk [vmem:[#allocation5] sm:$0xf] %vm1096_vm8, %v1094_v28 }
 0x4c8   : > { %1104 = vst.msk [vmem:[#allocation5] sm:$0xf] %vm1103_vm9, %v1101_v29 }
 0x4ce   : > { %v1154_v34 = vpop.permute.xlu1 %1153 }
 0x4d1   : > { %v1108_v30 = vpop.permute.xlu0 %1107 }
 0x4d2   : > { %1111 = vst.msk [vmem:[#allocation5] sm:$0xf] %vm1110_vm10, %v1108_v30 }
 0x4d9   : > { %v1112_v31 = vld [vmem:[#allocation5] sm:$0xf] }
 0x4da   : > { %1400 = vmatmul.msk.bf16.vlgmr.msra.gmra.mxu3 %vm619_vm0, %v1112_v31 }
 0x55d   : > { %v1145_v33 = vpop.f32.mrf.mxu3 }
 0x55e   : > { %v1146_v35 = vadd.f32 %v1541_v32, %v1145_v33 }
 0x560   : > { %v1156_v36 = vmul.f32 %v1154_v34, %v1146_v35 }
 0x562   : > { %v1157_v37 = vadd.f32 %v1156_v36, %v2040_v1 }
 0x564   : > { %1158 = vst.msk [vmem:[%s590_s26] sm:$0xff] %vm619_vm0, %v1157_v37 }
 0x565   : > { %v1147_v38 = vpop.f32.mrf.mxu3 }
 0x566 PF: > { %s33_s15 = sadd.s32 1, %s1808_s15   ;;  %s2192_s19 = sld [smem:[#allocation23_spill]] }
 0x567   : > { %p30_p2 = scmp.ge.s32.totalorder %s33_s15, 4   ;;  %s2193_s25 = sld [smem:[#allocation22_spill]] }
 0x568   : > { %s2194_s27 = smov %s1792_s28  ;;  %s2195_s28 = smov %s1796_s29 }
 0x569   : > { %s2197_s30 = smov %s1804_s14  ;;  %32 = sbr.rel (!%p30_p2) target bundleno = 16 (0x10), region = 154 }
 0x56c   : > { %s2196_s29 = smov %s2192_s19 }
 0x56d   : > { %s2198_s14 = smov %s2193_s25 }
 0x56e   :  { %1184 = vsyncpa [#allocation8], 1 }
 0x56f   :  { %1186 = vsyncpa [#allocation8 + $0x1], 1 }
 0x570   :  { %1187 = vsyncpa [#allocation10], 1 }
 0x571   :  { %1189 = vsyncpa [#allocation10 + $0x1], 1 }
 0x572   :  { %1190 = vsyncpa [#allocation13], 1 }
 0x573   :  { %1191 = vsyncpa [#allocation16], 1 }

</bundles_post_ra>
